<compile_context>
chip_gen: v5e
topology: v5e:2x2
jax: 0.10.0
libtpu: 0.0.40
codegen_flags: <defaults>
</compile_context>

<pallas_src>
import functools

import jax
import jax.numpy as jnp
from jax.experimental import pallas as pl
from jax.experimental.pallas import tpu as pltpu


# ----------------------------------------------------------------------------
# Small helpers: device detection, tile / batch-block sizing
# ----------------------------------------------------------------------------

def _device_kind():
    try:
        return jax.devices()[0].device_kind.lower()
    except Exception:
        return ""


def _vmem_limit_bytes(kind):
    """Explicit scoped-VMEM request per chip generation (None = compiler default)."""
    if "v7" in kind:
        return 52 * 1024 * 1024      # v7x: 64 MiB physical -> leave headroom
    if "v5" in kind or "v6" in kind:
        return 100 * 1024 * 1024     # v5e/v5p/v6e: 128 MiB physical, default scoped is small
    return None


def _pick_tile(total, target, aligns):
    """Largest divisor of `total` that is <= target and a multiple of one of `aligns`."""
    for align in aligns:
        best = None
        d = align
        upper = min(total, target)
        while d <= upper:
            if total % d == 0:
                best = d
            d += align
        if best is not None:
            return best
    return total


def _pick_batch_block(B, S, D, F, H, vmem_budget, prefer_split):
    """Pick the per-grid-step batch block from a VMEM budget (and split for v7x dual-TC)."""
    def estimate(bb):
        BS = bb * S
        acts = (bb * S * D * 4          # residual scratch (f32)
                + BS * 3 * D * 4        # fused qkv (f32)
                + 3 * BS * D * 2        # q/k/v head tiles (bf16)
                + 3 * H * bb * S * S * 4  # scores / probs
                + 2 * BS * D * 4        # ctx + attn_out
                + BS * F * 6            # ffn hidden (f32 + bf16)
                + 6 * BS * D * 4)       # misc residual / LN temporaries
        weights = 2 * 2 * (3 * D * D + 2 * D * D + D * D + 2 * D * F)  # double-buffered bf16
        return acts + weights

    divisors = [d for d in range(1, B + 1) if B % d == 0]
    fitting = [d for d in divisors if estimate(d) <= vmem_budget] or [1]
    bb = max(fitting)
    if prefer_split and bb == B and B > 1:
        halves = [d for d in fitting if d <= B // 2]
        if halves:
            bb = max(halves)           # nb >= 2 so both v7x TensorCores get work
    return bb


# ----------------------------------------------------------------------------
# Dense kernel:  o = x @ W + b   (bf16 MXU operands pre-cast in wrapper, f32 accum)
# ----------------------------------------------------------------------------

def dense_kernel(x_ref, w_ref, b_ref, o_ref):
    o_ref[...] = (
        jnp.dot(x_ref[...], w_ref[...], preferred_element_type=jnp.float32)
        + b_ref[...]
    )


def dense(x, w, b):
    """x: (M, K) f32, w: (K, N), b: (N,).  Output f32 (M, N), tiled over M and N."""
    M, K = x.shape
    N = w.shape[1]
    tn = _pick_tile(N, 512, aligns=(256, 128))            # prefer 256-wide tiles (v6e/v7x MXU)
    tm = _pick_tile(M, max(8, M // 2), aligns=(8,))       # >=2 M tiles when possible (dual-TC)
    return pl.pallas_call(
        dense_kernel,
        out_shape=jax.ShapeDtypeStruct((M, N), jnp.float32),
        grid=(M // tm, N // tn),
        in_specs=[
            pl.BlockSpec((tm, K), lambda i, j: (i, 0)),
            pl.BlockSpec((K, tn), lambda i, j: (0, j)),
            pl.BlockSpec((1, tn), lambda i, j: (0, j)),
        ],
        out_specs=pl.BlockSpec((tm, tn), lambda i, j: (i, j)),
        compiler_params=pltpu.CompilerParams(
            dimension_semantics=("parallel", "parallel")),
    )(x.astype(jnp.bfloat16), w.astype(jnp.bfloat16),
      b.reshape(1, -1).astype(jnp.float32))


# ----------------------------------------------------------------------------
# Fused decoder stack kernel: grid = (batch_blocks, num_layers)
# ----------------------------------------------------------------------------

def decoder_stack_kernel(
    x_ref, mem_ref,
    wi_s_ref, bi_s_ref, wo_s_ref, bo_s_ref,      # self-attn: fused QKV, out proj
    wv_c_ref, bv_c_ref, wo_c_ref, bo_c_ref,      # cross-attn: V proj + out proj
    w1_ref, b1_ref, w2_ref, b2_ref,              # feed-forward
    ln1w_ref, ln1b_ref, ln2w_ref, ln2b_ref, ln3w_ref, ln3b_ref,
    o_ref, x_scr,
    *, num_heads,
):
    layer = pl.program_id(1)
    bidx = pl.program_id(0)
    bb, S, D = x_scr.shape
    H = num_heads
    hd = D // H
    BS = bb * S
    G = H * bb                                    # one attention group per (head, sample)
    scale = 1.0 / float(hd) ** 0.5
    bf16 = jnp.bfloat16

    # Residual stream stays resident in VMEM scratch across the layer axis.
    @pl.when(layer == 0)
    def _init():
        x_scr[...] = x_ref[...]

    def layernorm(v, w_r, b_r):
        mu = jnp.mean(v, axis=-1, keepdims=True)
        var = jnp.mean((v - mu) ** 2, axis=-1, keepdims=True)
        return (v - mu) * jax.lax.rsqrt(var + 1e-5) * w_r[0] + b_r[0]

    def mm(a, w, b=None):
        out = jnp.dot(a.astype(bf16), w, preferred_element_type=jnp.float32)
        return out if b is None else out + b

    x = x_scr[...].reshape(BS, D)                                 # f32 (BS, D)

    # ---------------- causal self-attention (per-sample scores) ----------------
    qkv = mm(x, wi_s_ref[0], bi_s_ref[0])                         # (BS, 3D), 128-aligned slices

    def heads(col0, pre_scale=1.0):
        # Static (row, lane) slices -> (G, S, hd) with g = h*bb + b.
        parts = []
        for h in range(H):
            c = col0 + h * hd
            for b in range(bb):
                parts.append(qkv[b * S:(b + 1) * S, c:c + hd])
        t = jnp.stack(parts, axis=0)
        if pre_scale != 1.0:
            t = t * pre_scale
        return t.astype(bf16)

    qh = heads(0, scale)                                          # (G, S, hd)
    kh = heads(D)
    vh = heads(2 * D)

    s = jnp.einsum('gqc,gkc->gqk', qh, kh,
                   preferred_element_type=jnp.float32)            # (G, S, S)
    # causal mask generated in-kernel (no HBM-resident bias): disallow key > query
    rows = jax.lax.broadcasted_iota(jnp.int32, (S, S), 0)
    cols = jax.lax.broadcasted_iota(jnp.int32, (S, S), 1)
    s = s + jnp.where(cols > rows, jnp.float32(-1e30), jnp.float32(0.0))[None]
    s = s - jnp.max(s, axis=-1, keepdims=True)
    p = jnp.exp(s)
    p = p * pl.reciprocal(jnp.sum(p, axis=-1, keepdims=True), approx=True)

    ctx = jnp.einsum('gqk,gkc->gqc', p.astype(bf16), vh,
                     preferred_element_type=jnp.float32)          # (G, S, hd)
    # concat heads per sample, restore (BS, D) row order, then one K=D out-proj matmul
    ctx_cat = jnp.concatenate(
        [jnp.concatenate([ctx[h * bb + b] for h in range(H)], axis=-1)
         for b in range(bb)],
        axis=0)                                                   # (BS, D)
    attn_out = mm(ctx_cat, wo_s_ref[0], bo_s_ref[0])              # (BS, D)
    x = layernorm(x + attn_out, ln1w_ref, ln1b_ref)

    # ---------------- cross-attention over length-1 memory ----------------
    # softmax over a single key is exactly 1 -> context == V(memory); project the (bb, D)
    # rows first, then broadcast over S (exact in eval mode, removes an (S,D)x(D,D) matmul).
    mem = mem_ref[pl.ds(bidx * bb, bb), :]                        # (bb, D)
    v_c = mm(mem, wv_c_ref[0], bv_c_ref[0])                       # (bb, D)
    cross = mm(v_c, wo_c_ref[0], bo_c_ref[0])                     # (bb, D)
    cross_full = jnp.broadcast_to(cross[:, None, :], (bb, S, D)).reshape(BS, D)
    x = layernorm(x + cross_full, ln2w_ref, ln2b_ref)

    # ---------------- feed-forward (ReLU) ----------------
    h1 = jnp.maximum(mm(x, w1_ref[0], b1_ref[0]), 0.0)            # (BS, F)
    ff = mm(h1, w2_ref[0], b2_ref[0])                             # (BS, D)
    x = layernorm(x + ff, ln3w_ref, ln3b_ref)

    x_scr[...] = x.reshape(bb, S, D)

    @pl.when(layer == pl.num_programs(1) - 1)
    def _finalize():
        o_ref[...] = x_scr[...]


def transformer_decoder(x, mem, stacked, num_heads):
    """x: (B, S, D) f32, mem: (B, D) f32, stacked: list of (L, ...) weight arrays."""
    B, S, D = x.shape
    L = stacked[0].shape[0]
    F = stacked[8].shape[-1]                       # w1 is (L, D, F)

    kind = _device_kind()
    limit = _vmem_limit_bytes(kind)
    budget = int(0.7 * (limit if limit is not None else 32 * 1024 * 1024))
    bb = _pick_batch_block(B, S, D, F, num_heads, budget, prefer_split=("v7" in kind))
    nb = B // bb

    def w_spec(w):
        nz = w.ndim - 1
        return pl.BlockSpec((1,) + w.shape[1:],
                            lambda b, l, nz=nz: (l,) + (0,) * nz)

    in_specs = [
        pl.BlockSpec((bb, S, D), lambda b, l: (b, 0, 0)),
        pl.BlockSpec((B, D), lambda b, l: (0, 0)),   # memory rows, sliced in-kernel
    ] + [w_spec(w) for w in stacked]

    cp_kwargs = dict(dimension_semantics=("parallel", "arbitrary"))
    if limit is not None:
        cp_kwargs["vmem_limit_bytes"] = int(limit)

    kernel = functools.partial(decoder_stack_kernel, num_heads=num_heads)
    return pl.pallas_call(
        kernel,
        out_shape=jax.ShapeDtypeStruct((B, S, D), jnp.float32),
        grid=(nb, L),
        in_specs=in_specs,
        out_specs=pl.BlockSpec((bb, S, D), lambda b, l: (b, 0, 0)),
        scratch_shapes=[pltpu.VMEM((bb, S, D), jnp.float32)],
        compiler_params=pltpu.CompilerParams(**cp_kwargs),
    )(x, mem, *stacked)


# ----------------------------------------------------------------------------
# Parameter init (deterministic, synthetic) + stacking for the fused kernel
# ----------------------------------------------------------------------------

def init_params(key, vocab_size, embed_dim, num_layers, ffn_dim=1024, text_dim=768):
    D = embed_dim
    keys = jax.random.split(key, 4 + num_layers)
    params = {
        "image_embed": 0.02 * jax.random.normal(keys[0], (vocab_size, D), jnp.float32),
        "pos_embed": 0.02 * jax.random.normal(keys[1], (1024, D), jnp.float32),
        "text_proj_w": 0.02 * jax.random.normal(keys[2], (text_dim, D), jnp.float32),
        "text_proj_b": jnp.zeros((D,), jnp.float32),
        "out_w": 0.02 * jax.random.normal(keys[3], (D, vocab_size), jnp.float32),
        "out_b": jnp.zeros((vocab_size,), jnp.float32),
        "layers": [],
    }
    for l in range(num_layers):
        lk = jax.random.split(keys[4 + l], 6)
        layer = {
            # in_proj weights pre-transposed to (in, out), column order (q | k | v)
            "wi_s": 0.02 * jax.random.normal(lk[0], (D, 3 * D), jnp.float32),
            "bi_s": jnp.zeros((1, 3 * D), jnp.float32),
            "wo_s": 0.02 * jax.random.normal(lk[1], (D, D), jnp.float32),
            "bo_s": jnp.zeros((1, D), jnp.float32),
            "wi_c": 0.02 * jax.random.normal(lk[2], (D, 3 * D), jnp.float32),
            "bi_c": jnp.zeros((1, 3 * D), jnp.float32),
            "wo_c": 0.02 * jax.random.normal(lk[3], (D, D), jnp.float32),
            "bo_c": jnp.zeros((1, D), jnp.float32),
            "w1": 0.02 * jax.random.normal(lk[4], (D, ffn_dim), jnp.float32),
            "b1": jnp.zeros((1, ffn_dim), jnp.float32),
            "w2": 0.02 * jax.random.normal(lk[5], (ffn_dim, D), jnp.float32),
            "b2": jnp.zeros((1, D), jnp.float32),
            "ln1w": jnp.ones((1, D), jnp.float32), "ln1b": jnp.zeros((1, D), jnp.float32),
            "ln2w": jnp.ones((1, D), jnp.float32), "ln2b": jnp.zeros((1, D), jnp.float32),
            "ln3w": jnp.ones((1, D), jnp.float32), "ln3b": jnp.zeros((1, D), jnp.float32),
        }
        params["layers"].append(layer)
    return params


def stack_layer_params(layers):
    """Stack per-layer weights along a leading L axis; cast matmul weights to bf16;
    keep only the V slice of the cross-attention in_proj (length-1 memory)."""
    D = layers[0]["wi_s"].shape[0]
    bf16 = jnp.bfloat16
    f32 = jnp.float32

    def st(key):
        return jnp.stack([lp[key] for lp in layers], axis=0)

    return [
        st("wi_s").astype(bf16),                              # (L, D, 3D)  fused QKV
        st("bi_s").astype(f32),                               # (L, 1, 3D)
        st("wo_s").astype(bf16),                              # (L, D, D)   out proj
        st("bo_s").astype(f32),                               # (L, 1, D)
        st("wi_c")[:, :, 2 * D:3 * D].astype(bf16),           # (L, D, D)   cross-attn V only
        st("bi_c")[:, :, 2 * D:3 * D].astype(f32),            # (L, 1, D)
        st("wo_c").astype(bf16),                              # (L, D, D)
        st("bo_c").astype(f32),                               # (L, 1, D)
        st("w1").astype(bf16),                                # (L, D, F)
        st("b1").astype(f32),                                 # (L, 1, F)
        st("w2").astype(bf16),                                # (L, F, D)
        st("b2").astype(f32),                                 # (L, 1, D)
        st("ln1w"), st("ln1b"),
        st("ln2w"), st("ln2b"),
        st("ln3w"), st("ln3b"),
    ]


# ----------------------------------------------------------------------------
# Forward pass (glue in JAX, hot path in Pallas)
# ----------------------------------------------------------------------------

def forward(params, image_tokens, text_embedding, num_heads):
    if image_tokens.ndim == 3:
        B, Hh, Ww = image_tokens.shape
        S = Hh * Ww
        tokens = image_tokens.reshape(B, S)
    elif image_tokens.ndim == 2:
        B, S = image_tokens.shape
        tokens = image_tokens
    else:
        raise ValueError(f"Unexpected shape for image_tokens: {image_tokens.shape}")

    D = params["image_embed"].shape[1]

    # Embedding gathers (pure lookup -> JAX glue).
    x = jnp.take(params["image_embed"], tokens, axis=0)                       # (B, S, D)
    pos = params["pos_embed"][:S][None, :, :]                                 # (1, S, D)
    x = (x + pos).astype(jnp.float32)

    # Text conditioning projection (Pallas dense); memory length == 1 -> keep 2-D (B, D).
    mem = dense(text_embedding, params["text_proj_w"], params["text_proj_b"])  # (B, D)

    # Full decoder stack in one fused Pallas call.
    stacked = stack_layer_params(params["layers"])
    x = transformer_decoder(x, mem, stacked, num_heads)

    # Output projection to vocab logits (Pallas dense, M/N-tiled).
    logits = dense(x.reshape(B * S, D), params["out_w"], params["out_b"])
    return logits.reshape(B, S, -1)


# ----------------------------------------------------------------------------
# Demo
# ----------------------------------------------------------------------------

if __name__ == "__main__":
    VOCAB = 256
    EMBED_DIM = 128
    NUM_HEADS = 4
    NUM_LAYERS = 2
    FFN_DIM = 1024     # fixed in the PyTorch module
    TEXT_DIM = 768     # fixed in the PyTorch module

    key = jax.random.PRNGKey(0)
    kp, kt, kx = jax.random.split(key, 3)

    params = init_params(kp, VOCAB, EMBED_DIM, NUM_LAYERS, FFN_DIM, TEXT_DIM)

    # image tokens as a (B, H, W) grid of code indices; text embedding (B, 768)
    image_tokens = jax.random.randint(kx, (2, 4, 4), 0, VOCAB, dtype=jnp.int32)
    text_embedding = jax.random.normal(kt, (2, TEXT_DIM), jnp.float32)

    fwd = jax.jit(functools.partial(forward, num_heads=NUM_HEADS))
    logits = fwd(params, image_tokens, text_embedding)
    logits = jax.block_until_ready(logits)

    assert logits.shape == (2, 16, VOCAB), logits.shape
    assert bool(jnp.all(jnp.isfinite(logits)))
    print("KERNEL_OK")
</pallas_src>

<mosaic_0001>
module attributes {stable_mosaic.version = 11 : i64} {
  func.func @dense_kernel(%arg0: i32, %arg1: i32, %arg2: memref<2x768xbf16, #tpu.memory_space<vmem>>, %arg3: memref<768x128xbf16, #tpu.memory_space<vmem>>, %arg4: memref<1x128xf32, #tpu.memory_space<vmem>>, %arg5: memref<2x128xf32, #tpu.memory_space<vmem>>) attributes {dimension_semantics = [#tpu.dimension_semantics<parallel>, #tpu.dimension_semantics<parallel>], iteration_bounds = array<i64: 1, 1>, scalar_prefetch = 0 : i64, scratch_operands = 0 : i64, tpu.core_type = #tpu.core_type<tc>, window_params = [{transform_indices = @transform_0, window_bounds = array<i64: 2, 768>}, {transform_indices = @transform_1, window_bounds = array<i64: 768, 128>}, {transform_indices = @transform_2, window_bounds = array<i64: 1, 128>}, {transform_indices = @transform_3, window_bounds = array<i64: 2, 128>}]} {
    %c0 = arith.constant 0 : index
    %c0_0 = arith.constant 0 : index
    %0 = vector.load %arg2[%c0, %c0_0] : memref<2x768xbf16, #tpu.memory_space<vmem>>, vector<2x768xbf16>
    %c0_1 = arith.constant 0 : index
    %c0_2 = arith.constant 0 : index
    %1 = vector.load %arg3[%c0_1, %c0_2] : memref<768x128xbf16, #tpu.memory_space<vmem>>, vector<768x128xbf16>
    %cst = arith.constant dense<0.000000e+00> : vector<2x128xf32>
    %2 = tpu.matmul %0, %1, %cst {dimension_numbers = #tpu.dot_dimension_numbers<[1], [0], [0], [1], [0, 0, 1, 1], [], []>} : vector<2x768xbf16>, vector<768x128xbf16>, vector<2x128xf32> -> vector<2x128xf32>
    %c0_3 = arith.constant 0 : index
    %c0_4 = arith.constant 0 : index
    %3 = vector.load %arg4[%c0_3, %c0_4] : memref<1x128xf32, #tpu.memory_space<vmem>>, vector<1x128xf32>
    %4 = vector.broadcast %3 : vector<1x128xf32> to vector<2x128xf32>
    %5 = arith.addf %2, %4 : vector<2x128xf32>
    %c0_5 = arith.constant 0 : index
    %c0_6 = arith.constant 0 : index
    %6 = vector.load %arg5[%c0_5, %c0_6] : memref<2x128xf32, #tpu.memory_space<vmem>>, vector<2x128xf32>
    tpu.vector_store %arg5[%c0_5, %c0_6], %5 {strides = array<i32>} : memref<2x128xf32, #tpu.memory_space<vmem>>, vector<2x128xf32>,
    return
  }
  func.func @transform_0(%arg0: i32, %arg1: i32) -> (i32, i32) {
    %c0_i32 = arith.constant 0 : i32
    %c0_i32_0 = arith.constant 0 : i32
    return %arg0, %c0_i32 : i32, i32
  }
  func.func @transform_1(%arg0: i32, %arg1: i32) -> (i32, i32) {
    %c0_i32 = arith.constant 0 : i32
    %c0_i32_0 = arith.constant 0 : i32
    return %c0_i32, %arg1 : i32, i32
  }
  func.func @transform_2(%arg0: i32, %arg1: i32) -> (i32, i32) {
    %c0_i32 = arith.constant 0 : i32
    %c0_i32_0 = arith.constant 0 : i32
    return %c0_i32, %arg1 : i32, i32
  }
  func.func @transform_3(%arg0: i32, %arg1: i32) -> (i32, i32) {
    %c0_i32 = arith.constant 0 : i32
    return %arg0, %arg1 : i32, i32
  }
}

module attributes {stable_mosaic.version = 11 : i64} {
  func.func @dense_kernel(%arg0: i32, %arg1: i32, %arg2: memref<16x128xbf16, #tpu.memory_space<vmem>>, %arg3: memref<128x256xbf16, #tpu.memory_space<vmem>>, %arg4: memref<1x256xf32, #tpu.memory_space<vmem>>, %arg5: memref<16x256xf32, #tpu.memory_space<vmem>>) attributes {dimension_semantics = [#tpu.dimension_semantics<parallel>, #tpu.dimension_semantics<parallel>], iteration_bounds = array<i64: 2, 1>, scalar_prefetch = 0 : i64, scratch_operands = 0 : i64, tpu.core_type = #tpu.core_type<tc>, window_params = [{transform_indices = @transform_0, window_bounds = array<i64: 16, 128>}, {transform_indices = @transform_1, window_bounds = array<i64: 128, 256>}, {transform_indices = @transform_2, window_bounds = array<i64: 1, 256>}, {transform_indices = @transform_3, window_bounds = array<i64: 16, 256>}]} {
    %c0 = arith.constant 0 : index
    %c0_0 = arith.constant 0 : index
    %0 = vector.load %arg2[%c0, %c0_0] : memref<16x128xbf16, #tpu.memory_space<vmem>>, vector<16x128xbf16>
    %c0_1 = arith.constant 0 : index
    %c0_2 = arith.constant 0 : index
    %1 = vector.load %arg3[%c0_1, %c0_2] : memref<128x256xbf16, #tpu.memory_space<vmem>>, vector<128x256xbf16>
    %cst = arith.constant dense<0.000000e+00> : vector<16x256xf32>
    %2 = tpu.matmul %0, %1, %cst {dimension_numbers = #tpu.dot_dimension_numbers<[1], [0], [0], [1], [0, 0, 1, 1], [], []>} : vector<16x128xbf16>, vector<128x256xbf16>, vector<16x256xf32> -> vector<16x256xf32>
    %c0_3 = arith.constant 0 : index
    %c0_4 = arith.constant 0 : index
    %3 = vector.load %arg4[%c0_3, %c0_4] : memref<1x256xf32, #tpu.memory_space<vmem>>, vector<1x256xf32>
    %4 = vector.broadcast %3 : vector<1x256xf32> to vector<16x256xf32>
    %5 = arith.addf %2, %4 : vector<16x256xf32>
    %c0_5 = arith.constant 0 : index
    %c0_6 = arith.constant 0 : index
    %6 = vector.load %arg5[%c0_5, %c0_6] : memref<16x256xf32, #tpu.memory_space<vmem>>, vector<16x256xf32>
    tpu.vector_store %arg5[%c0_5, %c0_6], %5 {strides = array<i32>} : memref<16x256xf32, #tpu.memory_space<vmem>>, vector<16x256xf32>,
    return
  }
  func.func @transform_0(%arg0: i32, %arg1: i32) -> (i32, i32) {
    %c0_i32 = arith.constant 0 : i32
    %c0_i32_0 = arith.constant 0 : i32
    return %arg0, %c0_i32 : i32, i32
  }
  func.func @transform_1(%arg0: i32, %arg1: i32) -> (i32, i32) {
    %c0_i32 = arith.constant 0 : i32
    %c0_i32_0 = arith.constant 0 : i32
    return %c0_i32, %arg1 : i32, i32
  }
  func.func @transform_2(%arg0: i32, %arg1: i32) -> (i32, i32) {
    %c0_i32 = arith.constant 0 : i32
    %c0_i32_0 = arith.constant 0 : i32
    return %c0_i32, %arg1 : i32, i32
  }
  func.func @transform_3(%arg0: i32, %arg1: i32) -> (i32, i32) {
    %c0_i32 = arith.constant 0 : i32
    return %arg0, %arg1 : i32, i32
  }
}

module attributes {stable_mosaic.version = 11 : i64} {
  func.func @decoder_stack_kernel(%arg0: i32, %arg1: i32, %arg2: memref<2x16x128xf32, #tpu.memory_space<vmem>>, %arg3: memref<2x128xf32, #tpu.memory_space<vmem>>, %arg4: memref<1x128x384xbf16, #tpu.memory_space<vmem>>, %arg5: memref<1x1x384xf32, #tpu.memory_space<vmem>>, %arg6: memref<1x128x128xbf16, #tpu.memory_space<vmem>>, %arg7: memref<1x1x128xf32, #tpu.memory_space<vmem>>, %arg8: memref<1x128x128xbf16, #tpu.memory_space<vmem>>, %arg9: memref<1x1x128xf32, #tpu.memory_space<vmem>>, %arg10: memref<1x128x128xbf16, #tpu.memory_space<vmem>>, %arg11: memref<1x1x128xf32, #tpu.memory_space<vmem>>, %arg12: memref<1x128x1024xbf16, #tpu.memory_space<vmem>>, %arg13: memref<1x1x1024xf32, #tpu.memory_space<vmem>>, %arg14: memref<1x1024x128xbf16, #tpu.memory_space<vmem>>, %arg15: memref<1x1x128xf32, #tpu.memory_space<vmem>>, %arg16: memref<1x1x128xf32, #tpu.memory_space<vmem>>, %arg17: memref<1x1x128xf32, #tpu.memory_space<vmem>>, %arg18: memref<1x1x128xf32, #tpu.memory_space<vmem>>, %arg19: memref<1x1x128xf32, #tpu.memory_space<vmem>>, %arg20: memref<1x1x128xf32, #tpu.memory_space<vmem>>, %arg21: memref<1x1x128xf32, #tpu.memory_space<vmem>>, %arg22: memref<2x16x128xf32, #tpu.memory_space<vmem>>, %arg23: memref<2x16x128xf32, #tpu.memory_space<vmem>>) attributes {dimension_semantics = [#tpu.dimension_semantics<parallel>, #tpu.dimension_semantics<arbitrary>], iteration_bounds = array<i64: 1, 2>, scalar_prefetch = 0 : i64, scratch_operands = 1 : i64, tpu.core_type = #tpu.core_type<tc>, window_params = [{transform_indices = @transform_0, window_bounds = array<i64: 2, 16, 128>}, {pipeline_mode = #tpu.pipeline_mode<synchronous>, transform_indices = @transform_1, window_bounds = array<i64: 2, 128>}, {transform_indices = @transform_2, window_bounds = array<i64: 1, 128, 384>}, {transform_indices = @transform_3, window_bounds = array<i64: 1, 1, 384>}, {transform_indices = @transform_4, window_bounds = array<i64: 1, 128, 128>}, {transform_indices = @transform_5, window_bounds = array<i64: 1, 1, 128>}, {transform_indices = @transform_6, window_bounds = array<i64: 1, 128, 128>}, {transform_indices = @transform_7, window_bounds = array<i64: 1, 1, 128>}, {transform_indices = @transform_8, window_bounds = array<i64: 1, 128, 128>}, {transform_indices = @transform_9, window_bounds = array<i64: 1, 1, 128>}, {transform_indices = @transform_10, window_bounds = array<i64: 1, 128, 1024>}, {transform_indices = @transform_11, window_bounds = array<i64: 1, 1, 1024>}, {transform_indices = @transform_12, window_bounds = array<i64: 1, 1024, 128>}, {transform_indices = @transform_13, window_bounds = array<i64: 1, 1, 128>}, {transform_indices = @transform_14, window_bounds = array<i64: 1, 1, 128>}, {transform_indices = @transform_15, window_bounds = array<i64: 1, 1, 128>}, {transform_indices = @transform_16, window_bounds = array<i64: 1, 1, 128>}, {transform_indices = @transform_17, window_bounds = array<i64: 1, 1, 128>}, {transform_indices = @transform_18, window_bounds = array<i64: 1, 1, 128>}, {transform_indices = @transform_19, window_bounds = array<i64: 1, 1, 128>}, {transform_indices = @transform_20, window_bounds = array<i64: 2, 16, 128>}]} {
    %c0_i32 = arith.constant 0 : i32
    %0 = arith.cmpi eq, %arg1, %c0_i32 : i32
    %1 = arith.extui %0 : i1 to i32
    %c0_i32_0 = arith.constant 0 : i32
    %2 = arith.cmpi ne, %1, %c0_i32_0 : i32
    scf.if %2 {
      %c0_90 = arith.constant 0 : index
      %c0_91 = arith.constant 0 : index
      %c0_92 = arith.constant 0 : index
      %245 = vector.load %arg2[%c0_90, %c0_91, %c0_92] : memref<2x16x128xf32, #tpu.memory_space<vmem>>, vector<2x16x128xf32>
      %c0_93 = arith.constant 0 : index
      %c0_94 = arith.constant 0 : index
      %c0_95 = arith.constant 0 : index
      %246 = vector.load %arg23[%c0_93, %c0_94, %c0_95] : memref<2x16x128xf32, #tpu.memory_space<vmem>>, vector<2x16x128xf32>
      tpu.vector_store %arg23[%c0_93, %c0_94, %c0_95], %245 {strides = array<i32>} : memref<2x16x128xf32, #tpu.memory_space<vmem>>, vector<2x16x128xf32>,
    } else {
    }
    %c0 = arith.constant 0 : index
    %c0_1 = arith.constant 0 : index
    %c0_2 = arith.constant 0 : index
    %3 = vector.load %arg23[%c0, %c0_1, %c0_2] : memref<2x16x128xf32, #tpu.memory_space<vmem>>, vector<2x16x128xf32>
    %4 = vector.shape_cast %3 : vector<2x16x128xf32> to vector<32x128xf32>
    %c0_3 = arith.constant 0 : index
    %c0_4 = arith.constant 0 : index
    %c0_5 = arith.constant 0 : index
    %5 = vector.load %arg4[%c0_3, %c0_4, %c0_5] : memref<1x128x384xbf16, #tpu.memory_space<vmem>>, vector<1x128x384xbf16>
    %6 = vector.shape_cast %5 : vector<1x128x384xbf16> to vector<128x384xbf16>
    %c0_6 = arith.constant 0 : index
    %c0_7 = arith.constant 0 : index
    %c0_8 = arith.constant 0 : index
    %7 = vector.load %arg5[%c0_6, %c0_7, %c0_8] : memref<1x1x384xf32, #tpu.memory_space<vmem>>, vector<1x1x384xf32>
    %8 = vector.shape_cast %7 : vector<1x1x384xf32> to vector<1x384xf32>
    %9 = arith.truncf %4 : vector<32x128xf32> to vector<32x128xbf16>
    %cst = arith.constant dense<0.000000e+00> : vector<32x384xf32>
    %10 = tpu.matmul %9, %6, %cst {dimension_numbers = #tpu.dot_dimension_numbers<[1], [0], [0], [1], [0, 0, 1, 1], [], []>} : vector<32x128xbf16>, vector<128x384xbf16>, vector<32x384xf32> -> vector<32x384xf32>
    %11 = vector.broadcast %8 : vector<1x384xf32> to vector<32x384xf32>
    %12 = arith.addf %10, %11 : vector<32x384xf32>
    %13 = vector.extract_strided_slice %12 {offsets = [0, 0], sizes = [16, 32], strides = [1, 1]} : vector<32x384xf32> to vector<16x32xf32>
    %14 = vector.extract_strided_slice %12 {offsets = [16, 0], sizes = [16, 32], strides = [1, 1]} : vector<32x384xf32> to vector<16x32xf32>
    %15 = vector.extract_strided_slice %12 {offsets = [0, 32], sizes = [16, 32], strides = [1, 1]} : vector<32x384xf32> to vector<16x32xf32>
    %16 = vector.extract_strided_slice %12 {offsets = [16, 32], sizes = [16, 32], strides = [1, 1]} : vector<32x384xf32> to vector<16x32xf32>
    %17 = vector.extract_strided_slice %12 {offsets = [0, 64], sizes = [16, 32], strides = [1, 1]} : vector<32x384xf32> to vector<16x32xf32>
    %18 = vector.extract_strided_slice %12 {offsets = [16, 64], sizes = [16, 32], strides = [1, 1]} : vector<32x384xf32> to vector<16x32xf32>
    %19 = vector.extract_strided_slice %12 {offsets = [0, 96], sizes = [16, 32], strides = [1, 1]} : vector<32x384xf32> to vector<16x32xf32>
    %20 = vector.extract_strided_slice %12 {offsets = [16, 96], sizes = [16, 32], strides = [1, 1]} : vector<32x384xf32> to vector<16x32xf32>
    %21 = vector.shape_cast %13 : vector<16x32xf32> to vector<1x16x32xf32>
    %22 = vector.shape_cast %14 : vector<16x32xf32> to vector<1x16x32xf32>
    %23 = vector.shape_cast %15 : vector<16x32xf32> to vector<1x16x32xf32>
    %24 = vector.shape_cast %16 : vector<16x32xf32> to vector<1x16x32xf32>
    %25 = vector.shape_cast %17 : vector<16x32xf32> to vector<1x16x32xf32>
    %26 = vector.shape_cast %18 : vector<16x32xf32> to vector<1x16x32xf32>
    %27 = vector.shape_cast %19 : vector<16x32xf32> to vector<1x16x32xf32>
    %28 = vector.shape_cast %20 : vector<16x32xf32> to vector<1x16x32xf32>
    %29 = tpu.concatenate %21, %22, %23, %24, %25, %26, %27, %28 in 0 : vector<1x16x32xf32>, vector<1x16x32xf32>, vector<1x16x32xf32>, vector<1x16x32xf32>, vector<1x16x32xf32>, vector<1x16x32xf32>, vector<1x16x32xf32>, vector<1x16x32xf32> -> vector<8x16x32xf32>
    %cst_9 = arith.constant 0.176776692 : f32
    %30 = vector.broadcast %cst_9 : f32 to vector<8x16x32xf32>
    %31 = arith.mulf %29, %30 : vector<8x16x32xf32>
    %32 = arith.truncf %31 : vector<8x16x32xf32> to vector<8x16x32xbf16>
    %33 = vector.extract_strided_slice %12 {offsets = [0, 128], sizes = [16, 32], strides = [1, 1]} : vector<32x384xf32> to vector<16x32xf32>
    %34 = vector.extract_strided_slice %12 {offsets = [16, 128], sizes = [16, 32], strides = [1, 1]} : vector<32x384xf32> to vector<16x32xf32>
    %35 = vector.extract_strided_slice %12 {offsets = [0, 160], sizes = [16, 32], strides = [1, 1]} : vector<32x384xf32> to vector<16x32xf32>
    %36 = vector.extract_strided_slice %12 {offsets = [16, 160], sizes = [16, 32], strides = [1, 1]} : vector<32x384xf32> to vector<16x32xf32>
    %37 = vector.extract_strided_slice %12 {offsets = [0, 192], sizes = [16, 32], strides = [1, 1]} : vector<32x384xf32> to vector<16x32xf32>
    %38 = vector.extract_strided_slice %12 {offsets = [16, 192], sizes = [16, 32], strides = [1, 1]} : vector<32x384xf32> to vector<16x32xf32>
    %39 = vector.extract_strided_slice %12 {offsets = [0, 224], sizes = [16, 32], strides = [1, 1]} : vector<32x384xf32> to vector<16x32xf32>
    %40 = vector.extract_strided_slice %12 {offsets = [16, 224], sizes = [16, 32], strides = [1, 1]} : vector<32x384xf32> to vector<16x32xf32>
    %41 = vector.shape_cast %33 : vector<16x32xf32> to vector<1x16x32xf32>
    %42 = vector.shape_cast %34 : vector<16x32xf32> to vector<1x16x32xf32>
    %43 = vector.shape_cast %35 : vector<16x32xf32> to vector<1x16x32xf32>
    %44 = vector.shape_cast %36 : vector<16x32xf32> to vector<1x16x32xf32>
    %45 = vector.shape_cast %37 : vector<16x32xf32> to vector<1x16x32xf32>
    %46 = vector.shape_cast %38 : vector<16x32xf32> to vector<1x16x32xf32>
    %47 = vector.shape_cast %39 : vector<16x32xf32> to vector<1x16x32xf32>
    %48 = vector.shape_cast %40 : vector<16x32xf32> to vector<1x16x32xf32>
    %49 = tpu.concatenate %41, %42, %43, %44, %45, %46, %47, %48 in 0 : vector<1x16x32xf32>, vector<1x16x32xf32>, vector<1x16x32xf32>, vector<1x16x32xf32>, vector<1x16x32xf32>, vector<1x16x32xf32>, vector<1x16x32xf32>, vector<1x16x32xf32> -> vector<8x16x32xf32>
    %50 = arith.truncf %49 : vector<8x16x32xf32> to vector<8x16x32xbf16>
    %51 = vector.extract_strided_slice %12 {offsets = [0, 256], sizes = [16, 32], strides = [1, 1]} : vector<32x384xf32> to vector<16x32xf32>
    %52 = vector.extract_strided_slice %12 {offsets = [16, 256], sizes = [16, 32], strides = [1, 1]} : vector<32x384xf32> to vector<16x32xf32>
    %53 = vector.extract_strided_slice %12 {offsets = [0, 288], sizes = [16, 32], strides = [1, 1]} : vector<32x384xf32> to vector<16x32xf32>
    %54 = vector.extract_strided_slice %12 {offsets = [16, 288], sizes = [16, 32], strides = [1, 1]} : vector<32x384xf32> to vector<16x32xf32>
    %55 = vector.extract_strided_slice %12 {offsets = [0, 320], sizes = [16, 32], strides = [1, 1]} : vector<32x384xf32> to vector<16x32xf32>
    %56 = vector.extract_strided_slice %12 {offsets = [16, 320], sizes = [16, 32], strides = [1, 1]} : vector<32x384xf32> to vector<16x32xf32>
    %57 = vector.extract_strided_slice %12 {offsets = [0, 352], sizes = [16, 32], strides = [1, 1]} : vector<32x384xf32> to vector<16x32xf32>
    %58 = vector.extract_strided_slice %12 {offsets = [16, 352], sizes = [16, 32], strides = [1, 1]} : vector<32x384xf32> to vector<16x32xf32>
    %59 = vector.shape_cast %51 : vector<16x32xf32> to vector<1x16x32xf32>
    %60 = vector.shape_cast %52 : vector<16x32xf32> to vector<1x16x32xf32>
    %61 = vector.shape_cast %53 : vector<16x32xf32> to vector<1x16x32xf32>
    %62 = vector.shape_cast %54 : vector<16x32xf32> to vector<1x16x32xf32>
    %63 = vector.shape_cast %55 : vector<16x32xf32> to vector<1x16x32xf32>
    %64 = vector.shape_cast %56 : vector<16x32xf32> to vector<1x16x32xf32>
    %65 = vector.shape_cast %57 : vector<16x32xf32> to vector<1x16x32xf32>
    %66 = vector.shape_cast %58 : vector<16x32xf32> to vector<1x16x32xf32>
    %67 = tpu.concatenate %59, %60, %61, %62, %63, %64, %65, %66 in 0 : vector<1x16x32xf32>, vector<1x16x32xf32>, vector<1x16x32xf32>, vector<1x16x32xf32>, vector<1x16x32xf32>, vector<1x16x32xf32>, vector<1x16x32xf32>, vector<1x16x32xf32> -> vector<8x16x32xf32>
    %68 = arith.truncf %67 : vector<8x16x32xf32> to vector<8x16x32xbf16>
    "tpu.trace_start"() <{level = 10 : i32, message = "gqc,gkc->gqk"}> : () -> ()
    %cst_10 = arith.constant dense<0.000000e+00> : vector<8x16x16xf32>
    %69 = tpu.matmul %32, %50, %cst_10 {dimension_numbers = #tpu.dot_dimension_numbers<[2], [2], [1], [1], [0, 0, 0, 1, 1, 1], [0], [0]>} : vector<8x16x32xbf16>, vector<8x16x32xbf16>, vector<8x16x16xf32> -> vector<8x16x16xf32>
    "tpu.trace_stop"() : () -> ()
    %70 = tpu.iota {dimensions = array<i32: 0>} : vector<16x16xi32>
    %71 = tpu.iota {dimensions = array<i32: 1>} : vector<16x16xi32>
    %72 = arith.cmpi sgt, %71, %70 : vector<16x16xi32>
    %cst_11 = arith.constant -1.000000e+30 : f32
    %cst_12 = arith.constant 0.000000e+00 : f32
    %73 = vector.broadcast %cst_11 : f32 to vector<16x16xf32>
    %74 = vector.broadcast %cst_12 : f32 to vector<16x16xf32>
    %75 = arith.select %72, %73, %74 : vector<16x16xi1>, vector<16x16xf32>
    %76 = vector.shape_cast %75 : vector<16x16xf32> to vector<1x16x16xf32>
    %77 = vector.broadcast %76 : vector<1x16x16xf32> to vector<8x16x16xf32>
    %78 = arith.addf %69, %77 : vector<8x16x16xf32>
    %cst_13 = arith.constant dense<0xFF800000> : vector<8x16xf32>
    %79 = vector.multi_reduction <maximumf>, %78, %cst_13 [2] : vector<8x16x16xf32> to vector<8x16xf32>
    %80 = vector.shape_cast %79 : vector<8x16xf32> to vector<8x16x1xf32>
    %81 = vector.broadcast %80 : vector<8x16x1xf32> to vector<8x16x16xf32>
    %82 = arith.subf %78, %81 : vector<8x16x16xf32>
    %83 = math.exp %82 : vector<8x16x16xf32>
    %cst_14 = arith.constant dense<0.000000e+00> : vector<8x16xf32>
    %84 = vector.multi_reduction <add>, %83, %cst_14 [2] : vector<8x16x16xf32> to vector<8x16xf32>
    %85 = vector.shape_cast %84 : vector<8x16xf32> to vector<8x16x1xf32>
    %86 = tpu.reciprocal %85 {approx = true} : vector<8x16x1xf32> -> vector<8x16x1xf32>
    %87 = vector.broadcast %86 : vector<8x16x1xf32> to vector<8x16x16xf32>
    %88 = arith.mulf %83, %87 : vector<8x16x16xf32>
    %89 = arith.truncf %88 : vector<8x16x16xf32> to vector<8x16x16xbf16>
    "tpu.trace_start"() <{level = 10 : i32, message = "gqk,gkc->gqc"}> : () -> ()
    %cst_15 = arith.constant dense<0.000000e+00> : vector<8x16x32xf32>
    %90 = tpu.matmul %89, %68, %cst_15 {dimension_numbers = #tpu.dot_dimension_numbers<[2], [1], [1], [2], [0, 0, 0, 1, 1, 2], [0], [0]>} : vector<8x16x16xbf16>, vector<8x16x32xbf16>, vector<8x16x32xf32> -> vector<8x16x32xf32>
    "tpu.trace_stop"() : () -> ()
    %91 = vector.extract_strided_slice %90 {offsets = [0, 0, 0], sizes = [1, 16, 32], strides = [1, 1, 1]} : vector<8x16x32xf32> to vector<1x16x32xf32>
    %92 = vector.shape_cast %91 : vector<1x16x32xf32> to vector<16x32xf32>
    %93 = vector.extract_strided_slice %90 {offsets = [2, 0, 0], sizes = [1, 16, 32], strides = [1, 1, 1]} : vector<8x16x32xf32> to vector<1x16x32xf32>
    %94 = vector.shape_cast %93 : vector<1x16x32xf32> to vector<16x32xf32>
    %95 = vector.extract_strided_slice %90 {offsets = [4, 0, 0], sizes = [1, 16, 32], strides = [1, 1, 1]} : vector<8x16x32xf32> to vector<1x16x32xf32>
    %96 = vector.shape_cast %95 : vector<1x16x32xf32> to vector<16x32xf32>
    %97 = vector.extract_strided_slice %90 {offsets = [6, 0, 0], sizes = [1, 16, 32], strides = [1, 1, 1]} : vector<8x16x32xf32> to vector<1x16x32xf32>
    %98 = vector.shape_cast %97 : vector<1x16x32xf32> to vector<16x32xf32>
    %99 = tpu.concatenate %92, %94, %96, %98 in 1 : vector<16x32xf32>, vector<16x32xf32>, vector<16x32xf32>, vector<16x32xf32> -> vector<16x128xf32>
    %100 = vector.extract_strided_slice %90 {offsets = [1, 0, 0], sizes = [1, 16, 32], strides = [1, 1, 1]} : vector<8x16x32xf32> to vector<1x16x32xf32>
    %101 = vector.shape_cast %100 : vector<1x16x32xf32> to vector<16x32xf32>
    %102 = vector.extract_strided_slice %90 {offsets = [3, 0, 0], sizes = [1, 16, 32], strides = [1, 1, 1]} : vector<8x16x32xf32> to vector<1x16x32xf32>
    %103 = vector.shape_cast %102 : vector<1x16x32xf32> to vector<16x32xf32>
    %104 = vector.extract_strided_slice %90 {offsets = [5, 0, 0], sizes = [1, 16, 32], strides = [1, 1, 1]} : vector<8x16x32xf32> to vector<1x16x32xf32>
    %105 = vector.shape_cast %104 : vector<1x16x32xf32> to vector<16x32xf32>
    %106 = vector.extract_strided_slice %90 {offsets = [7, 0, 0], sizes = [1, 16, 32], strides = [1, 1, 1]} : vector<8x16x32xf32> to vector<1x16x32xf32>
    %107 = vector.shape_cast %106 : vector<1x16x32xf32> to vector<16x32xf32>
    %108 = tpu.concatenate %101, %103, %105, %107 in 1 : vector<16x32xf32>, vector<16x32xf32>, vector<16x32xf32>, vector<16x32xf32> -> vector<16x128xf32>
    %109 = tpu.concatenate %99, %108 in 0 : vector<16x128xf32>, vector<16x128xf32> -> vector<32x128xf32>
    %c0_16 = arith.constant 0 : index
    %c0_17 = arith.constant 0 : index
    %c0_18 = arith.constant 0 : index
    %110 = vector.load %arg6[%c0_16, %c0_17, %c0_18] : memref<1x128x128xbf16, #tpu.memory_space<vmem>>, vector<1x128x128xbf16>
    %111 = vector.shape_cast %110 : vector<1x128x128xbf16> to vector<128x128xbf16>
    %c0_19 = arith.constant 0 : index
    %c0_20 = arith.constant 0 : index
    %c0_21 = arith.constant 0 : index
    %112 = vector.load %arg7[%c0_19, %c0_20, %c0_21] : memref<1x1x128xf32, #tpu.memory_space<vmem>>, vector<1x1x128xf32>
    %113 = vector.shape_cast %112 : vector<1x1x128xf32> to vector<1x128xf32>
    %114 = arith.truncf %109 : vector<32x128xf32> to vector<32x128xbf16>
    %cst_22 = arith.constant dense<0.000000e+00> : vector<32x128xf32>
    %115 = tpu.matmul %114, %111, %cst_22 {dimension_numbers = #tpu.dot_dimension_numbers<[1], [0], [0], [1], [0, 0, 1, 1], [], []>} : vector<32x128xbf16>, vector<128x128xbf16>, vector<32x128xf32> -> vector<32x128xf32>
    %116 = vector.broadcast %113 : vector<1x128xf32> to vector<32x128xf32>
    %117 = arith.addf %115, %116 : vector<32x128xf32>
    %118 = arith.addf %4, %117 : vector<32x128xf32>
    %cst_23 = arith.constant dense<0.000000e+00> : vector<32xf32>
    %119 = vector.multi_reduction <add>, %118, %cst_23 [1] : vector<32x128xf32> to vector<32xf32>
    %120 = vector.shape_cast %119 : vector<32xf32> to vector<32x1xf32>
    %cst_24 = arith.constant 1.280000e+02 : f32
    %121 = vector.broadcast %cst_24 : f32 to vector<32x1xf32>
    %122 = arith.divf %120, %121 : vector<32x1xf32>
    %123 = vector.broadcast %122 : vector<32x1xf32> to vector<32x128xf32>
    %124 = arith.subf %118, %123 : vector<32x128xf32>
    %125 = arith.mulf %124, %124 : vector<32x128xf32>
    %cst_25 = arith.constant dense<0.000000e+00> : vector<32xf32>
    %126 = vector.multi_reduction <add>, %125, %cst_25 [1] : vector<32x128xf32> to vector<32xf32>
    %127 = vector.shape_cast %126 : vector<32xf32> to vector<32x1xf32>
    %cst_26 = arith.constant 1.280000e+02 : f32
    %128 = vector.broadcast %cst_26 : f32 to vector<32x1xf32>
    %129 = arith.divf %127, %128 : vector<32x1xf32>
    %130 = vector.broadcast %122 : vector<32x1xf32> to vector<32x128xf32>
    %131 = arith.subf %118, %130 : vector<32x128xf32>
    %cst_27 = arith.constant 9.99999974E-6 : f32
    %132 = vector.broadcast %cst_27 : f32 to vector<32x1xf32>
    %133 = arith.addf %129, %132 : vector<32x1xf32>
    %134 = math.rsqrt %133 : vector<32x1xf32>
    %135 = vector.broadcast %134 : vector<32x1xf32> to vector<32x128xf32>
    %136 = arith.mulf %131, %135 : vector<32x128xf32>
    %c0_28 = arith.constant 0 : index
    %c0_29 = arith.constant 0 : index
    %c0_30 = arith.constant 0 : index
    %137 = vector.load %arg16[%c0_28, %c0_29, %c0_30] : memref<1x1x128xf32, #tpu.memory_space<vmem>>, vector<1x1x128xf32>
    %138 = vector.shape_cast %137 : vector<1x1x128xf32> to vector<1x128xf32>
    %139 = vector.broadcast %138 : vector<1x128xf32> to vector<32x128xf32>
    %140 = arith.mulf %136, %139 : vector<32x128xf32>
    %c0_31 = arith.constant 0 : index
    %c0_32 = arith.constant 0 : index
    %c0_33 = arith.constant 0 : index
    %141 = vector.load %arg17[%c0_31, %c0_32, %c0_33] : memref<1x1x128xf32, #tpu.memory_space<vmem>>, vector<1x1x128xf32>
    %142 = vector.shape_cast %141 : vector<1x1x128xf32> to vector<1x128xf32>
    %143 = vector.broadcast %142 : vector<1x128xf32> to vector<32x128xf32>
    %144 = arith.addf %140, %143 : vector<32x128xf32>
    %c2_i32 = arith.constant 2 : i32
    %145 = arith.muli %arg0, %c2_i32 : i32
    %146 = arith.index_cast %145 : i32 to index
    %c0_34 = arith.constant 0 : index
    %147 = vector.load %arg3[%146, %c0_34] : memref<2x128xf32, #tpu.memory_space<vmem>>, vector<2x128xf32>
    %c0_35 = arith.constant 0 : index
    %c0_36 = arith.constant 0 : index
    %c0_37 = arith.constant 0 : index
    %148 = vector.load %arg8[%c0_35, %c0_36, %c0_37] : memref<1x128x128xbf16, #tpu.memory_space<vmem>>, vector<1x128x128xbf16>
    %149 = vector.shape_cast %148 : vector<1x128x128xbf16> to vector<128x128xbf16>
    %c0_38 = arith.constant 0 : index
    %c0_39 = arith.constant 0 : index
    %c0_40 = arith.constant 0 : index
    %150 = vector.load %arg9[%c0_38, %c0_39, %c0_40] : memref<1x1x128xf32, #tpu.memory_space<vmem>>, vector<1x1x128xf32>
    %151 = vector.shape_cast %150 : vector<1x1x128xf32> to vector<1x128xf32>
    %152 = arith.truncf %147 : vector<2x128xf32> to vector<2x128xbf16>
    %cst_41 = arith.constant dense<0.000000e+00> : vector<2x128xf32>
    %153 = tpu.matmul %152, %149, %cst_41 {dimension_numbers = #tpu.dot_dimension_numbers<[1], [0], [0], [1], [0, 0, 1, 1], [], []>} : vector<2x128xbf16>, vector<128x128xbf16>, vector<2x128xf32> -> vector<2x128xf32>
    %154 = vector.broadcast %151 : vector<1x128xf32> to vector<2x128xf32>
    %155 = arith.addf %153, %154 : vector<2x128xf32>
    %c0_42 = arith.constant 0 : index
    %c0_43 = arith.constant 0 : index
    %c0_44 = arith.constant 0 : index
    %156 = vector.load %arg10[%c0_42, %c0_43, %c0_44] : memref<1x128x128xbf16, #tpu.memory_space<vmem>>, vector<1x128x128xbf16>
    %157 = vector.shape_cast %156 : vector<1x128x128xbf16> to vector<128x128xbf16>
    %c0_45 = arith.constant 0 : index
    %c0_46 = arith.constant 0 : index
    %c0_47 = arith.constant 0 : index
    %158 = vector.load %arg11[%c0_45, %c0_46, %c0_47] : memref<1x1x128xf32, #tpu.memory_space<vmem>>, vector<1x1x128xf32>
    %159 = vector.shape_cast %158 : vector<1x1x128xf32> to vector<1x128xf32>
    %160 = arith.truncf %155 : vector<2x128xf32> to vector<2x128xbf16>
    %cst_48 = arith.constant dense<0.000000e+00> : vector<2x128xf32>
    %161 = tpu.matmul %160, %157, %cst_48 {dimension_numbers = #tpu.dot_dimension_numbers<[1], [0], [0], [1], [0, 0, 1, 1], [], []>} : vector<2x128xbf16>, vector<128x128xbf16>, vector<2x128xf32> -> vector<2x128xf32>
    %162 = vector.broadcast %159 : vector<1x128xf32> to vector<2x128xf32>
    %163 = arith.addf %161, %162 : vector<2x128xf32>
    %164 = vector.shape_cast %163 : vector<2x128xf32> to vector<2x1x128xf32>
    %165 = vector.shape_cast %164 : vector<2x1x128xf32> to vector<2x1x128xf32>
    %166 = vector.broadcast %165 : vector<2x1x128xf32> to vector<2x16x128xf32>
    %167 = vector.shape_cast %166 : vector<2x16x128xf32> to vector<32x128xf32>
    %168 = arith.addf %144, %167 : vector<32x128xf32>
    %cst_49 = arith.constant dense<0.000000e+00> : vector<32xf32>
    %169 = vector.multi_reduction <add>, %168, %cst_49 [1] : vector<32x128xf32> to vector<32xf32>
    %170 = vector.shape_cast %169 : vector<32xf32> to vector<32x1xf32>
    %cst_50 = arith.constant 1.280000e+02 : f32
    %171 = vector.broadcast %cst_50 : f32 to vector<32x1xf32>
    %172 = arith.divf %170, %171 : vector<32x1xf32>
    %173 = vector.broadcast %172 : vector<32x1xf32> to vector<32x128xf32>
    %174 = arith.subf %168, %173 : vector<32x128xf32>
    %175 = arith.mulf %174, %174 : vector<32x128xf32>
    %cst_51 = arith.constant dense<0.000000e+00> : vector<32xf32>
    %176 = vector.multi_reduction <add>, %175, %cst_51 [1] : vector<32x128xf32> to vector<32xf32>
    %177 = vector.shape_cast %176 : vector<32xf32> to vector<32x1xf32>
    %cst_52 = arith.constant 1.280000e+02 : f32
    %178 = vector.broadcast %cst_52 : f32 to vector<32x1xf32>
    %179 = arith.divf %177, %178 : vector<32x1xf32>
    %180 = vector.broadcast %172 : vector<32x1xf32> to vector<32x128xf32>
    %181 = arith.subf %168, %180 : vector<32x128xf32>
    %cst_53 = arith.constant 9.99999974E-6 : f32
    %182 = vector.broadcast %cst_53 : f32 to vector<32x1xf32>
    %183 = arith.addf %179, %182 : vector<32x1xf32>
    %184 = math.rsqrt %183 : vector<32x1xf32>
    %185 = vector.broadcast %184 : vector<32x1xf32> to vector<32x128xf32>
    %186 = arith.mulf %181, %185 : vector<32x128xf32>
    %c0_54 = arith.constant 0 : index
    %c0_55 = arith.constant 0 : index
    %c0_56 = arith.constant 0 : index
    %187 = vector.load %arg18[%c0_54, %c0_55, %c0_56] : memref<1x1x128xf32, #tpu.memory_space<vmem>>, vector<1x1x128xf32>
    %188 = vector.shape_cast %187 : vector<1x1x128xf32> to vector<1x128xf32>
    %189 = vector.broadcast %188 : vector<1x128xf32> to vector<32x128xf32>
    %190 = arith.mulf %186, %189 : vector<32x128xf32>
    %c0_57 = arith.constant 0 : index
    %c0_58 = arith.constant 0 : index
    %c0_59 = arith.constant 0 : index
    %191 = vector.load %arg19[%c0_57, %c0_58, %c0_59] : memref<1x1x128xf32, #tpu.memory_space<vmem>>, vector<1x1x128xf32>
    %192 = vector.shape_cast %191 : vector<1x1x128xf32> to vector<1x128xf32>
    %193 = vector.broadcast %192 : vector<1x128xf32> to vector<32x128xf32>
    %194 = arith.addf %190, %193 : vector<32x128xf32>
    %c0_60 = arith.constant 0 : index
    %c0_61 = arith.constant 0 : index
    %c0_62 = arith.constant 0 : index
    %195 = vector.load %arg12[%c0_60, %c0_61, %c0_62] : memref<1x128x1024xbf16, #tpu.memory_space<vmem>>, vector<1x128x1024xbf16>
    %196 = vector.shape_cast %195 : vector<1x128x1024xbf16> to vector<128x1024xbf16>
    %c0_63 = arith.constant 0 : index
    %c0_64 = arith.constant 0 : index
    %c0_65 = arith.constant 0 : index
    %197 = vector.load %arg13[%c0_63, %c0_64, %c0_65] : memref<1x1x1024xf32, #tpu.memory_space<vmem>>, vector<1x1x1024xf32>
    %198 = vector.shape_cast %197 : vector<1x1x1024xf32> to vector<1x1024xf32>
    %199 = arith.truncf %194 : vector<32x128xf32> to vector<32x128xbf16>
    %cst_66 = arith.constant dense<0.000000e+00> : vector<32x1024xf32>
    %200 = tpu.matmul %199, %196, %cst_66 {dimension_numbers = #tpu.dot_dimension_numbers<[1], [0], [0], [1], [0, 0, 1, 1], [], []>} : vector<32x128xbf16>, vector<128x1024xbf16>, vector<32x1024xf32> -> vector<32x1024xf32>
    %201 = vector.broadcast %198 : vector<1x1024xf32> to vector<32x1024xf32>
    %202 = arith.addf %200, %201 : vector<32x1024xf32>
    %cst_67 = arith.constant 0.000000e+00 : f32
    %203 = vector.broadcast %cst_67 : f32 to vector<32x1024xf32>
    %204 = arith.maximumf %202, %203 : vector<32x1024xf32>
    %c0_68 = arith.constant 0 : index
    %c0_69 = arith.constant 0 : index
    %c0_70 = arith.constant 0 : index
    %205 = vector.load %arg14[%c0_68, %c0_69, %c0_70] : memref<1x1024x128xbf16, #tpu.memory_space<vmem>>, vector<1x1024x128xbf16>
    %206 = vector.shape_cast %205 : vector<1x1024x128xbf16> to vector<1024x128xbf16>
    %c0_71 = arith.constant 0 : index
    %c0_72 = arith.constant 0 : index
    %c0_73 = arith.constant 0 : index
    %207 = vector.load %arg15[%c0_71, %c0_72, %c0_73] : memref<1x1x128xf32, #tpu.memory_space<vmem>>, vector<1x1x128xf32>
    %208 = vector.shape_cast %207 : vector<1x1x128xf32> to vector<1x128xf32>
    %209 = arith.truncf %204 : vector<32x1024xf32> to vector<32x1024xbf16>
    %cst_74 = arith.constant dense<0.000000e+00> : vector<32x128xf32>
    %210 = tpu.matmul %209, %206, %cst_74 {dimension_numbers = #tpu.dot_dimension_numbers<[1], [0], [0], [1], [0, 0, 1, 1], [], []>} : vector<32x1024xbf16>, vector<1024x128xbf16>, vector<32x128xf32> -> vector<32x128xf32>
    %211 = vector.broadcast %208 : vector<1x128xf32> to vector<32x128xf32>
    %212 = arith.addf %210, %211 : vector<32x128xf32>
    %213 = arith.addf %194, %212 : vector<32x128xf32>
    %cst_75 = arith.constant dense<0.000000e+00> : vector<32xf32>
    %214 = vector.multi_reduction <add>, %213, %cst_75 [1] : vector<32x128xf32> to vector<32xf32>
    %215 = vector.shape_cast %214 : vector<32xf32> to vector<32x1xf32>
    %cst_76 = arith.constant 1.280000e+02 : f32
    %216 = vector.broadcast %cst_76 : f32 to vector<32x1xf32>
    %217 = arith.divf %215, %216 : vector<32x1xf32>
    %218 = vector.broadcast %217 : vector<32x1xf32> to vector<32x128xf32>
    %219 = arith.subf %213, %218 : vector<32x128xf32>
    %220 = arith.mulf %219, %219 : vector<32x128xf32>
    %cst_77 = arith.constant dense<0.000000e+00> : vector<32xf32>
    %221 = vector.multi_reduction <add>, %220, %cst_77 [1] : vector<32x128xf32> to vector<32xf32>
    %222 = vector.shape_cast %221 : vector<32xf32> to vector<32x1xf32>
    %cst_78 = arith.constant 1.280000e+02 : f32
    %223 = vector.broadcast %cst_78 : f32 to vector<32x1xf32>
    %224 = arith.divf %222, %223 : vector<32x1xf32>
    %225 = vector.broadcast %217 : vector<32x1xf32> to vector<32x128xf32>
    %226 = arith.subf %213, %225 : vector<32x128xf32>
    %cst_79 = arith.constant 9.99999974E-6 : f32
    %227 = vector.broadcast %cst_79 : f32 to vector<32x1xf32>
    %228 = arith.addf %224, %227 : vector<32x1xf32>
    %229 = math.rsqrt %228 : vector<32x1xf32>
    %230 = vector.broadcast %229 : vector<32x1xf32> to vector<32x128xf32>
    %231 = arith.mulf %226, %230 : vector<32x128xf32>
    %c0_80 = arith.constant 0 : index
    %c0_81 = arith.constant 0 : index
    %c0_82 = arith.constant 0 : index
    %232 = vector.load %arg20[%c0_80, %c0_81, %c0_82] : memref<1x1x128xf32, #tpu.memory_space<vmem>>, vector<1x1x128xf32>
    %233 = vector.shape_cast %232 : vector<1x1x128xf32> to vector<1x128xf32>
    %234 = vector.broadcast %233 : vector<1x128xf32> to vector<32x128xf32>
    %235 = arith.mulf %231, %234 : vector<32x128xf32>
    %c0_83 = arith.constant 0 : index
    %c0_84 = arith.constant 0 : index
    %c0_85 = arith.constant 0 : index
    %236 = vector.load %arg21[%c0_83, %c0_84, %c0_85] : memref<1x1x128xf32, #tpu.memory_space<vmem>>, vector<1x1x128xf32>
    %237 = vector.shape_cast %236 : vector<1x1x128xf32> to vector<1x128xf32>
    %238 = vector.broadcast %237 : vector<1x128xf32> to vector<32x128xf32>
    %239 = arith.addf %235, %238 : vector<32x128xf32>
    %240 = vector.shape_cast %239 : vector<32x128xf32> to vector<2x16x128xf32>
    %c0_86 = arith.constant 0 : index
    %c0_87 = arith.constant 0 : index
    %c0_88 = arith.constant 0 : index
    %241 = vector.load %arg23[%c0_86, %c0_87, %c0_88] : memref<2x16x128xf32, #tpu.memory_space<vmem>>, vector<2x16x128xf32>
    tpu.vector_store %arg23[%c0_86, %c0_87, %c0_88], %240 {strides = array<i32>} : memref<2x16x128xf32, #tpu.memory_space<vmem>>, vector<2x16x128xf32>,
    %c1_i32 = arith.constant 1 : i32
    %242 = arith.cmpi eq, %arg1, %c1_i32 : i32
    %243 = arith.extui %242 : i1 to i32
    %c0_i32_89 = arith.constant 0 : i32
    %244 = arith.cmpi ne, %243, %c0_i32_89 : i32
    scf.if %244 {
      %c0_90 = arith.constant 0 : index
      %c0_91 = arith.constant 0 : index
      %c0_92 = arith.constant 0 : index
      %245 = vector.load %arg23[%c0_90, %c0_91, %c0_92] : memref<2x16x128xf32, #tpu.memory_space<vmem>>, vector<2x16x128xf32>
      %c0_93 = arith.constant 0 : index
      %c0_94 = arith.constant 0 : index
      %c0_95 = arith.constant 0 : index
      %246 = vector.load %arg22[%c0_93, %c0_94, %c0_95] : memref<2x16x128xf32, #tpu.memory_space<vmem>>, vector<2x16x128xf32>
      tpu.vector_store %arg22[%c0_93, %c0_94, %c0_95], %245 {strides = array<i32>} : memref<2x16x128xf32, #tpu.memory_space<vmem>>, vector<2x16x128xf32>,
    } else {
    }
    return
  }
  func.func @transform_0(%arg0: i32, %arg1: i32) -> (i32, i32, i32) {
    %c0_i32 = arith.constant 0 : i32
    %c0_i32_0 = arith.constant 0 : i32
    %c0_i32_1 = arith.constant 0 : i32
    return %arg0, %c0_i32, %c0_i32_0 : i32, i32, i32
  }
  func.func @transform_1(%arg0: i32, %arg1: i32) -> (i32, i32) {
    %c0_i32 = arith.constant 0 : i32
    %c0_i32_0 = arith.constant 0 : i32
    %c0_i32_1 = arith.constant 0 : i32
    return %c0_i32, %c0_i32_0 : i32, i32
  }
  func.func @transform_2(%arg0: i32, %arg1: i32) -> (i32, i32, i32) {
    %c0_i32 = arith.constant 0 : i32
    %c0_i32_0 = arith.constant 0 : i32
    %c0_i32_1 = arith.constant 0 : i32
    return %arg1, %c0_i32, %c0_i32_0 : i32, i32, i32
  }
  func.func @transform_3(%arg0: i32, %arg1: i32) -> (i32, i32, i32) {
    %c0_i32 = arith.constant 0 : i32
    %c0_i32_0 = arith.constant 0 : i32
    %c0_i32_1 = arith.constant 0 : i32
    return %arg1, %c0_i32, %c0_i32_0 : i32, i32, i32
  }
  func.func @transform_4(%arg0: i32, %arg1: i32) -> (i32, i32, i32) {
    %c0_i32 = arith.constant 0 : i32
    %c0_i32_0 = arith.constant 0 : i32
    %c0_i32_1 = arith.constant 0 : i32
    return %arg1, %c0_i32, %c0_i32_0 : i32, i32, i32
  }
  func.func @transform_5(%arg0: i32, %arg1: i32) -> (i32, i32, i32) {
    %c0_i32 = arith.constant 0 : i32
    %c0_i32_0 = arith.constant 0 : i32
    %c0_i32_1 = arith.constant 0 : i32
    return %arg1, %c0_i32, %c0_i32_0 : i32, i32, i32
  }
  func.func @transform_6(%arg0: i32, %arg1: i32) -> (i32, i32, i32) {
    %c0_i32 = arith.constant 0 : i32
    %c0_i32_0 = arith.constant 0 : i32
    %c0_i32_1 = arith.constant 0 : i32
    return %arg1, %c0_i32, %c0_i32_0 : i32, i32, i32
  }
  func.func @transform_7(%arg0: i32, %arg1: i32) -> (i32, i32, i32) {
    %c0_i32 = arith.constant 0 : i32
    %c0_i32_0 = arith.constant 0 : i32
    %c0_i32_1 = arith.constant 0 : i32
    return %arg1, %c0_i32, %c0_i32_0 : i32, i32, i32
  }
  func.func @transform_8(%arg0: i32, %arg1: i32) -> (i32, i32, i32) {
    %c0_i32 = arith.constant 0 : i32
    %c0_i32_0 = arith.constant 0 : i32
    %c0_i32_1 = arith.constant 0 : i32
    return %arg1, %c0_i32, %c0_i32_0 : i32, i32, i32
  }
  func.func @transform_9(%arg0: i32, %arg1: i32) -> (i32, i32, i32) {
    %c0_i32 = arith.constant 0 : i32
    %c0_i32_0 = arith.constant 0 : i32
    %c0_i32_1 = arith.constant 0 : i32
    return %arg1, %c0_i32, %c0_i32_0 : i32, i32, i32
  }
  func.func @transform_10(%arg0: i32, %arg1: i32) -> (i32, i32, i32) {
    %c0_i32 = arith.constant 0 : i32
    %c0_i32_0 = arith.constant 0 : i32
    %c0_i32_1 = arith.constant 0 : i32
    return %arg1, %c0_i32, %c0_i32_0 : i32, i32, i32
  }
  func.func @transform_11(%arg0: i32, %arg1: i32) -> (i32, i32, i32) {
    %c0_i32 = arith.constant 0 : i32
    %c0_i32_0 = arith.constant 0 : i32
    %c0_i32_1 = arith.constant 0 : i32
    return %arg1, %c0_i32, %c0_i32_0 : i32, i32, i32
  }
  func.func @transform_12(%arg0: i32, %arg1: i32) -> (i32, i32, i32) {
    %c0_i32 = arith.constant 0 : i32
    %c0_i32_0 = arith.constant 0 : i32
    %c0_i32_1 = arith.constant 0 : i32
    return %arg1, %c0_i32, %c0_i32_0 : i32, i32, i32
  }
  func.func @transform_13(%arg0: i32, %arg1: i32) -> (i32, i32, i32) {
    %c0_i32 = arith.constant 0 : i32
    %c0_i32_0 = arith.constant 0 : i32
    %c0_i32_1 = arith.constant 0 : i32
    return %arg1, %c0_i32, %c0_i32_0 : i32, i32, i32
  }
  func.func @transform_14(%arg0: i32, %arg1: i32) -> (i32, i32, i32) {
    %c0_i32 = arith.constant 0 : i32
    %c0_i32_0 = arith.constant 0 : i32
    %c0_i32_1 = arith.constant 0 : i32
    return %arg1, %c0_i32, %c0_i32_0 : i32, i32, i32
  }
  func.func @transform_15(%arg0: i32, %arg1: i32) -> (i32, i32, i32) {
    %c0_i32 = arith.constant 0 : i32
    %c0_i32_0 = arith.constant 0 : i32
    %c0_i32_1 = arith.constant 0 : i32
    return %arg1, %c0_i32, %c0_i32_0 : i32, i32, i32
  }
  func.func @transform_16(%arg0: i32, %arg1: i32) -> (i32, i32, i32) {
    %c0_i32 = arith.constant 0 : i32
    %c0_i32_0 = arith.constant 0 : i32
    %c0_i32_1 = arith.constant 0 : i32
    return %arg1, %c0_i32, %c0_i32_0 : i32, i32, i32
  }
  func.func @transform_17(%arg0: i32, %arg1: i32) -> (i32, i32, i32) {
    %c0_i32 = arith.constant 0 : i32
    %c0_i32_0 = arith.constant 0 : i32
    %c0_i32_1 = arith.constant 0 : i32
    return %arg1, %c0_i32, %c0_i32_0 : i32, i32, i32
  }
  func.func @transform_18(%arg0: i32, %arg1: i32) -> (i32, i32, i32) {
    %c0_i32 = arith.constant 0 : i32
    %c0_i32_0 = arith.constant 0 : i32
    %c0_i32_1 = arith.constant 0 : i32
    return %arg1, %c0_i32, %c0_i32_0 : i32, i32, i32
  }
  func.func @transform_19(%arg0: i32, %arg1: i32) -> (i32, i32, i32) {
    %c0_i32 = arith.constant 0 : i32
    %c0_i32_0 = arith.constant 0 : i32
    %c0_i32_1 = arith.constant 0 : i32
    return %arg1, %c0_i32, %c0_i32_0 : i32, i32, i32
  }
  func.func @transform_20(%arg0: i32, %arg1: i32) -> (i32, i32, i32) {
    %c0_i32 = arith.constant 0 : i32
    %c0_i32_0 = arith.constant 0 : i32
    %c0_i32_1 = arith.constant 0 : i32
    return %arg0, %c0_i32, %c0_i32_0 : i32, i32, i32
  }
}

</mosaic_0001>

<bundles_post_ra>
// kernel: forward.5
= control target key start
LH: loop header
LB: loop body
LE: loop exit
PB: predicated region body
PF: predicated region fallthrough
CT: control target
= control target key end

     0   :  { %8 = vsyncpa [#allocation3], 0  ;;  %s946_s0 = inlined_call_operand.vmem [shape: bf16[32,128], index: 0, kind: input, shape index: {}]   ;;  %s947_s1 = inlined_call_operand.vmem [shape: bf16[128,256], index: 1, kind: input, shape index: {}]   ;;  %s948_s2 = inlined_call_operand.vmem [shape: f32[1,256], index: 2, kind: input, shape index: {}]   ;;  %s949_s3 = inlined_call_operand.hbm [shape: f32[32,256], index: 3, kind: output, shape index: {}]  }
   0x1   :  { %10 = vsyncpa [#allocation3 + $0x1], 0  ;;  %s751_s12 = smov 0   ;;  %s753_s13 = smov 0  }
   0x2   :  { %s755_s14 = smov 0   ;;  %s757_s15 = smov 0  }
   0x3   :  { %s759_s16 = smov 0   ;;  %s761_s17 = smov 0  }
   0x4 LB: > { %s489_s18 = sadd.s32 4294967295, %s727_s17   ;;  %s490_s19 = sadd.s32 4294967294, %s727_s17   ;;  %s727_s17 = sphi %s761_s17, %s16_s17   ;;  %s723_s16 = sphi %s759_s16, %s956_s16   ;;  %s719_s15 = sphi %s757_s15, %s955_s15   ;;  %s715_s14 = sphi %s755_s14, %s954_s14   ;;  %s711_s13 = sphi %s753_s13, %s953_s13   ;;  %s707_s12 = sphi %s751_s12, %s952_s12  }
   0x5   : > { %s28_s20 = sadd.s32 1, %s723_s16  ;;  %s115_s21 = sadd.s32 1, %s715_s14 }
   0x6   : > { %p30_p0 = scmp.ge.s32.totalorder %s28_s20, 2  ;;  %p125_p1 = scmp.ne.s32.totalorder %s715_s14, %s711_s13 }
   0x7   : > { %p126_p2 = scmp.eq.s32.totalorder %s489_s18, 1  ;;  %p131_p3 = scmp.ne.s32.totalorder %s711_s13, %s707_s12 }
   0x8   : > { %s958_s20 = smov (%p30_p0, %s28_s20), 0  ;;  %p132_p5 = scmp.eq.s32.totalorder %s490_s19, 1 }
   0x9   : > { %p791_p4 = por %p126_p2, %p125_p1  ;;  %s110_s23 = ssub.s32 %s723_s16, %s958_s20 }
   0xa   : > { %p495_p6 = scmp.ge.s32.totalorder %s727_s17, 1  ;;  %p113_p7 = scmp.eq.s32.totalorder %s110_s23, 0 }
   0xb   : > { %p798_p8 = por %p132_p5, %p131_p3  ;;  %p176_p9 = scmp.lt.s32.totalorder %s727_s17, 3 }
   0xc   : > { %s804_s25 = scalar_select %p113_p7, %s715_s14, %s115_s21  }
   0xd   : > { %p177_p10 = pnand %p495_p6, %p176_p9 }
   0xe   : > { %s497_s5 = sshll.u32 (!%p177_p10), %s719_s15, 1  ;;  %s591_s4 = sshll.u32 (!%p177_p10), %s719_s15, 5 }
   0xf   : > { %180 = sbr.rel (%p177_p10) target bundleno = 195 (0xc3), region = 32  ;;  %p210_p11 = scmp.lt.s32.totalorder (!%p177_p10), %s497_s5, 3 }
  0x10   : > { %s385_s9 = scalar_lea.hbm (!%p177_p10), %s949_s3, %s591_s4  ;;  %s669_s26 = scalar_lea.hbm (!%p177_p10), %s949_s3, 64 }
  0x11   : > { %s388_s11 = sshll.u32 (!%p177_p10), %s385_s9, 4  ;;  %s389_s11 = int_to_ptr.hbm [resolvable:$true] %s388_s11 }
  0x12   : > { %s663_s18 = sshra.s32 (!%p177_p10), %s389_s11, 4  ;;  %s664_s18 = int_to_ptr.hbm [resolvable:$true] %s663_s18 }
  0x13   : > { %s665_s19 = scalar_lea.hbm (!%p177_p10), %s664_s18, 32  ;;  %p670_p1 = scmp.lt.s32.totalorder (!%p177_p10), %s664_s18, %s949_s3 }
  0x14   : > { %v561_v0 = vld [vmem:[%s947_s1 + $0x70] sm:$0xf]  ;;  %v589_v1 = vld [vmem:[%s947_s1 + $0x74] sm:$0xf0]  ;;  %v588_v2 = vld [vmem:[%s947_s1 + $0x74] sm:$0xf]  ;;  %p666_p12 = scmp.ne.s32.totalorder %s664_s18, %s665_s19  ;;  %p671_p2 = scmp.lt.s32.totalorder %s669_s26, %s665_s19 }
  0x15   : > { %v562_v3 = vor.u32 %v589_v1, %v561_v0  ;;  %v563_v4 = vld [vmem:[%s947_s1 + $0x78] sm:$0xf0]  ;;  %v553_v5 = vld [vmem:[%s947_s1 + $0x60] sm:$0xf]  ;;  %v587_v6 = vld [vmem:[%s947_s1 + $0x64] sm:$0xf0] }
  0x16   : > { %v566_v7 = vor.u32 %v588_v2, %v563_v4  ;;  %v586_v8 = vld [vmem:[%s947_s1 + $0x64] sm:$0xf]  ;;  %v555_v9 = vld [vmem:[%s947_s1 + $0x68] sm:$0xf0]  ;;  %v554_v10 = vor.u32 %v587_v6, %v553_v5  ;;  %v545_v12 = vld [vmem:[%s947_s1 + $0x50] sm:$0xf]  ;;  %p667_p13 = pnand %p666_p12, %p791_p4  ;;  %p672_p3 = por %p671_p2, %p670_p1 }
  0x17   : > { %338 = vmatpush.bf16.msra.mxu0 %v562_v3  ;;  %v558_v11 = vor.u32 %v586_v8, %v555_v9  ;;  %v585_v13 = vld [vmem:[%s947_s1 + $0x54] sm:$0xf0]  ;;  %v584_v14 = vld [vmem:[%s947_s1 + $0x54] sm:$0xf]  ;;  %v547_v15 = vld [vmem:[%s947_s1 + $0x58] sm:$0xf0] }
  0x18   : > { %352 = vmatpush.bf16.msra.mxu1 %v566_v7  ;;  %v546_v16 = vor.u32 %v585_v13, %v545_v12  ;;  %v550_v17 = vor.u32 %v584_v14, %v547_v15  ;;  %v537_v18 = vld [vmem:[%s947_s1 + $0x40] sm:$0xf]  ;;  %v583_v19 = vld [vmem:[%s947_s1 + $0x44] sm:$0xf0]  ;;  %v582_v20 = vld [vmem:[%s947_s1 + $0x44] sm:$0xf]  ;;  %p668_p0 = pneg %p667_p13 }
  0x19   : > { %v539_v21 = vld [vmem:[%s947_s1 + $0x48] sm:$0xf0]  ;;  %v538_v22 = vor.u32 %v583_v19, %v537_v18  ;;  %v529_v24 = vld [vmem:[%s947_s1 + $0x30] sm:$0xf]  ;;  %v581_v25 = vld [vmem:[%s947_s1 + $0x34] sm:$0xf0] }
  0x1a   : > { %v542_v23 = vor.u32 %v582_v20, %v539_v21  ;;  %v580_v26 = vld [vmem:[%s947_s1 + $0x34] sm:$0xf]  ;;  %v531_v27 = vld [vmem:[%s947_s1 + $0x38] sm:$0xf0]  ;;  %v530_v28 = vor.u32 %v581_v25, %v529_v24  ;;  %v521_v30 = vld [vmem:[%s947_s1 + $0x20] sm:$0xf]  ;;  %p673_p5 = pnand %p672_p3, %p668_p0 }
  0x1b   : > { %339 = vmatpush.bf16.msra.mxu0 %v554_v10  ;;  %v534_v29 = vor.u32 %v580_v26, %v531_v27  ;;  %v579_v31 = vld [vmem:[%s947_s1 + $0x24] sm:$0xf0]  ;;  %v578_v32 = vld [vmem:[%s947_s1 + $0x24] sm:$0xf]  ;;  %v523_v33 = vld [vmem:[%s947_s1 + $0x28] sm:$0xf0] }
  0x1c   : > { %353 = vmatpush.bf16.msra.mxu1 %v558_v11  ;;  %v522_v34 = vor.u32 %v579_v31, %v521_v30  ;;  %v526_v35 = vor.u32 %v578_v32, %v523_v33  ;;  %v513_v36 = vld [vmem:[%s947_s1 + $0x10] sm:$0xf]  ;;  %v577_v37 = vld [vmem:[%s947_s1 + $0x14] sm:$0xf0]  ;;  %s960_s5 = smov (!%p210_p11, %s497_s5), 3 }
  0x1d   : > { %v576_v38 = vld [vmem:[%s947_s1 + $0x14] sm:$0xf]  ;;  %v515_v39 = vld [vmem:[%s947_s1 + $0x18] sm:$0xf0]  ;;  %v514_v40 = vor.u32 %v577_v37, %v513_v36  ;;  %v505_v42 = vld [vmem:[%s947_s1] sm:$0xf] }
  0x1e   : > { %v518_v41 = vor.u32 %v576_v38, %v515_v39  ;;  %v575_v43 = vld [vmem:[%s947_s1 + $0x4] sm:$0xf0]  ;;  %s498_s10 = sshll.u32 %s960_s5, 2  ;;  %v574_v44 = vld [vmem:[%s947_s1 + $0x4] sm:$0xf]  ;;  %s206_s5 = sand.u32 1, %s711_s13  }
  0x1f   : > { %340 = vmatpush.bf16.msra.mxu0 %v546_v16  ;;  %v507_v45 = vld [vmem:[%s947_s1 + $0x8] sm:$0xf0]  ;;  %v506_v46 = vor.u32 %v575_v43, %v505_v42  ;;  %s213_s27 = scalar_lea.vmem %s946_s0, %s498_s10  ;;  %v246_v49 = vld [vmem:[%s948_s2] sm:$0x3]  ;;  %s496_s30 = sshll.u32 %s206_s5, 5 }
  0x20   : > { %354 = vmatpush.bf16.msra.mxu1 %v550_v17  ;;  %v510_v47 = vor.u32 %v574_v44, %v507_v45  ;;  %v573_v48 = vld [vmem:[%s213_s27] sm:$0xff]  ;;  %v248_v50 = vperm.slane %v246_v49, 0  ;;  %v249_v51 = vperm.slane %v246_v49, 1  ;;  %s208_s6 = scalar_lea.vmem [#allocation2], %s496_s30  ;;  %s371_s15 = scalar_lea.sflag [#allocation3], %s206_s5 }
  0x21   : > { %s386_s10 = sshll.u32 %s208_s6, 4  ;;  %s387_s10 = int_to_ptr.vmem [resolvable:$true] %s386_s10 }
  0x23   : > { %341 = vmatpush.bf16.msra.mxu0 %v538_v22 }
  0x24   : > { %355 = vmatpush.bf16.msra.mxu1 %v542_v23 }
  0x27   : > { %342 = vmatpush.bf16.msra.mxu0 %v530_v28 }
  0x28   : > { %356 = vmatpush.bf16.msra.mxu1 %v534_v29 }
  0x2b   : > { %343 = vmatpush.bf16.msra.mxu0 %v522_v34 }
  0x2c   : > { %357 = vmatpush.bf16.msra.mxu1 %v526_v35 }
  0x2f   : > { %344 = vmatpush.bf16.msra.mxu0 %v514_v40 }
  0x30   : > { %358 = vmatpush.bf16.msra.mxu1 %v518_v41 }
  0x33   : > { %345 = vmatpush.bf16.msra.mxu0 %v506_v46 }
  0x34   : > { %359 = vmatpush.bf16.msra.mxu1 %v510_v47 }
  0x36   : > { %346 = vmatmul.bf16.vlgmr.msra.gmra.mxu0 %v573_v48 }
  0x37   : > { %360 = vmatmul.bf16.vlgmr.msra.gmra.mxu1 %v573_v48 }
  0xb3   : > { %v347_v52 = vpop.f32.mrf.mxu0 }
  0xb4   : > { %v348_v53 = vadd.f32 %v347_v52, %v248_v50  ;;  %v361_v54 = vpop.f32.mrf.mxu1 }
  0xb5   : > { %v362_v55 = vadd.f32 %v361_v54, %v249_v51 }
  0xb6   : > { %366 = vst [vmem:[%s208_s6] sm:$0xff] %v348_v53 }
  0xb7   : > { %367 = vst [vmem:[%s208_s6 + $0x8] sm:$0xff] %v362_v55 }
  0xbb   : > { %v349_v56 = vpop.f32.mrf.mxu0 }
  0xbc   : > { %v350_v57 = vadd.f32 %v349_v56, %v248_v50  ;;  %v363_v58 = vpop.f32.mrf.mxu1 }
  0xbd   : > { %v364_v59 = vadd.f32 %v363_v58, %v249_v51 }
  0xbe   : > { %368 = vst [vmem:[%s208_s6 + $0x10] sm:$0xff] %v350_v57 }
  0xbf   : > { %369 = vst [vmem:[%s208_s6 + $0x18] sm:$0xff] %v364_v59 }
  0xc0   : > { %676 = shalt.err (!%p673_p5)
}
  0xc1   : > { %s729_s5 = smov 256   ;;  %s730_s29 = smov 16  }
  0xc2   : > { %592 = dma.vmem_to_hbm [thread:$0]  (%p791_p4), %s387_s10, 512, %s389_s11, %s371_s15, %s729_s5, %s729_s5, %s730_s29  }
  0xc3 PF: > { %p598_p6 = scmp.ge.s32.totalorder %s727_s17, 2  ;;  %s403_s30 = sand.u32 1, %s707_s12  }
  0xc4   : > { %s404_s4 = scalar_lea.sflag [#allocation3], %s403_s30 }
  0xc5   : > { %p595_p7 = pnand %p598_p6, %p798_p8 }
  0xc7   : > { %p596_p9 = pneg %p595_p7 }
  0xc9   : > { %702 = dma.done.wait (%p596_p9), %s404_s4, 512  }
  0xca   : > { %704 = vsyncadd (%p596_p9), %s404_s4, 4294966784  ;;  %s16_s17 = sadd.s32 1, %s727_s17   ;;  %s952_s12 = smov %s711_s13 }
  0xcb   : > { %p13_p10 = scmp.ge.s32.totalorder %s16_s17, 4   ;;  %s953_s13 = smov %s715_s14 }
  0xcc   : > { %s954_s14 = smov %s804_s25  ;;  %s955_s15 = smov %s723_s16 }
  0xcd   : > { %s956_s16 = smov %s958_s20  ;;  %15 = sbr.rel (!%p13_p10) target bundleno = 4 (0x4), region = 73 }
  0xd2   :  { %410 = vsyncpa [#allocation3], 1 }
  0xd3   :  { %412 = vsyncpa [#allocation3 + $0x1], 1 }

// kernel: forward.3
= control target key start
LH: loop header
LB: loop body
LE: loop exit
PB: predicated region body
PF: predicated region fallthrough
CT: control target
= control target key end

     0   :  { %s914_s1 = inlined_call_operand.vmem [shape: bf16[768,128], index: 1, kind: input, shape index: {}]   ;;  %s915_s0 = inlined_call_operand.vmem [shape: bf16[2,768], index: 0, kind: input, shape index: {}]   ;;  %s916_s2 = inlined_call_operand.vmem [shape: f32[1,128], index: 2, kind: input, shape index: {}]   ;;  %s917_s3 = inlined_call_operand.vmem [shape: f32[2,128], index: 3, kind: output, shape index: {}]  }
   0x1   :  { %v699_v0 = vld [vmem:[%s914_s1 + $0x38] sm:$0xff]  ;;  %v698_v2 = vld [vmem:[%s914_s1 + $0x30] sm:$0xff]  ;;  %v697_v8 = vld [vmem:[%s914_s1 + $0x28] sm:$0xff] }
   0x2   :  { %v707_v1 = vld [vmem:[%s914_s1 + $0x78] sm:$0xff]  ;;  %417 = vmatpush.bf16.msra.mxu0 %v699_v0  ;;  %v706_v3 = vld [vmem:[%s914_s1 + $0x70] sm:$0xff]  ;;  %v705_v9 = vld [vmem:[%s914_s1 + $0x68] sm:$0xff] }
   0x3   :  { %430 = vmatpush.bf16.msra.mxu1 %v707_v1  ;;  %v715_v4 = vld [vmem:[%s914_s1 + $0xb8] sm:$0xff]  ;;  %v714_v6 = vld [vmem:[%s914_s1 + $0xb0] sm:$0xff]  ;;  %v713_v10 = vld [vmem:[%s914_s1 + $0xa8] sm:$0xff] }
   0x4   :  { %v723_v5 = vld [vmem:[%s914_s1 + $0xf8] sm:$0xff]  ;;  %443 = vmatpush.bf16.msra.mxu2 %v715_v4  ;;  %v722_v7 = vld [vmem:[%s914_s1 + $0xf0] sm:$0xff]  ;;  %v721_v11 = vld [vmem:[%s914_s1 + $0xe8] sm:$0xff] }
   0x5   :  { %456 = vmatpush.bf16.msra.mxu3 %v723_v5  ;;  %v696_v12 = vld [vmem:[%s914_s1 + $0x20] sm:$0xff]  ;;  %v695_v17 = vld [vmem:[%s914_s1 + $0x18] sm:$0xff]  ;;  %v694_v21 = vld [vmem:[%s914_s1 + $0x10] sm:$0xff] }
   0x6   :  { %418 = vmatpush.bf16.msra.mxu0 %v698_v2  ;;  %v704_v13 = vld [vmem:[%s914_s1 + $0x60] sm:$0xff]  ;;  %v703_v18 = vld [vmem:[%s914_s1 + $0x58] sm:$0xff]  ;;  %v702_v22 = vld [vmem:[%s914_s1 + $0x50] sm:$0xff] }
   0x7   :  { %431 = vmatpush.bf16.msra.mxu1 %v706_v3  ;;  %v14_v14 = vld [vmem:[%s915_s0] sm:$0x3f]  ;;  %v711_v19 = vld [vmem:[%s914_s1 + $0x98] sm:$0xff]  ;;  %v710_v23 = vld [vmem:[%s914_s1 + $0x90] sm:$0xff] }
   0x8   :  { %444 = vmatpush.bf16.msra.mxu2 %v714_v6  ;;  %v712_v15 = vld [vmem:[%s914_s1 + $0xa0] sm:$0xff]  ;;  %116 = vst [vmem:[#allocation1] ss:$9 sm:$0xff] %v14_v14  ;;  %v719_v20 = vld [vmem:[%s914_s1 + $0xd8] sm:$0xff]  ;;  %v718_v24 = vld [vmem:[%s914_s1 + $0xd0] sm:$0xff] }
   0x9   :  { %457 = vmatpush.bf16.msra.mxu3 %v722_v7  ;;  %v720_v16 = vld [vmem:[%s914_s1 + $0xe0] sm:$0xff]  ;;  %v693_v25 = vld [vmem:[%s914_s1 + $0x8] sm:$0xff]  ;;  %v731_v31 = vld [vmem:[%s914_s1 + $0x138] sm:$0xff] }
   0xa   :  { %419 = vmatpush.bf16.msra.mxu0 %v697_v8  ;;  %v701_v26 = vld [vmem:[%s914_s1 + $0x48] sm:$0xff]  ;;  %v692_v29 = vld [vmem:[%s914_s1] sm:$0xff]  ;;  %v739_v32 = vld [vmem:[%s914_s1 + $0x178] sm:$0xff] }
   0xb   :  { %432 = vmatpush.bf16.msra.mxu1 %v705_v9  ;;  %v709_v27 = vld [vmem:[%s914_s1 + $0x88] sm:$0xff]  ;;  %v700_v30 = vld [vmem:[%s914_s1 + $0x40] sm:$0xff]  ;;  %v730_v37 = vld [vmem:[%s914_s1 + $0x130] sm:$0xff] }
   0xc   :  { %445 = vmatpush.bf16.msra.mxu2 %v713_v10  ;;  %v717_v28 = vld [vmem:[%s914_s1 + $0xc8] sm:$0xff]  ;;  %v708_v33 = vld [vmem:[%s914_s1 + $0x80] sm:$0xff]  ;;  %v738_v38 = vld [vmem:[%s914_s1 + $0x170] sm:$0xff] }
   0xd   :  { %458 = vmatpush.bf16.msra.mxu3 %v721_v11  ;;  %v716_v34 = vld [vmem:[%s914_s1 + $0xc0] sm:$0xff]  ;;  %v729_v41 = vld [vmem:[%s914_s1 + $0x128] sm:$0xff]  ;;  %v727_v45 = vld [vmem:[%s914_s1 + $0x118] sm:$0xff] }
   0xe   :  { %420 = vmatpush.bf16.msra.mxu0 %v696_v12  ;;  %v737_v42 = vld [vmem:[%s914_s1 + $0x168] sm:$0xff]  ;;  %v728_v43 = vld [vmem:[%s914_s1 + $0x120] sm:$0xff]  ;;  %v735_v46 = vld [vmem:[%s914_s1 + $0x158] sm:$0xff] }
   0xf   :  { %433 = vmatpush.bf16.msra.mxu1 %v704_v13  ;;  %v117_v35 = vld [vmem:[#allocation1] sm:$0xff]  ;;  %v118_v36 = vld [vmem:[#allocation1 + $0x9] sm:$0xff]  ;;  %v119_v39 = vld [vmem:[#allocation1 + $0x12] sm:$0xff] }
  0x10   :  { %446 = vmatpush.bf16.msra.mxu2 %v712_v15  ;;  %v120_v40 = vld [vmem:[#allocation1 + $0x1b] sm:$0xff]  ;;  %v726_v47 = vld [vmem:[%s914_s1 + $0x110] sm:$0xff]  ;;  %v725_v49 = vld [vmem:[%s914_s1 + $0x108] sm:$0xff] }
  0x11   :  { %459 = vmatpush.bf16.msra.mxu3 %v720_v16  ;;  %v736_v44 = vld [vmem:[%s914_s1 + $0x160] sm:$0xff]  ;;  %v734_v48 = vld [vmem:[%s914_s1 + $0x150] sm:$0xff]  ;;  %v733_v50 = vld [vmem:[%s914_s1 + $0x148] sm:$0xff] }
  0x12   :  { %421 = vmatpush.bf16.msra.mxu0 %v695_v17  ;;  %v724_v51 = vld [vmem:[%s914_s1 + $0x100] sm:$0xff]  ;;  %v122_v54 = vld [vmem:[#allocation1 + $0x2d] sm:$0xff] }
  0x13   :  { %434 = vmatpush.bf16.msra.mxu1 %v703_v18  ;;  %v732_v52 = vld [vmem:[%s914_s1 + $0x140] sm:$0xff] }
  0x14   :  { %447 = vmatpush.bf16.msra.mxu2 %v711_v19  ;;  %v121_v53 = vld [vmem:[#allocation1 + $0x24] sm:$0xff]  ;;  %v740_v61 = vld [vmem:[%s916_s2] ss:$0 sm:$0xff] }
  0x15   :  { %460 = vmatpush.bf16.msra.mxu3 %v719_v20 }
  0x16   :  { %422 = vmatpush.bf16.msra.mxu0 %v694_v21 }
  0x17   :  { %435 = vmatpush.bf16.msra.mxu1 %v702_v22 }
  0x18   :  { %448 = vmatpush.bf16.msra.mxu2 %v710_v23 }
  0x19   :  { %461 = vmatpush.bf16.msra.mxu3 %v718_v24 }
  0x1a   :  { %423 = vmatpush.bf16.msra.mxu0 %v693_v25 }
  0x1b   :  { %436 = vmatpush.bf16.msra.mxu1 %v701_v26 }
  0x1c   :  { %449 = vmatpush.bf16.msra.mxu2 %v709_v27 }
  0x1d   :  { %462 = vmatpush.bf16.msra.mxu3 %v717_v28 }
  0x1e   :  { %424 = vmatpush.bf16.msra.mxu0 %v692_v29 }
  0x1f   :  { %437 = vmatpush.bf16.msra.mxu1 %v700_v30 }
  0x20   :  { %450 = vmatpush.bf16.msra.mxu2 %v708_v33 }
  0x21   :  { %463 = vmatpush.bf16.msra.mxu3 %v716_v34  ;;  %425 = vmatmul.bf16.vlgmr.msra.gmra.mxu0 %v117_v35 }
  0x22   :  { %469 = vmatpush.bf16.msrb.mxu0 %v731_v31  ;;  %438 = vmatmul.bf16.vlgmr.msra.gmra.mxu1 %v118_v36 }
  0x23   :  { %482 = vmatpush.bf16.msrb.mxu1 %v739_v32  ;;  %451 = vmatmul.bf16.vlgmr.msra.gmra.mxu2 %v119_v39 }
  0x24   :  { %464 = vmatmul.bf16.vlgmr.msra.gmra.mxu3 %v120_v40 }
  0x26   :  { %470 = vmatpush.bf16.msrb.mxu0 %v730_v37 }
  0x27   :  { %483 = vmatpush.bf16.msrb.mxu1 %v738_v38 }
  0x2a   :  { %471 = vmatpush.bf16.msrb.mxu0 %v729_v41 }
  0x2b   :  { %484 = vmatpush.bf16.msrb.mxu1 %v737_v42 }
  0x2e   :  { %472 = vmatpush.bf16.msrb.mxu0 %v728_v43 }
  0x2f   :  { %485 = vmatpush.bf16.msrb.mxu1 %v736_v44 }
  0x32   :  { %473 = vmatpush.bf16.msrb.mxu0 %v727_v45 }
  0x33   :  { %486 = vmatpush.bf16.msrb.mxu1 %v735_v46 }
  0x36   :  { %474 = vmatpush.bf16.msrb.mxu0 %v726_v47 }
  0x37   :  { %487 = vmatpush.bf16.msrb.mxu1 %v734_v48 }
  0x3a   :  { %475 = vmatpush.bf16.msrb.mxu0 %v725_v49 }
  0x3b   :  { %488 = vmatpush.bf16.msrb.mxu1 %v733_v50 }
  0x3e   :  { %476 = vmatpush.bf16.msrb.mxu0 %v724_v51 }
  0x3f   :  { %489 = vmatpush.bf16.msrb.mxu1 %v732_v52 }
  0x41   :  { %477 = vmatmul.bf16.vlgmr.msrb.gmra.mxu0 %v121_v53 }
  0x42   :  { %490 = vmatmul.bf16.vlgmr.msrb.gmra.mxu1 %v122_v54 }
  0x9e   :  { %v426_v55 = vpop.f32.mrf.mxu0 }
  0x9f   :  { %v439_v56 = vpop.f32.mrf.mxu1  ;;  %v427_v62 = vadd.f32 %v740_v61, %v426_v55 }
  0xa1   :  { %v440_v1 = vadd.f32 %v439_v56, %v427_v62 }
  0xa6   :  { %v428_v57 = vpop.f32.mrf.mxu0  ;;  %v452_v59 = vpop.f32.mrf.mxu2 }
  0xa7   :  { %v441_v58 = vpop.f32.mrf.mxu1  ;;  %v465_v60 = vpop.f32.mrf.mxu3  ;;  %v453_v2 = vadd.f32 %v452_v59, %v440_v1 }
  0xa9   :  { %v466_v3 = vadd.f32 %v465_v60, %v453_v2 }
  0xae   :  { %v454_v63 = vpop.f32.mrf.mxu2 }
  0xaf   :  { %v467_v0 = vpop.f32.mrf.mxu3 }
  0xbe   :  { %v478_v4 = vpop.f32.mrf.mxu0 }
  0xbf   :  { %v491_v5 = vpop.f32.mrf.mxu1  ;;  %v479_v6 = vadd.f32 %v478_v4, %v466_v3 }
  0xc1   :  { %v492_v7 = vadd.f32 %v491_v5, %v479_v6 }
  0xc3   :  { %495 = vst [vmem:[%s917_s3] sm:$0x3] %v492_v7 }
  0xc6   :  { %v480_v8 = vpop.f32.mrf.mxu0 }
  0xc7   :  { %v493_v9 = vpop.f32.mrf.mxu1 }

// kernel: forward.4
= control target key start
LH: loop header
LB: loop body
LE: loop exit
PB: predicated region body
PF: predicated region fallthrough
CT: control target
= control target key end

     0   :  { %s5498_s22 = smov 0   ;;  %s5500_s23 = smov 0   ;;  %s6388_s0 = inlined_call_operand.vmem [shape: f32[2,16,128], index: 0, kind: input, shape index: {}]   ;;  %s6389_s1 = inlined_call_operand.vmem [shape: f32[2,128], index: 1, kind: input, shape index: {}]   ;;  %s6390_s2 = inlined_call_operand.vmem [shape: bf16[2,128,384], index: 2, kind: input, shape index: {}]   ;;  %s6391_s3 = inlined_call_operand.vmem [shape: f32[2,1,384], index: 3, kind: input, shape index: {}]   ;;  %s6392_s4 = inlined_call_operand.vmem [shape: bf16[2,128,128], index: 4, kind: input, shape index: {}]   ;;  %s6393_s5 = inlined_call_operand.vmem [shape: f32[2,1,128], index: 5, kind: input, shape index: {}]   ;;  %s6394_s6 = inlined_call_operand.vmem [shape: bf16[2,128,128], index: 6, kind: input, shape index: {}]   ;;  %s6395_s7 = inlined_call_operand.vmem [shape: f32[2,1,128], index: 7, kind: input, shape index: {}]   ;;  %s6396_s8 = inlined_call_operand.vmem [shape: bf16[2,128,128], index: 8, kind: input, shape index: {}]   ;;  %s6397_s9 = inlined_call_operand.vmem [shape: f32[2,1,128], index: 9, kind: input, shape index: {}]   ;;  %s6398_s10 = inlined_call_operand.vmem [shape: bf16[2,128,1024], index: 10, kind: input, shape index: {}]   ;;  %s6399_s11 = inlined_call_operand.vmem [shape: f32[2,1,1024], index: 11, kind: input, shape index: {}]   ;;  %s6400_s12 = inlined_call_operand.vmem [shape: bf16[2,1024,128], index: 12, kind: input, shape index: {}]   ;;  %s6401_s13 = inlined_call_operand.vmem [shape: f32[2,1,128], index: 13, kind: input, shape index: {}]   ;;  %s6402_s14 = inlined_call_operand.vmem [shape: f32[2,1,128], index: 14, kind: input, shape index: {}]   ;;  %s6403_s15 = inlined_call_operand.vmem [shape: f32[2,1,128], index: 15, kind: input, shape index: {}]   ;;  %s6404_s16 = inlined_call_operand.vmem [shape: f32[2,1,128], index: 16, kind: input, shape index: {}]   ;;  %s6405_s17 = inlined_call_operand.vmem [shape: f32[2,1,128], index: 17, kind: input, shape index: {}]   ;;  %s6406_s18 = inlined_call_operand.vmem [shape: f32[2,1,128], index: 18, kind: input, shape index: {}]   ;;  %s6407_s19 = inlined_call_operand.vmem [shape: f32[2,1,128], index: 19, kind: input, shape index: {}]   ;;  %s6408_s20 = inlined_call_operand.vmem [shape: f32[2,16,128], index: 20, kind: output, shape index: {}]  }
   0x1   :  { %6415 = sst [smem:[#allocation9_spill]] %s6388_s0 }
   0x2   :  { %6416 = sst [smem:[#allocation10_spill]] %s6389_s1  ;;  %s5496_s1 = smov 0  }
   0x3   :  { %6417 = sst [smem:[#allocation11_spill]] %s6390_s2 }
   0x4   :  { %6418 = sst [smem:[#allocation12_spill]] %s6391_s3 }
   0x5   :  { %6419 = sst [smem:[#allocation13_spill]] %s6392_s4 }
   0x6   :  { %6420 = sst [smem:[#allocation14_spill]] %s6393_s5 }
   0x7   :  { %6421 = sst [smem:[#allocation15_spill]] %s6394_s6 }
   0x8   :  { %6422 = sst [smem:[#allocation16_spill]] %s6396_s8 }
   0x9   :  { %6423 = sst [smem:[#allocation17_spill]] %s6398_s10 }
   0xa   :  { %6424 = sst [smem:[#allocation18_spill]] %s6399_s11 }
   0xb   :  { %6425 = sst [smem:[#allocation19_spill]] %s6400_s12 }
   0xc   :  { %6426 = sst [smem:[#allocation20_spill]] %s6401_s13 }
   0xd   :  { %6427 = sst [smem:[#allocation21_spill]] %s6405_s17 }
   0xe   :  { %6428 = sst [smem:[#allocation22_spill]] %s6406_s18 }
   0xf   :  { %6429 = sst [smem:[#allocation23_spill]] %s6407_s19 }
  0x10   :  { %6430 = sst [smem:[#allocation24_spill]] %s6408_s20 }
  0x11 LB: > { %6431 = sst [smem:[#allocation3_spill]] %s5376_s1  ;;  %s39_s24 = sadd.s32 1, %s5380_s22  ;;  %s5384_s23 = sphi %s5500_s23, %s30_s23   ;;  %s5380_s22 = sphi %s5498_s22, %s6470_s22   ;;  %s5376_s1 = sphi %s5496_s1, %s6469_s1  }
  0x12   : > { %6432 = sst [smem:[#allocation4_spill]] %s5380_s22  ;;  %p4217_p0 = scmp.ge.s32.totalorder %s5384_s23, 1 }
  0x13   : > { %6433 = sst [smem:[#allocation5_spill]] %s5384_s23  ;;  %p40_p1 = scmp.ge.s32.totalorder %s39_s24, 2 }
  0x14   : > { %p734_p2 = scmp.lt.s32.totalorder %s5384_s23, 3 }
  0x15   : > { %s6472_s24 = smov (%p40_p1, %s39_s24), 0 }
  0x16   : > { %6434 = sst [smem:[#allocation6_spill]] %s6472_s24  ;;  %p735_p3 = pnand %p4217_p0, %p734_p2 }
  0x18   : > { %738 = sbr.rel (%p735_p3) target bundleno = 2412 (0x96c), region = 100 }
  0x1d   : > { %p869_p4 = scmp.lt.s32.totalorder %s5376_s1, 1  ;;  %s6435_s4 = sld [smem:[#allocation13_spill]] }
  0x1e   : > { %s6436_s21 = sld [smem:[#allocation11_spill]] }
  0x1f   : > { %s5518_s2 = scalar_select %p869_p4, %s5376_s1, 1 }
  0x20   : > { %s6438_s18 = sld [smem:[#allocation12_spill]] }
  0x21   : > { %s5137_s25 = smul.u32 192, %s5518_s2  ;;  %s4956_s3 = sshll.u32 %s5518_s2, 6 }
  0x22   : > { %s5138_s26 = smul.u32 3, %s5518_s2  ;;  %s6439_s6 = sld [smem:[#allocation15_spill]] }
  0x23   : > { %s5526_s29 = scalar_lea.vmem %s6435_s4, %s4956_s3  ;;  %s6441_s8 = sld [smem:[#allocation16_spill]] }
  0x24   : > { %s5531_s24 = scalar_lea.vmem %s6436_s21, %s5137_s25  ;;  %s4959_s1 = sshll.u32 %s5518_s2, 9 }
  0x25   : > { %s6442_s10 = sld [smem:[#allocation17_spill]]  ;;  %s4227_s28 = sshll.u32 %s5518_s2, 3 }
  0x26   : > { %s5540_s17 = scalar_lea.vmem %s6438_s18, %s5138_s26  ;;  %s6443_s11 = sld [smem:[#allocation18_spill]] }
  0x27   : > { %s6445_s12 = sld [smem:[#allocation19_spill]] }
  0x28   : > { %s5545_s4 = scalar_lea.vmem %s6439_s6, %s4956_s3  ;;  %s6448_s22 = sld [smem:[#allocation22_spill]] }
  0x29   : > { %6440 = sst [smem:[#allocation7_spill]] %s5545_s4  ;;  %s5554_s23 = scalar_lea.vmem %s6441_s8, %s4956_s3 }
  0x2a   : > { %s6449_s0 = sld [smem:[#allocation23_spill]] }
  0x2b   : > { %s5564_s27 = scalar_lea.vmem %s6442_s10, %s4959_s1  ;;  %s6450_s5 = sld [smem:[#allocation3_spill]] }
  0x2c   : > { %s5570_s30 = scalar_lea.vmem %s6443_s11, %s4227_s28  ;;  %s927_s28 = scalar_lea.vmem %s6404_s16, %s5518_s2 }
  0x2d   : > { %6444 = sst [smem:[#allocation8_spill]] %s5570_s30  ;;  %s5575_s3 = scalar_lea.vmem %s6445_s12, %s4959_s1 }
  0x2e   : > { %s6447_s1 = sld [smem:[#allocation21_spill]]  ;;  %s933_s20 = scalar_lea.vmem %s6448_s22, %s5518_s2 }
  0x30   : > { %s936_s18 = scalar_lea.vmem %s6449_s0, %s5518_s2 }
  0x31   : > { %p4230_p5 = scmp.ne.s32.totalorder %s6450_s5, 0 }
  0x32   : > { %s6451_s10 = sld [smem:[#allocation9_spill]] (!%p4230_p5) }
  0x33   : > { %948 = sbr.rel (%p4230_p5) target bundleno = 61 (0x3d), region = 104 }
  0x34   : > { %s930_s21 = scalar_lea.vmem %s6447_s1, %s5518_s2 }
  0x38   : > { %v949_v0 = vld [vmem:[%s6451_s10] sm:$0xff]  ;;  %v950_v1 = vld [vmem:[%s6451_s10 + $0x8] sm:$0xff]  ;;  %v951_v2 = vld [vmem:[%s6451_s10 + $0x10] sm:$0xff] }
  0x39   : > { %953 = vst [vmem:[#allocation2 + $0x10] sm:$0xff] %v949_v0  ;;  %v952_v3 = vld [vmem:[%s6451_s10 + $0x18] sm:$0xff] }
  0x3a   : > { %954 = vst [vmem:[#allocation2] sm:$0xff] %v950_v1 }
  0x3b   : > { %955 = vst [vmem:[#allocation2 + $0x18] sm:$0xff] %v951_v2 }
  0x3c   : > { %956 = vst [vmem:[#allocation2 + $0x8] sm:$0xff] %v952_v3 }
  0x3d PF: > { %v4317_v4 = vld [vmem:[%s5531_s24 + $0xa8] sm:$0xf]  ;;  %v4983_v5 = vld [vmem:[%s5531_s24 + $0xb0] sm:$0xf0]  ;;  %v4982_v6 = vld [vmem:[%s5531_s24 + $0xac] sm:$0xf]  ;;  %s6456_s11 = scalar_lea.vmem %s6395_s7, %s5518_s2  ;;  %s6457_s12 = scalar_lea.vmem %s6397_s9, %s5518_s2 }
  0x3e   : > { %v4318_v7 = vor.u32 %v4983_v5, %v4317_v4  ;;  %v4319_v8 = vld [vmem:[%s5531_s24 + $0xb4] sm:$0xf0]  ;;  %v4305_v9 = vld [vmem:[%s5531_s24 + $0x90] sm:$0xf]  ;;  %v4980_v10 = vld [vmem:[%s5531_s24 + $0x98] sm:$0xf0] }
  0x3f   : > { %v4322_v11 = vor.u32 %v4982_v6, %v4319_v8  ;;  %v4979_v12 = vld [vmem:[%s5531_s24 + $0x94] sm:$0xf]  ;;  %v4307_v13 = vld [vmem:[%s5531_s24 + $0x9c] sm:$0xf0]  ;;  %v4306_v14 = vor.u32 %v4980_v10, %v4305_v9  ;;  %v4293_v16 = vld [vmem:[%s5531_s24 + $0x78] sm:$0xf] }
  0x40   : > { %1131 = vmatpush.bf16.msra.mxu0 %v4318_v7  ;;  %v4310_v15 = vor.u32 %v4979_v12, %v4307_v13  ;;  %v4977_v17 = vld [vmem:[%s5531_s24 + $0x80] sm:$0xf0]  ;;  %v4976_v18 = vld [vmem:[%s5531_s24 + $0x7c] sm:$0xf]  ;;  %v4295_v19 = vld [vmem:[%s5531_s24 + $0x84] sm:$0xf0] }
  0x41   : > { %1150 = vmatpush.bf16.msra.mxu1 %v4322_v11  ;;  %v4294_v20 = vor.u32 %v4977_v17, %v4293_v16  ;;  %v4298_v21 = vor.u32 %v4976_v18, %v4295_v19  ;;  %v4281_v22 = vld [vmem:[%s5531_s24 + $0x60] sm:$0xf]  ;;  %v4974_v23 = vld [vmem:[%s5531_s24 + $0x68] sm:$0xf0]  ;;  %v4973_v24 = vld [vmem:[%s5531_s24 + $0x64] sm:$0xf] }
  0x42   : > { %v4283_v25 = vld [vmem:[%s5531_s24 + $0x6c] sm:$0xf0]  ;;  %v4269_v26 = vld [vmem:[%s5531_s24 + $0x48] sm:$0xf]  ;;  %v4282_v27 = vor.u32 %v4974_v23, %v4281_v22  ;;  %v4971_v28 = vld [vmem:[%s5531_s24 + $0x50] sm:$0xf0] }
  0x43   : > { %v4970_v29 = vld [vmem:[%s5531_s24 + $0x4c] sm:$0xf]  ;;  %v4271_v30 = vld [vmem:[%s5531_s24 + $0x54] sm:$0xf0]  ;;  %v4286_v31 = vor.u32 %v4973_v24, %v4283_v25  ;;  %v4270_v32 = vor.u32 %v4971_v28, %v4269_v26  ;;  %v4257_v34 = vld [vmem:[%s5531_s24 + $0x30] sm:$0xf] }
  0x44   : > { %1132 = vmatpush.bf16.msra.mxu0 %v4306_v14  ;;  %v4274_v33 = vor.u32 %v4970_v29, %v4271_v30  ;;  %v4968_v35 = vld [vmem:[%s5531_s24 + $0x38] sm:$0xf0]  ;;  %v4967_v36 = vld [vmem:[%s5531_s24 + $0x34] sm:$0xf]  ;;  %v4259_v37 = vld [vmem:[%s5531_s24 + $0x3c] sm:$0xf0] }
  0x45   : > { %1151 = vmatpush.bf16.msra.mxu1 %v4310_v15  ;;  %v4258_v38 = vor.u32 %v4968_v35, %v4257_v34  ;;  %v4325_v39 = vld [vmem:[%s5531_s24 + $0xb0] sm:$0xf]  ;;  %v4984_v40 = vld [vmem:[%s5531_s24 + $0xb8] sm:$0xf0]  ;;  %v4313_v41 = vld [vmem:[%s5531_s24 + $0x98] sm:$0xf]  ;;  %v4262_v42 = vor.u32 %v4967_v36, %v4259_v37 }
  0x46   : > { %v4245_v43 = vld [vmem:[%s5531_s24 + $0x18] sm:$0xf]  ;;  %v4965_v44 = vld [vmem:[%s5531_s24 + $0x20] sm:$0xf0]  ;;  %v4326_v45 = vor.u32 %v4984_v40, %v4325_v39  ;;  %v4964_v47 = vld [vmem:[%s5531_s24 + $0x1c] sm:$0xf] }
  0x47   : > { %v4981_v46 = vld [vmem:[%s5531_s24 + $0xa0] sm:$0xf0]  ;;  %v4247_v48 = vld [vmem:[%s5531_s24 + $0x24] sm:$0xf0]  ;;  %v4246_v50 = vor.u32 %v4965_v44, %v4245_v43  ;;  %v4301_v51 = vld [vmem:[%s5531_s24 + $0x80] sm:$0xf] }
  0x48   : > { %1133 = vmatpush.bf16.msra.mxu0 %v4294_v20  ;;  %1169 = vmatpush.bf16.msra.mxu2 %v4326_v45  ;;  %v4314_v49 = vor.u32 %v4981_v46, %v4313_v41  ;;  %v4978_v52 = vld [vmem:[%s5531_s24 + $0x88] sm:$0xf0]  ;;  %v4250_v53 = vor.u32 %v4964_v47, %v4247_v48  ;;  %v4233_v54 = vld [vmem:[%s5531_s24] sm:$0xf]  ;;  %v4961_v56 = vld [vmem:[%s5531_s24 + $0x4] sm:$0xf] }
  0x49   : > { %1152 = vmatpush.bf16.msra.mxu1 %v4298_v21  ;;  %v4962_v55 = vld [vmem:[%s5531_s24 + $0x8] sm:$0xf0]  ;;  %v4235_v57 = vld [vmem:[%s5531_s24 + $0xc] sm:$0xf0]  ;;  %v4302_v59 = vor.u32 %v4978_v52, %v4301_v51  ;;  %v958_v61 = vld [vmem:[#allocation2] sm:$0xff]  ;;  %s5386_s13 = smov 96  }
  0x4a   : > { %v957_v58 = vld [vmem:[#allocation2 + $0x10] sm:$0xff]  ;;  %v4234_v60 = vor.u32 %v4962_v55, %v4233_v54  ;;  %v4289_v62 = vld [vmem:[%s5531_s24 + $0x68] sm:$0xf]  ;;  %v4238_v0 = vor.u32 %v4961_v56, %v4235_v57  ;;  %v4972_v4 = vld [vmem:[%s5531_s24 + $0x58] sm:$0xf0]  ;;  %vm1391_vm0 = vcmask 261120  }
  0x4b   : > { %v4975_v63 = vld [vmem:[%s5531_s24 + $0x70] sm:$0xf0]  ;;  %v994_v1 = vpack.c.bf16 %v958_v61, %v957_v58  ;;  %v4277_v3 = vld [vmem:[%s5531_s24 + $0x50] sm:$0xf]  ;;  %v4265_v6 = vld [vmem:[%s5531_s24 + $0x38] sm:$0xf] }
  0x4c   : > { %1134 = vmatpush.bf16.msra.mxu0 %v4282_v27  ;;  %1170 = vmatpush.bf16.msra.mxu2 %v4314_v49  ;;  %v4290_v2 = vor.u32 %v4975_v63, %v4289_v62  ;;  %v4278_v5 = vor.u32 %v4972_v4, %v4277_v3  ;;  %v4969_v7 = vld [vmem:[%s5531_s24 + $0x40] sm:$0xf0]  ;;  %v4253_v9 = vld [vmem:[%s5531_s24 + $0x20] sm:$0xf]  ;;  %v4966_v10 = vld [vmem:[%s5531_s24 + $0x28] sm:$0xf0] }
  0x4d   : > { %1153 = vmatpush.bf16.msra.mxu1 %v4286_v31  ;;  %v4266_v8 = vor.u32 %v4969_v7, %v4265_v6  ;;  %v959_v11 = vld [vmem:[#allocation2 + $0x18] sm:$0xff]  ;;  %v4254_v12 = vor.u32 %v4966_v10, %v4253_v9  ;;  %v960_v13 = vld [vmem:[#allocation2 + $0x8] sm:$0xff]  ;;  %v4963_v15 = vld [vmem:[%s5531_s24 + $0x10] sm:$0xf0]  ;;  %vm1622_vm2 = vcmask 130048   ;;  %s6452_s19 = sld [smem:[#allocation7_spill]] }
  0x4e   : > { %v4241_v14 = vld [vmem:[%s5531_s24 + $0x8] sm:$0xf]  ;;  %v995_v16 = vpack.c.bf16 %v960_v13, %v959_v11  ;;  %v5667_v18 = vld [vmem:[%s5540_s17] sm:$0x7]  ;;  %s5387_s17 = smov 64   ;;  %s5388_s24 = smov 32  }
  0x4f   : > { %v4242_v17 = vor.u32 %v4963_v15, %v4241_v14  ;;  %v998_v21 = vperm.slane %v5667_v18, 1  ;;  %v997_v22 = vperm.slane %v5667_v18, 0  ;;  %vm2065_vm4 = vcmask 523264   ;;  %s6453_s1 = sld [smem:[#allocation10_spill]] }
  0x50   : > { %1135 = vmatpush.bf16.msra.mxu0 %v4270_v32  ;;  %1171 = vmatpush.bf16.msra.mxu2 %v4302_v59  ;;  %vm2068_vm5 = vcmask 785408   ;;  %s6454_s8 = sld [smem:[#allocation14_spill]] }
  0x51   : > { %1154 = vmatpush.bf16.msra.mxu1 %v4274_v33 }
  0x54   : > { %1136 = vmatpush.bf16.msra.mxu0 %v4258_v38  ;;  %1172 = vmatpush.bf16.msra.mxu2 %v4290_v2  ;;  %v5694_v2 = vperm.slane %v5667_v18, 2 }
  0x55   : > { %1155 = vmatpush.bf16.msra.mxu1 %v4262_v42 }
  0x56   : > { %s6455_s26 = scalar_lea.vmem %s6454_s8, %s5518_s2 }
  0x58   : > { %1137 = vmatpush.bf16.msra.mxu0 %v4246_v50  ;;  %1173 = vmatpush.bf16.msra.mxu2 %v4278_v5 }
  0x59   : > { %1156 = vmatpush.bf16.msra.mxu1 %v4250_v53 }
  0x5c   : > { %1138 = vmatpush.bf16.msra.mxu0 %v4234_v60  ;;  %1174 = vmatpush.bf16.msra.mxu2 %v4266_v8 }
  0x5d   : > { %1157 = vmatpush.bf16.msra.mxu1 %v4238_v0 }
  0x5f   : > { %1139 = vmatmul.bf16.vlgmr.msra.gmra.mxu0 %v994_v1 }
  0x60   : > { %1158 = vmatmul.bf16.vlgmr.msra.gmra.mxu1 %v994_v1  ;;  %1175 = vmatpush.bf16.msra.mxu2 %v4254_v12 }
  0x64   : > { %1176 = vmatpush.bf16.msra.mxu2 %v4242_v17 }
  0x67   : > { %1177 = vmatmul.bf16.vlgmr.msra.gmra.mxu2 %v994_v1 }
  0x6f   : > { %1144 = vmatmul.bf16.gmra.mxu0 %v995_v16 }
  0x70   : > { %1163 = vmatmul.bf16.gmra.mxu1 %v995_v16 }
  0x77   : > { %1182 = vmatmul.bf16.gmra.mxu2 %v995_v16 }
  0xdc   : > { %v1140_v19 = vpop.f32.mrf.mxu0 }
  0xdd   : > { %v1159_v20 = vpop.f32.mrf.mxu1  ;;  %v1141_v24 = vadd.f32 %v1140_v19, %v997_v22 }
  0xde   : > { %v1160_v23 = vadd.f32 %v1159_v20, %v998_v21 }
  0xdf   : > { %v1228_v32 = vmul.f32 0.17677669, %v1141_v24 }
  0xe0   : > { %v1300_v29 = vpack.c.bf16 %v1160_v23, %v1160_v23 }
  0xe1   : > { %v1244_v38 = vpack.c.bf16 %v1228_v32, %v1228_v32 }
  0xe2   : > { %v1388_v34 = vunpack.c.l.b16 %v1300_v29 }
  0xe3   : > { %v1383_v43 = vunpack.c.l.b16 %v1244_v38 }
  0xe4   : > { %v1142_v25 = vpop.f32.mrf.mxu0 }
  0xe5   : > { %v1143_v26 = vadd.f32 %v1142_v25, %v997_v22  ;;  %v1161_v27 = vpop.f32.mrf.mxu1 }
  0xe6   : > { %v1162_v28 = vadd.f32 %v1161_v27, %v998_v21 }
  0xe7   : > { %1192 = vrot.lane.b32.xlu1 %v1143_v26, %s5386_s13  ;;  %v1229_v33 = vmul.f32 0.17677669, %v1143_v26 }
  0xe8   : > { %v5168_v30 = vpack.i.bf16 %v1162_v28, %v1160_v23  ;;  %v1301_v31 = vpack.c.bf16 %v1162_v28, %v1162_v28 }
  0xe9   : > { %v1245_v39 = vpack.c.bf16 %v1229_v33, %v1229_v33 }
  0xea   : > { %5169 = vrot.lane.b32.xlu0 %v5168_v30, %s5386_s13  ;;  %v1389_v35 = vunpack.c.l.b16 %v1301_v31  ;;  %v1178_v1 = vpop.f32.mrf.mxu2 }
  0xeb   : > { %v1384_v44 = vunpack.c.l.b16 %v1245_v39  ;;  %v5697_v3 = vadd.f32 %v1178_v1, %v5694_v2 }
  0xec   : > { %v1145_v36 = vpop.f32.mrf.mxu0  ;;  %v1390_v37 = vpack.c.b16 %v1389_v35, %v1388_v34 }
  0xed   : > { %v1146_v40 = vadd.f32 %v1145_v36, %v997_v22  ;;  %v1164_v41 = vpop.f32.mrf.mxu1  ;;  %v1385_v47 = vpack.c.b16 %v1384_v44, %v1383_v43 }
  0xee   : > { %v1396_v42 = vsel %vm1391_vm0, %v1390_v37, 0  ;;  %v1165_v45 = vadd.f32 %v1164_v41, %v998_v21 }
  0xef   : > { %1405 = vmatpush.bf16.xpose.msra.mxu3 %v1396_v42  ;;  %1198 = vrot.lane.b32.xlu2 %v1146_v40, %s5386_s13  ;;  %v1230_v50 = vmul.f32 0.17677669, %v1146_v40 }
  0xf0   : > { %v1302_v52 = vpack.c.bf16 %v1165_v45, %v1165_v45 }
  0xf1   : > { %v1246_v56 = vpack.c.bf16 %v1230_v50, %v1230_v50 }
  0xf2   : > { %1190 = vrot.lane.b32.xlu0 %v1141_v24, %s5386_s13  ;;  %v1419_v57 = vunpack.c.l.b16 %v1302_v52  ;;  %v1180_v4 = vpop.f32.mrf.mxu2 }
  0xf3   : > { %v1414_v62 = vunpack.c.l.b16 %v1246_v56  ;;  %v5700_v5 = vadd.f32 %v1180_v4, %v5694_v2 }
  0xf4   : > { %v1147_v46 = vpop.f32.mrf.mxu0 }
  0xf5   : > { %v1148_v48 = vadd.f32 %v1147_v46, %v997_v22  ;;  %v1166_v49 = vpop.f32.mrf.mxu1  ;;  %v5704_v6 = vpack.i.bf16 %v5700_v5, %v5697_v3 }
  0xf6   : > { %v1167_v51 = vadd.f32 %v1166_v49, %v998_v21  ;;  %4327 = vmatmul.msk.bf16.vlgmr.msra.gmra.mxu3 %vm1391_vm0, %v1385_v47 }
  0xf7   : > { %v1231_v53 = vmul.f32 0.17677669, %v1148_v48  ;;  %1200 = vrot.lane.b32.xlu2 %v1148_v48, %s5386_s13 }
  0xf8   : > { %v5173_v54 = vpack.i.bf16 %v1167_v51, %v1165_v45  ;;  %v1303_v55 = vpack.c.bf16 %v1167_v51, %v1167_v51 }
  0xf9   : > { %v1247_v59 = vpack.c.bf16 %v1231_v53, %v1231_v53 }
  0xfa   : > { %5174 = vrot.lane.b32.xlu1 %v5173_v54, %s5386_s13  ;;  %5179 = vrot.lane.b32.xlu0 %v5168_v30, %s5387_s17  ;;  %v1420_v58 = vunpack.c.l.b16 %v1303_v55 }
  0xfb   : > { %v1415_v63 = vunpack.c.l.b16 %v1247_v59 }
  0xfc   : > { %v1421_v60 = vpack.c.b16 %v1420_v58, %v1419_v57 }
  0xfd   : > { %v1416_v0 = vpack.c.b16 %v1415_v63, %v1414_v62  ;;  %v5389_v62 = vmov 0.0  }
  0xfe   : > { %v1426_v61 = vsel %vm1391_vm0, %v1421_v60, 0 }
  0xff   : > { %1435 = vmatpush.bf16.xpose.msrb.mxu3 %v1426_v61  ;;  %1204 = vrot.lane.b32.xlu2 %v1141_v24, %s5387_s17 }
 0x102   : > { %5184 = vrot.lane.b32.xlu1 %v5168_v30, %s5388_s24  ;;  %1206 = vrot.lane.b32.xlu0 %v1143_v26, %s5387_s17  ;;  %v1372_v30 = vlaneseq }
 0x104   : > { %v1373_v41 = vshrl.u32 %v1372_v30, 7  ;;  %v1376_v42 = vand.u32 127, %v1372_v30 }
 0x106   : > { %4328 = vmatmul.msk.bf16.vlgmr.msrb.gmra.mxu3 %vm1391_vm0, %v1416_v0  ;;  %vm1377_vm1 = vcmp.gt.s32.totalorder %v1376_v42, %v1373_v41  ;;  %v1374_v0 = vadd.s32 8, %v1373_v41 }
 0x107   : > { %1218 = vrot.lane.b32.xlu2 %v1143_v26, %s5388_s24  ;;  %v5714_v63 = vsel %vm1377_vm1, -1e+30, %v5389_v62 }
 0x108   : > { %vm1378_vm3 = vcmp.gt.s32.totalorder %v1376_v42, %v1374_v0 }
 0x10a   : > { %1216 = vrot.lane.b32.xlu1 %v1141_v24, %s5388_s24  ;;  %5189 = vrot.lane.b32.xlu0 %v5173_v54, %s5388_s24 }
 0x10f   : > { %1224 = vrot.lane.b32.xlu2 %v1148_v48, %s5388_s24 }
 0x112   : > { %1222 = vrot.lane.b32.xlu1 %v1146_v40, %s5388_s24  ;;  %5194 = vrot.lane.b32.xlu0 %v5173_v54, %s5387_s17 }
 0x117   : > { %1212 = vrot.lane.b32.xlu2 %v1148_v48, %s5387_s17 }
 0x11a   : > { %1210 = vrot.lane.b32.xlu1 %v1146_v40, %s5387_s17 }
 0x122   : > { %5199 = vrot.lane.b32.xlu1 %v5704_v6, %s5386_s13 }
 0x149   : > { %v1199_v7 = vpop.permute.xlu2 %1198 }
 0x14a   : > { %v1234_v35 = vmul.f32 0.17677669, %v1199_v7 }
 0x14c   : > { %v1250_v48 = vpack.c.bf16 %v1234_v35, %v1234_v35 }
 0x14e   : > { %v1474_v57 = vunpack.c.l.b16 %v1250_v48 }
 0x151   : > { %v1201_v9 = vpop.permute.xlu2 %1200 }
 0x152   : > { %v1235_v36 = vmul.f32 0.17677669, %v1201_v9 }
 0x154   : > { %v1251_v49 = vpack.c.bf16 %v1235_v36, %v1235_v36 }
 0x156   : > { %v1475_v58 = vunpack.c.l.b16 %v1251_v49 }
 0x159   : > { %v1193_v12 = vpop.permute.xlu1 %1192  ;;  %v5709_v23 = vpop.permute.xlu2 %1204 }
 0x15a   : > { %v1233_v17 = vmul.f32 0.17677669, %v1193_v12  ;;  %v1236_v30 = vmul.f32 0.17677669, %v5709_v23 }
 0x15c   : > { %v5170_v8 = vpop.permute.xlu0 %5169  ;;  %v1249_v20 = vpack.c.bf16 %v1233_v17, %v1233_v17 }
 0x15d   : > { %v5172_v10 = vunpack.i.h.bf16 %v5170_v8  ;;  %v5171_v11 = vunpack.i.l.bf16 %v5170_v8 }
 0x15e   : > { %v1445_v25 = vunpack.c.l.b16 %v1249_v20 }
 0x15f   : > { %v1305_v13 = vpack.c.bf16 %v5172_v10, %v5172_v10  ;;  %v1304_v14 = vpack.c.bf16 %v5171_v11, %v5171_v11  ;;  %v1476_v10 = vpack.c.b16 %v1475_v58, %v1474_v57 }
 0x161   : > { %v1450_v15 = vunpack.c.l.b16 %v1305_v13  ;;  %v1449_v16 = vunpack.c.l.b16 %v1304_v14  ;;  %v1219_v43 = vpop.permute.xlu2 %1218 }
 0x162   : > { %v1241_v1 = vmul.f32 0.17677669, %v1219_v43 }
 0x163   : > { %v1451_v18 = vpack.c.b16 %v1450_v15, %v1449_v16 }
 0x164   : > { %v1191_v19 = vpop.permute.xlu0 %1190  ;;  %v1257_v13 = vpack.c.bf16 %v1241_v1, %v1241_v1 }
 0x165   : > { %v1232_v21 = vmul.f32 0.17677669, %v1191_v19  ;;  %v1456_v22 = vsel %vm1391_vm0, %v1451_v18, 0 }
 0x166   : > { %1465 = vmatpush.bf16.xpose.msra.mxu3 %v1456_v22  ;;  %v5725_v22 = vsel %vm1378_vm3, -1e+30, %v5389_v62 }
 0x167   : > { %v1248_v24 = vpack.c.bf16 %v1232_v21, %v1232_v21  ;;  %v1183_v21 = vpop.f32.mrf.mxu2 }
 0x169   : > { %v1444_v26 = vunpack.c.l.b16 %v1248_v24  ;;  %v5719_v11 = vpop.permute.xlu2 %1224  ;;  %v1356_v24 = vpack.c.bf16 %v5697_v3, %v5697_v3 }
 0x16b   : > { %v1446_v27 = vpack.c.b16 %v1445_v25, %v1444_v26  ;;  %v1357_v25 = vpack.c.bf16 %v5700_v5, %v5700_v5 }
 0x16c   : > { %v5175_v28 = vpop.permute.xlu1 %5174  ;;  %v5180_v29 = vpop.permute.xlu0 %5179 }
 0x16d   : > { %v5177_v31 = vunpack.i.h.bf16 %v5175_v28  ;;  %v5176_v32 = vunpack.i.l.bf16 %v5175_v28  ;;  %v5182_v33 = vunpack.i.h.bf16 %v5180_v29  ;;  %v5181_v34 = vunpack.i.l.bf16 %v5180_v29  ;;  %4329 = vmatmul.msk.bf16.vlgmr.msra.gmra.mxu3 %vm1391_vm0, %v1446_v27 }
 0x16f   : > { %v1307_v37 = vpack.c.bf16 %v5177_v31, %v5177_v31  ;;  %v1306_v38 = vpack.c.bf16 %v5176_v32, %v5176_v32  ;;  %v1309_v39 = vpack.c.bf16 %v5182_v33, %v5182_v33  ;;  %v1308_v40 = vpack.c.bf16 %v5181_v34, %v5181_v34  ;;  %v1185_v49 = vpop.f32.mrf.mxu2 }
 0x170   : > { %v1822_v31 = vunpack.c.l.b16 %v1356_v24  ;;  %v1823_v32 = vunpack.c.l.b16 %v1357_v25  ;;  %v1565_v33 = vunpack.c.l.b16 %v1257_v13 }
 0x171   : > { %v1480_v44 = vunpack.c.l.b16 %v1307_v37  ;;  %v1479_v45 = vunpack.c.l.b16 %v1306_v38  ;;  %v1510_v46 = vunpack.c.l.b16 %v1309_v39  ;;  %v1509_v47 = vunpack.c.l.b16 %v1308_v40 }
 0x172   : > { %v1824_v3 = vpack.c.b16 %v1823_v32, %v1822_v31  ;;  %v1184_v39 = vadd.f32 %v1183_v21, %v5694_v2 }
 0x173   : > { %v1481_v50 = vpack.c.b16 %v1480_v44, %v1479_v45  ;;  %v1511_v51 = vpack.c.b16 %v1510_v46, %v1509_v47  ;;  %v1252_v45 = vpack.c.bf16 %v1236_v30, %v1236_v30 }
 0x174   : > { %v5185_v52 = vpop.permute.xlu1 %5184  ;;  %v1207_v53 = vpop.permute.xlu0 %1206  ;;  %1836 = vmatpush.bf16.msrb.mxu0 %v1824_v3  ;;  %v1358_v44 = vpack.c.bf16 %v1184_v39, %v1184_v39 }
 0x175   : > { %v5187_v54 = vunpack.i.h.bf16 %v5185_v52  ;;  %v5186_v55 = vunpack.i.l.bf16 %v5185_v52  ;;  %v1486_v56 = vsel %vm1391_vm0, %v1481_v50, 0  ;;  %v1516_v59 = vsel %vm1391_vm0, %v1511_v51, 0  ;;  %v1213_v50 = vpop.permute.xlu2 %1212 }
 0x176   : > { %1495 = vmatpush.bf16.xpose.msrb.mxu3 %v1486_v56  ;;  %v1237_v26 = vmul.f32 0.17677669, %v1207_v53  ;;  %v1186_v51 = vadd.f32 %v1185_v49, %v5694_v2  ;;  %v1504_v58 = vunpack.c.l.b16 %v1252_v45 }
 0x177   : > { %v1313_v60 = vpack.c.bf16 %v5187_v54, %v5187_v54  ;;  %v1312_v61 = vpack.c.bf16 %v5186_v55, %v5186_v55  ;;  %v1850_v55 = vunpack.c.l.b16 %v1358_v44 }
 0x178   : > { %v1253_v5 = vpack.c.bf16 %v1237_v26, %v1237_v26  ;;  %v1359_v56 = vpack.c.bf16 %v1186_v51, %v1186_v51  ;;  %v5741_v57 = vpack.i.bf16 %v1186_v51, %v1184_v39 }
 0x179   : > { %v1570_v4 = vunpack.c.l.b16 %v1313_v60  ;;  %v1569_v7 = vunpack.c.l.b16 %v1312_v61  ;;  %v1407_v8 = vpop.f32.mrf.mxu3 }
 0x17a   : > { %v5717_v9 = vadd.f32 %v1407_v8, %v5714_v63  ;;  %v1505_v52 = vunpack.c.l.b16 %v1253_v5  ;;  %5204 = vrot.lane.b32.xlu0 %v5741_v57, %s5386_s13  ;;  %v1851_v1 = vunpack.c.l.b16 %v1359_v56 }
 0x17b   : > { %v1571_v12 = vpack.c.b16 %v1570_v4, %v1569_v7 }
 0x17c   : > { %v1217_v14 = vpop.permute.xlu1 %1216  ;;  %v5190_v15 = vpop.permute.xlu0 %5189  ;;  %v1623_v16 = vsel %vm1622_vm2, %v5717_v9, -inf  ;;  %v1506_v2 = vpack.c.b16 %v1505_v52, %v1504_v58 }
 0x17d   : > { %v1240_v17 = vmul.f32 0.17677669, %v1217_v14  ;;  %v5192_v18 = vunpack.i.h.bf16 %v5190_v15  ;;  %v5191_v19 = vunpack.i.l.bf16 %v5190_v15  ;;  %4330 = vmatmul.msk.bf16.vlgmr.msrb.gmra.mxu3 %vm1391_vm0, %v1476_v10  ;;  %1624 = vmax.xlane.f32.xlu2 %v1623_v16  ;;  %v1576_v20 = vsel %vm1391_vm0, %v1571_v12, 0 }
 0x17e   : > { %1525 = vmatpush.bf16.xpose.msra.mxu3 %v1516_v59  ;;  %1585 = vmatpush.bf16.xpose.msrb.mxu2 %v1576_v20  ;;  %v1239_v59 = vmul.f32 0.17677669, %v1213_v50  ;;  %v1852_v10 = vpack.c.b16 %v1851_v1, %v1850_v55 }
 0x17f   : > { %v1256_v27 = vpack.c.bf16 %v1240_v17, %v1240_v17  ;;  %v1315_v28 = vpack.c.bf16 %v5192_v18, %v5192_v18  ;;  %v1314_v29 = vpack.c.bf16 %v5191_v19, %v5191_v19  ;;  %v1243_v17 = vmul.f32 0.17677669, %v5719_v11 }
 0x180   : > { %v1255_v12 = vpack.c.bf16 %v1239_v59, %v1239_v59 }
 0x181   : > { %v1564_v34 = vunpack.c.l.b16 %v1256_v27  ;;  %v1600_v35 = vunpack.c.l.b16 %v1315_v28  ;;  %v1599_v36 = vunpack.c.l.b16 %v1314_v29  ;;  %v1409_v37 = vpop.f32.mrf.mxu3  ;;  %v1259_v27 = vpack.c.bf16 %v1243_v17, %v1243_v17 }
 0x182   : > { %v5733_v38 = vadd.f32 %v1409_v37, %v5725_v22  ;;  %v1535_v18 = vunpack.c.l.b16 %v1255_v12 }
 0x183   : > { %v1566_v40 = vpack.c.b16 %v1565_v33, %v1564_v34  ;;  %v1601_v41 = vpack.c.b16 %v1600_v35, %v1599_v36  ;;  %v1595_v29 = vunpack.c.l.b16 %v1259_v27 }
 0x184   : > { %v1223_v42 = vpop.permute.xlu1 %1222  ;;  %v5195_v43 = vpop.permute.xlu0 %5194  ;;  %v1626_v23 = vsel %vm1622_vm2, %v5733_v38, -inf }
 0x185   : > { %v5197_v46 = vunpack.i.h.bf16 %v5195_v43  ;;  %v5196_v47 = vunpack.i.l.bf16 %v5195_v43  ;;  %4333 = vmatmul.msk.bf16.vlgmr.msrb.gmra.mxu2 %vm1391_vm0, %v1566_v40  ;;  %1627 = vmax.xlane.f32.xlu2 %v1626_v23  ;;  %v1606_v48 = vsel %vm1391_vm0, %v1601_v41, 0  ;;  %v1242_v15 = vmul.f32 0.17677669, %v1223_v42 }
 0x186   : > { %1615 = vmatpush.bf16.xpose.msrb.mxu3 %v1606_v48 }
 0x187   : > { %v1311_v53 = vpack.c.bf16 %v5197_v46, %v5197_v46  ;;  %v1310_v54 = vpack.c.bf16 %v5196_v47, %v5196_v47  ;;  %v1258_v24 = vpack.c.bf16 %v1242_v15, %v1242_v15 }
 0x189   : > { %v1540_v60 = vunpack.c.l.b16 %v1311_v53  ;;  %v1539_v61 = vunpack.c.l.b16 %v1310_v54  ;;  %v1437_v62 = vpop.f32.mrf.mxu3  ;;  %v1594_v28 = vunpack.c.l.b16 %v1258_v24 }
 0x18a   : > { %v5744_v0 = vadd.f32 %v1437_v62, %v5714_v63 }
 0x18b   : > { %v1541_v4 = vpack.c.b16 %v1540_v60, %v1539_v61  ;;  %v1596_v30 = vpack.c.b16 %v1595_v29, %v1594_v28 }
 0x18c   : > { %v1211_v7 = vpop.permute.xlu1 %1210  ;;  %v1629_v8 = vsel %vm1622_vm2, %v5744_v0, -inf }
 0x18d   : > { %v1238_v13 = vmul.f32 0.17677669, %v1211_v7  ;;  %4331 = vmatmul.msk.bf16.vlgmr.msra.gmra.mxu3 %vm1391_vm0, %v1506_v2  ;;  %1630 = vmax.xlane.f32.xlu1 %v1629_v8  ;;  %v1546_v14 = vsel %vm1391_vm0, %v1541_v4, 0 }
 0x18e   : > { %1555 = vmatpush.bf16.xpose.msrb.mxu1 %v1546_v14 }
 0x18f   : > { %v1254_v16 = vpack.c.bf16 %v1238_v13, %v1238_v13 }
 0x191   : > { %v1534_v19 = vunpack.c.l.b16 %v1254_v16  ;;  %v1439_v20 = vpop.f32.mrf.mxu3 }
 0x192   : > { %v5754_v21 = vadd.f32 %v1439_v20, %v5725_v22 }
 0x193   : > { %v1536_v25 = vpack.c.b16 %v1535_v18, %v1534_v19 }
 0x194   : > { %v1632_v26 = vsel %vm1622_vm2, %v5754_v21, -inf  ;;  %v5200_v11 = vpop.permute.xlu1 %5199 }
 0x195   : > { %4332 = vmatmul.msk.bf16.vlgmr.msrb.gmra.mxu1 %vm1391_vm0, %v1536_v25  ;;  %1633 = vmax.xlane.f32.xlu2 %v1632_v26  ;;  %v5202_v31 = vunpack.i.h.bf16 %v5200_v11  ;;  %v5201_v32 = vunpack.i.l.bf16 %v5200_v11 }
 0x196   : > { %1864 = vmatpush.bf16.msra.mxu1 %v1852_v10 }
 0x197   : > { %v1361_v33 = vpack.c.bf16 %v5202_v31, %v5202_v31  ;;  %v1360_v34 = vpack.c.bf16 %v5201_v32, %v5201_v32 }
 0x199   : > { %v1879_v35 = vunpack.c.l.b16 %v1361_v33  ;;  %v1878_v36 = vunpack.c.l.b16 %v1360_v34 }
 0x19b   : > { %v1880_v37 = vpack.c.b16 %v1879_v35, %v1878_v36 }
 0x19d   : > { %4334 = vmatmul.msk.bf16.vlgmr.msrb.gmra.mxu3 %vm1391_vm0, %v1596_v30  ;;  %1892 = vmatpush.bf16.msra.mxu2 %v1880_v37 }
 0x1ec   : > { %v5205_v12 = vpop.permute.xlu0 %5204 }
 0x1ed   : > { %v5207_v15 = vunpack.i.h.bf16 %v5205_v12  ;;  %v5206_v16 = vunpack.i.l.bf16 %v5205_v12 }
 0x1ef   : > { %v1363_v18 = vpack.c.bf16 %v5207_v15, %v5207_v15  ;;  %v1362_v19 = vpack.c.bf16 %v5206_v16, %v5206_v16 }
 0x1f0   : > { %v1467_v3 = vpop.f32.mrf.mxu3  ;;  %v1625_v43 = vpop.xlane.xlu2 %1624 }
 0x1f1   : > { %v5761_v39 = vadd.f32 %v1467_v3, %v5714_v63  ;;  %v1671_v44 = vsub.f32 %v5717_v9, %v1625_v43  ;;  %v1907_v25 = vunpack.c.l.b16 %v1363_v18  ;;  %v1906_v26 = vunpack.c.l.b16 %v1362_v19 }
 0x1f3   : > { %v1635_v5 = vsel %vm1622_vm2, %v5761_v39, -inf  ;;  %v1687_v45 = vmul.f32 1.442695, %v1671_v44  ;;  %v1908_v30 = vpack.c.b16 %v1907_v25, %v1906_v26 }
 0x1f4   : > { %1636 = vmax.xlane.f32.xlu0 %v1635_v5 }
 0x1f5   : > { %5268 = vpow2.f32 %v1687_v45  ;;  %1920 = vmatpush.bf16.msra.mxu3 %v1908_v30 }
 0x1f8   : > { %v1469_v40 = vpop.f32.mrf.mxu3  ;;  %v1628_v50 = vpop.xlane.xlu2 %1627 }
 0x1f9   : > { %v5766_v41 = vadd.f32 %v1469_v40, %v5725_v22  ;;  %v1672_v9 = vsub.f32 %v5733_v38, %v1628_v50 }
 0x1fb   : > { %v1638_v42 = vsel %vm1622_vm2, %v5766_v41, -inf  ;;  %v5776_v51 = vpop.eup %5268  ;;  %v1689_v1 = vmul.f32 1.442695, %v1672_v9 }
 0x1fc   : > { %1639 = vmax.xlane.f32.xlu1 %v1638_v42  ;;  %v1719_v60 = vsel %vm1622_vm2, %v5776_v51, 0.0 }
 0x1fd   : > { %5270 = vpow2.f32 %v1689_v1 }
 0x200   : > { %v1497_v23 = vpop.f32.mrf.mxu3  ;;  %v1631_v53 = vpop.xlane.xlu1 %1630 }
 0x201   : > { %v1673_v61 = vsub.f32 %v5744_v0, %v1631_v53  ;;  %v5793_v38 = vadd.f32 %v1497_v23, %v5714_v63 }
 0x203   : > { %v1691_v2 = vmul.f32 1.442695, %v1673_v61  ;;  %v1641_v0 = vsel %vm1622_vm2, %v5793_v38, -inf  ;;  %v5807_v20 = vpop.eup %5270 }
 0x204   : > { %v1722_v29 = vsel %vm1622_vm2, %v5807_v20, 0.0 }
 0x205   : > { %5272 = vpow2.f32 %v1691_v2 }
 0x208   : > { %v1499_v46 = vpop.f32.mrf.mxu3  ;;  %v1587_v47 = vpop.f32.mrf.mxu2 }
 0x209   : > { %v5772_v48 = vadd.f32 %v1587_v47, %v5714_v63  ;;  %v5796_v4 = vadd.f32 %v1499_v46, %v5725_v22  ;;  %v1634_v17 = vpop.xlane.xlu2 %1633 }
 0x20a   : > { %v1674_v28 = vsub.f32 %v5754_v21, %v1634_v17 }
 0x20b   : > { %v1659_v49 = vsel %vm1622_vm2, %v5772_v48, -inf  ;;  %v1644_v13 = vsel %vm1622_vm2, %v5796_v4, -inf  ;;  %v5812_v27 = vpop.eup %5272 }
 0x20c   : > { %1660 = vmax.xlane.f32.xlu2 %v1659_v49  ;;  %v1725_v31 = vsel %vm1622_vm2, %v5812_v27, 0.0  ;;  %v1693_v32 = vmul.f32 1.442695, %v1674_v28 }
 0x20e   : > { %5274 = vpow2.f32 %v1693_v32 }
 0x210   : > { %v1589_v52 = vpop.f32.mrf.mxu2  ;;  %v1527_v55 = vpop.f32.mrf.mxu3 }
 0x211   : > { %v5779_v54 = vadd.f32 %v1589_v52, %v5725_v22  ;;  %v5822_v34 = vadd.f32 %v1527_v55, %v5714_v63 }
 0x212   : > { %v1557_v56 = vpop.f32.mrf.mxu1 }
 0x213   : > { %v5783_v58 = vadd.f32 %v1557_v56, %v5714_v63  ;;  %v1662_v59 = vsel %vm1622_vm2, %v5779_v54, -inf  ;;  %v1647_v35 = vsel %vm1622_vm2, %v5822_v34, -inf }
 0x214   : > { %1663 = vmax.xlane.f32.xlu0 %v1662_v59  ;;  %1720 = vadd.xlane.f32.xlu2 %v1719_v60  ;;  %v5831_v37 = vpop.eup %5274 }
 0x215   : > { %v1653_v62 = vsel %vm1622_vm2, %v5783_v58, -inf  ;;  %v1728_v3 = vsel %vm1622_vm2, %v5831_v37, 0.0 }
 0x216   : > { %1654 = vmax.xlane.f32.xlu1 %v1653_v62 }
 0x218   : > { %v1529_v10 = vpop.f32.mrf.mxu3 }
 0x219   : > { %v5810_v24 = vadd.f32 %v1529_v10, %v5725_v22 }
 0x21a   : > { %v1559_v7 = vpop.f32.mrf.mxu1 }
 0x21b   : > { %v5799_v8 = vadd.f32 %v1559_v7, %v5725_v22  ;;  %v1650_v11 = vsel %vm1622_vm2, %v5810_v24, -inf }
 0x21c   : > { %1642 = vmax.xlane.f32.xlu0 %v1641_v0 }
 0x21d   : > { %v1656_v14 = vsel %vm1622_vm2, %v5799_v8, -inf }
 0x21e   : > { %1645 = vmax.xlane.f32.xlu1 %v1644_v13  ;;  %1657 = vmax.xlane.f32.xlu2 %v1656_v14 }
 0x220   : > { %v1617_v33 = vpop.f32.mrf.mxu3 }
 0x221   : > { %v5825_v21 = vadd.f32 %v1617_v33, %v5714_v63 }
 0x223   : > { %v1665_v36 = vsel %vm1622_vm2, %v5825_v21, -inf }
 0x224   : > { %1723 = vadd.xlane.f32.xlu0 %v1722_v29 }
 0x226   : > { %1651 = vmax.xlane.f32.xlu1 %v1650_v11  ;;  %1726 = vadd.xlane.f32.xlu2 %v1725_v31 }
 0x228   : > { %v1619_v5 = vpop.f32.mrf.mxu3 }
 0x229   : > { %v5836_v40 = vadd.f32 %v1619_v5, %v5725_v22 }
 0x22b   : > { %v1668_v63 = vsel %vm1622_vm2, %v5836_v40, -inf }
 0x22c   : > { %1648 = vmax.xlane.f32.xlu0 %v1647_v35 }
 0x22e   : > { %1666 = vmax.xlane.f32.xlu2 %v1665_v36 }
 0x234   : > { %1729 = vadd.xlane.f32.xlu0 %v1728_v3 }
 0x23c   : > { %1669 = vmax.xlane.f32.xlu0 %v1668_v63 }
 0x267   : > { %v1637_v42 = vpop.xlane.xlu0 %1636 }
 0x268   : > { %v1675_v43 = vsub.f32 %v5761_v39, %v1637_v42 }
 0x26a   : > { %v1695_v23 = vmul.f32 1.442695, %v1675_v43 }
 0x26c   : > { %5276 = vpow2.f32 %v1695_v23 }
 0x26f   : > { %v1640_v44 = vpop.xlane.xlu1 %1639 }
 0x270   : > { %v1676_v45 = vsub.f32 %v5766_v41, %v1640_v44 }
 0x272   : > { %v5842_v46 = vpop.eup %5276  ;;  %v1697_v47 = vmul.f32 1.442695, %v1676_v45 }
 0x273   : > { %v1731_v49 = vsel %vm1622_vm2, %v5842_v46, 0.0 }
 0x274   : > { %5278 = vpow2.f32 %v1697_v47  ;;  %1732 = vadd.xlane.f32.xlu0 %v1731_v49 }
 0x27a   : > { %v5846_v22 = vpop.eup %5278 }
 0x27b   : > { %v1734_v50 = vsel %vm1622_vm2, %v5846_v22, 0.0 }
 0x27c   : > { %1735 = vadd.xlane.f32.xlu1 %v1734_v50 }
 0x27f   : > { %v1661_v39 = vpop.xlane.xlu2 %1660 }
 0x280   : > { %v1683_v52 = vsub.f32 %v5772_v48, %v1661_v39 }
 0x282   : > { %v1711_v53 = vmul.f32 1.442695, %v1683_v52 }
 0x284   : > { %5280 = vpow2.f32 %v1711_v53 }
 0x287   : > { %v1664_v41 = vpop.xlane.xlu0 %1663  ;;  %v1721_v61 = vpop.xlane.xlu2 %1720 }
 0x288   : > { %v1684_v9 = vsub.f32 %v5779_v54, %v1664_v41 }
 0x289   : > { %v1655_v55 = vpop.xlane.xlu1 %1654 }
 0x28a   : > { %v5852_v56 = vpop.eup %5280  ;;  %v1713_v59 = vmul.f32 1.442695, %v1684_v9  ;;  %v1681_v31 = vsub.f32 %v5783_v58, %v1655_v55 }
 0x28b   : > { %v1755_v60 = vsel %vm1622_vm2, %v5852_v56, 0.0 }
 0x28c   : > { %5282 = vpow2.f32 %v1713_v59  ;;  %1756 = vadd.xlane.f32.xlu2 %v1755_v60  ;;  %v1707_v63 = vmul.f32 1.442695, %v1681_v31 }
 0x28d   : > { %5284 = vrcp.f32 %v1721_v61 }
 0x28f   : > { %v1643_v62 = vpop.xlane.xlu0 %1642 }
 0x290   : > { %v1677_v1 = vsub.f32 %v5793_v38, %v1643_v62 }
 0x291   : > { %v1646_v2 = vpop.xlane.xlu1 %1645  ;;  %v1658_v12 = vpop.xlane.xlu2 %1657 }
 0x292   : > { %v5857_v48 = vpop.eup %5282  ;;  %v1699_v7 = vmul.f32 1.442695, %v1677_v1  ;;  %v1678_v54 = vsub.f32 %v5796_v4, %v1646_v2  ;;  %v1682_v58 = vsub.f32 %v5799_v8, %v1658_v12 }
 0x293   : > { %v1758_v0 = vsel %vm1622_vm2, %v5857_v48, 0.0  ;;  %v5285_v14 = vpop.eup %5284 }
 0x294   : > { %5286 = vpow2.f32 %v1699_v7  ;;  %v1701_v10 = vmul.f32 1.442695, %v1678_v54  ;;  %1759 = vadd.xlane.f32.xlu0 %v1758_v0  ;;  %v1783_v17 = vmul.f32 %v5285_v14, %v5776_v51  ;;  %v1709_v45 = vmul.f32 1.442695, %v1682_v58 }
 0x296   : > { %5288 = vpow2.f32 %v1701_v10  ;;  %v1799_v28 = vpack.c.bf16 %v1783_v17, %v1783_v17 }
 0x297   : > { %v1724_v13 = vpop.xlane.xlu0 %1723 }
 0x298   : > { %5290 = vrcp.f32 %v1724_v13  ;;  %v1817_v33 = vunpack.c.l.b16 %v1799_v28 }
 0x299   : > { %v1652_v15 = vpop.xlane.xlu1 %1651  ;;  %v1727_v30 = vpop.xlane.xlu2 %1726 }
 0x29a   : > { %v5862_v38 = vpop.eup %5286  ;;  %v1680_v16 = vsub.f32 %v5810_v24, %v1652_v15 }
 0x29b   : > { %v1737_v4 = vsel %vm1622_vm2, %v5862_v38, 0.0 }
 0x29c   : > { %v5868_v18 = vpop.eup %5288  ;;  %v1705_v19 = vmul.f32 1.442695, %v1680_v16  ;;  %1738 = vadd.xlane.f32.xlu2 %v1737_v4 }
 0x29d   : > { %v1740_v25 = vsel %vm1622_vm2, %v5868_v18, 0.0 }
 0x29e   : > { %v5291_v26 = vpop.eup %5290  ;;  %5292 = vpow2.f32 %v1705_v19  ;;  %1741 = vadd.xlane.f32.xlu0 %v1740_v25 }
 0x29f   : > { %v1784_v29 = vmul.f32 %v5291_v26, %v5807_v20  ;;  %v1649_v24 = vpop.xlane.xlu0 %1648  ;;  %5294 = vrcp.f32 %v1727_v30 }
 0x2a0   : > { %v1679_v51 = vsub.f32 %v5822_v34, %v1649_v24 }
 0x2a1   : > { %v1800_v11 = vpack.c.bf16 %v1784_v29, %v1784_v29  ;;  %v1667_v9 = vpop.xlane.xlu2 %1666 }
 0x2a2   : > { %v1703_v32 = vmul.f32 1.442695, %v1679_v51  ;;  %v1685_v55 = vsub.f32 %v5825_v21, %v1667_v9 }
 0x2a3   : > { %v1818_v35 = vunpack.c.l.b16 %v1800_v11 }
 0x2a4   : > { %v5875_v36 = vpop.eup %5292  ;;  %5296 = vpow2.f32 %v1703_v32  ;;  %v1715_v59 = vmul.f32 1.442695, %v1685_v55 }
 0x2a5   : > { %v1746_v3 = vsel %vm1622_vm2, %v5875_v36, 0.0  ;;  %v1819_v5 = vpack.c.b16 %v1818_v35, %v1817_v33  ;;  %v5295_v34 = vpop.eup %5294 }
 0x2a6   : > { %1747 = vadd.xlane.f32.xlu2 %v1746_v3  ;;  %v1785_v43 = vmul.f32 %v5295_v34, %v5812_v27 }
 0x2a7   : > { %v1730_v20 = vpop.xlane.xlu0 %1729  ;;  %4335 = vmatmul.msk.bf16.vlgmr.msrb.gmra.mxu0 %vm1622_vm2, %v1819_v5 }
 0x2a8   : > { %5298 = vrcp.f32 %v1730_v20  ;;  %v1801_v47 = vpack.c.bf16 %v1785_v43, %v1785_v43 }
 0x2a9   : > { %5300 = vpow2.f32 %v1707_v63 }
 0x2aa   : > { %v5880_v42 = vpop.eup %5296  ;;  %5302 = vpow2.f32 %v1709_v45  ;;  %v1845_v52 = vunpack.c.l.b16 %v1801_v47 }
 0x2ab   : > { %v1743_v23 = vsel %vm1622_vm2, %v5880_v42, 0.0  ;;  %5304 = vpow2.f32 %v1715_v59 }
 0x2ac   : > { %1744 = vadd.xlane.f32.xlu1 %v1743_v23 }
 0x2ae   : > { %v5299_v44 = vpop.eup %5298 }
 0x2af   : > { %v1786_v49 = vmul.f32 %v5299_v44, %v5831_v37  ;;  %v5887_v50 = vpop.eup %5300  ;;  %v1670_v60 = vpop.xlane.xlu0 %1669 }
 0x2b0   : > { %v1749_v27 = vsel %vm1622_vm2, %v5887_v50, 0.0  ;;  %v5894_v41 = vpop.eup %5302  ;;  %v1686_v61 = vsub.f32 %v5836_v40, %v1670_v60 }
 0x2b1   : > { %v1802_v39 = vpack.c.bf16 %v1786_v49, %v1786_v49  ;;  %v1752_v37 = vsel %vm1622_vm2, %v5894_v41, 0.0  ;;  %v5904_v62 = vpop.eup %5304 }
 0x2b2   : > { %5214 = vrot.lane.b32.xlu0 %v5704_v6, %s5387_s17  ;;  %v1717_v1 = vmul.f32 1.442695, %v1686_v61  ;;  %v1761_v2 = vsel %vm1622_vm2, %v5904_v62, 0.0 }
 0x2b3   : > { %v1846_v8 = vunpack.c.l.b16 %v1802_v39 }
 0x2b4   : > { %1750 = vadd.xlane.f32.xlu1 %v1749_v27  ;;  %5306 = vpow2.f32 %v1717_v1 }
 0x2b5   : > { %v1847_v53 = vpack.c.b16 %v1846_v8, %v1845_v52 }
 0x2b7   : > { %4336 = vmatmul.msk.bf16.vlgmr.msra.gmra.mxu1 %vm1622_vm2, %v1847_v53 }
 0x2bc   : > { %1753 = vadd.xlane.f32.xlu1 %v1752_v37 }
 0x2be   : > { %5209 = vrot.lane.b32.xlu2 %v5704_v6, %s5388_s24  ;;  %v5908_v6 = vpop.eup %5306 }
 0x2bf   : > { %v1764_v21 = vsel %vm1622_vm2, %v5908_v6, 0.0 }
 0x2d5   : > { %5219 = vrot.lane.b32.xlu1 %v5741_v57, %s5388_s24 }
 0x2dc   : > { %1762 = vadd.xlane.f32.xlu0 %v1761_v2 }
 0x2e7   : > { %v1733_v7 = vpop.xlane.xlu0 %1732  ;;  %1765 = vadd.xlane.f32.xlu2 %v1764_v21 }
 0x2e8   : > { %5308 = vrcp.f32 %v1733_v7 }
 0x2ee   : > { %v5309_v54 = vpop.eup %5308 }
 0x2ef   : > { %v1736_v40 = vpop.xlane.xlu1 %1735  ;;  %v1787_v0 = vmul.f32 %v5309_v54, %v5842_v46 }
 0x2f0   : > { %5310 = vrcp.f32 %v1736_v40  ;;  %5224 = vrot.lane.b32.xlu0 %v5741_v57, %s5387_s17 }
 0x2f1   : > { %v1803_v12 = vpack.c.bf16 %v1787_v0, %v1787_v0 }
 0x2f3   : > { %v1873_v15 = vunpack.c.l.b16 %v1803_v12 }
 0x2f6   : > { %v5311_v10 = vpop.eup %5310 }
 0x2f7   : > { %v1788_v13 = vmul.f32 %v5311_v10, %v5846_v22 }
 0x2f9   : > { %v1804_v14 = vpack.c.bf16 %v1788_v13, %v1788_v13 }
 0x2fb   : > { %v1874_v16 = vunpack.c.l.b16 %v1804_v14 }
 0x2fd   : > { %v1875_v17 = vpack.c.b16 %v1874_v16, %v1873_v15 }
 0x2ff   : > { %4337 = vmatmul.msk.bf16.vlgmr.msra.gmra.mxu2 %vm1622_vm2, %v1875_v17  ;;  %v1757_v4 = vpop.xlane.xlu2 %1756 }
 0x307   : > { %v1760_v19 = vpop.xlane.xlu0 %1759 }
 0x30f   : > { %v1739_v25 = vpop.xlane.xlu2 %1738 }
 0x310   : > { %5312 = vrcp.f32 %v1739_v25 }
 0x311   : > { %v1742_v26 = vpop.xlane.xlu0 %1741 }
 0x312   : > { %5314 = vrcp.f32 %v1742_v26 }
 0x313   : > { %5316 = vrcp.f32 %v1760_v19 }
 0x314   : > { %5318 = vrcp.f32 %v1757_v4 }
 0x316   : > { %v5313_v57 = vpop.eup %5312 }
 0x317   : > { %v1789_v46 = vmul.f32 %v5313_v57, %v5862_v38 }
 0x318   : > { %v5315_v28 = vpop.eup %5314 }
 0x319   : > { %v1805_v29 = vpack.c.bf16 %v1789_v46, %v1789_v46  ;;  %v1790_v22 = vmul.f32 %v5315_v28, %v5868_v18  ;;  %v1748_v30 = vpop.xlane.xlu2 %1747  ;;  %v5317_v24 = vpop.eup %5316 }
 0x31a   : > { %5320 = vrcp.f32 %v1748_v30  ;;  %v5319_v32 = vpop.eup %5318  ;;  %v1796_v33 = vmul.f32 %v5317_v24, %v5857_v48 }
 0x31b   : > { %v1806_v51 = vpack.c.bf16 %v1790_v22, %v1790_v22  ;;  %v1901_v11 = vunpack.c.l.b16 %v1805_v29  ;;  %v1795_v38 = vmul.f32 %v5319_v32, %v5852_v56 }
 0x31c   : > { %v1812_v20 = vpack.c.bf16 %v1796_v33, %v1796_v33 }
 0x31d   : > { %v1902_v31 = vunpack.c.l.b16 %v1806_v51  ;;  %v1811_v45 = vpack.c.bf16 %v1795_v38, %v1795_v38 }
 0x31e   : > { %v1986_v39 = vunpack.c.l.b16 %v1812_v20 }
 0x31f   : > { %v1903_v35 = vpack.c.b16 %v1902_v31, %v1901_v11  ;;  %v1745_v3 = vpop.xlane.xlu1 %1744  ;;  %v1985_v55 = vunpack.c.l.b16 %v1811_v45 }
 0x320   : > { %v5321_v5 = vpop.eup %5320  ;;  %5322 = vrcp.f32 %v1745_v3 }
 0x321   : > { %4338 = vmatmul.msk.bf16.vlgmr.msra.gmra.mxu3 %vm1622_vm2, %v1903_v35  ;;  %v5210_v63 = vpop.permute.xlu2 %5209  ;;  %v1792_v58 = vmul.f32 %v5321_v5, %v5875_v36  ;;  %v1987_v61 = vpack.c.b16 %v1986_v39, %v1985_v55  ;;  %v4990_v55 = vld [vmem:[%s5526_s29 + $0x28] sm:$0xff] }
 0x322   : > { %v5212_v18 = vunpack.i.h.bf16 %v5210_v63  ;;  %v5211_v34 = vunpack.i.l.bf16 %v5210_v63 }
 0x323   : > { %v1808_v27 = vpack.c.bf16 %v1792_v58, %v1792_v58 }
 0x324   : > { %v1369_v43 = vpack.c.bf16 %v5212_v18, %v5212_v18  ;;  %v1368_v23 = vpack.c.bf16 %v5211_v34, %v5211_v34  ;;  %v5215_v44 = vpop.permute.xlu0 %5214 }
 0x325   : > { %v5217_v47 = vunpack.i.h.bf16 %v5215_v44  ;;  %v5216_v48 = vunpack.i.l.bf16 %v5215_v44  ;;  %v1930_v1 = vunpack.c.l.b16 %v1808_v27 }
 0x326   : > { %v5323_v49 = vpop.eup %5322  ;;  %v1991_v52 = vunpack.c.l.b16 %v1369_v43  ;;  %v1990_v8 = vunpack.c.l.b16 %v1368_v23  ;;  %v1838_v23 = vpop.f32.mrf.mxu0 }
 0x327   : > { %v1791_v56 = vmul.f32 %v5323_v49, %v5880_v42  ;;  %v1365_v53 = vpack.c.bf16 %v5217_v47, %v5217_v47  ;;  %v1364_v37 = vpack.c.bf16 %v5216_v48, %v5216_v48  ;;  %v1751_v40 = vpop.xlane.xlu1 %1750 }
 0x328   : > { %v1992_v9 = vpack.c.b16 %v1991_v52, %v1990_v8 }
 0x329   : > { %v1807_v59 = vpack.c.bf16 %v1791_v56, %v1791_v56  ;;  %v1935_v60 = vunpack.c.l.b16 %v1365_v53  ;;  %v1934_v36 = vunpack.c.l.b16 %v1364_v37  ;;  %v4992_v53 = vld [vmem:[%s5526_s29 + $0x38] sm:$0xff] }
 0x32a   : > { %2004 = vmatpush.bf16.msrb.mxu2 %v1992_v9  ;;  %v4991_v9 = vld [vmem:[%s5526_s29 + $0x30] sm:$0xff] }
 0x32b   : > { %v1929_v2 = vunpack.c.l.b16 %v1807_v59  ;;  %v1936_v21 = vpack.c.b16 %v1935_v60, %v1934_v36 }
 0x32d   : > { %v1931_v7 = vpack.c.b16 %v1930_v1, %v1929_v2  ;;  %1948 = vmatpush.bf16.msra.mxu0 %v1936_v21  ;;  %4341 = vmatmul.msk.bf16.vlgmr.msrb.gmra.mxu2 %vm1622_vm2, %v1987_v61 }
 0x32e   : > { %v1840_v45 = vpop.f32.mrf.mxu0 }
 0x32f   : > { %v1754_v42 = vpop.xlane.xlu1 %1753 }
 0x330   : > { %4339 = vmatmul.msk.bf16.vlgmr.msra.gmra.mxu0 %vm1622_vm2, %v1931_v7  ;;  %v4989_v7 = vld [vmem:[%s5526_s29 + $0x20] sm:$0xff] }
 0x331   : > { %2171 = vmatpush.bf16.msrb.mxu0 %v4992_v53 }
 0x334   : > { %v5937_v37 = vpop.f32.mrf.mxu1 }
 0x335   : > { %2172 = vmatpush.bf16.msrb.mxu0 %v4991_v9 }
 0x339   : > { %2173 = vmatpush.bf16.msrb.mxu0 %v4990_v55  ;;  %v5008_v55 = vld [vmem:[%s5554_s23 + $0x38] sm:$0xff] }
 0x33a   : > { %2451 = vmatpush.bf16.msra.mxu2 %v5008_v55 }
 0x33c   : > { %v1868_v59 = vpop.f32.mrf.mxu1 }
 0x33d   : > { %2174 = vmatpush.bf16.msrb.mxu0 %v4989_v7 }
 0x347   : > { %v5220_v54 = vpop.permute.xlu1 %5219 }
 0x348   : > { %v5222_v0 = vunpack.i.h.bf16 %v5220_v54  ;;  %v5221_v10 = vunpack.i.l.bf16 %v5220_v54  ;;  %v4986_v54 = vld [vmem:[%s5526_s29 + $0x8] sm:$0xff] }
 0x34a   : > { %v1371_v12 = vpack.c.bf16 %v5222_v0, %v5222_v0  ;;  %v1370_v13 = vpack.c.bf16 %v5221_v10, %v5221_v10  ;;  %v4985_v0 = vld [vmem:[%s5526_s29] sm:$0xff] }
 0x34c   : > { %v2019_v14 = vunpack.c.l.b16 %v1371_v12  ;;  %v2018_v15 = vunpack.c.l.b16 %v1370_v13 }
 0x34e   : > { %v2020_v16 = vpack.c.b16 %v2019_v14, %v2018_v15 }
 0x34f   : > { %v1763_v17 = vpop.xlane.xlu0 %1762 }
 0x350   : > { %2032 = vmatpush.bf16.msrb.mxu3 %v2020_v16  ;;  %5324 = vrcp.f32 %v1763_v17 }
 0x351   : > { %5326 = vrcp.f32 %v1754_v42  ;;  %v4987_v42 = vld [vmem:[%s5526_s29 + $0x10] sm:$0xff] }
 0x352   : > { %5328 = vrcp.f32 %v1751_v40  ;;  %v4988_v40 = vld [vmem:[%s5526_s29 + $0x18] sm:$0xff]  ;;  %s6459_s29 = scalar_lea.vmem %s6403_s15, %s5518_s2 }
 0x353   : > { %2175 = vmatpush.bf16.msrb.mxu0 %v4988_v40 }
 0x356   : > { %v5325_v19 = vpop.eup %5324 }
 0x357   : > { %v5327_v25 = vpop.eup %5326  ;;  %v1797_v26 = vmul.f32 %v5325_v19, %v5904_v62  ;;  %2176 = vmatpush.bf16.msrb.mxu0 %v4987_v42 }
 0x358   : > { %v5329_v57 = vpop.eup %5328  ;;  %v1794_v46 = vmul.f32 %v5327_v25, %v5894_v41 }
 0x359   : > { %v1793_v29 = vmul.f32 %v5329_v57, %v5887_v50  ;;  %v1813_v22 = vpack.c.bf16 %v1797_v26, %v1797_v26 }
 0x35a   : > { %v1766_v4 = vpop.xlane.xlu2 %1765  ;;  %v1810_v31 = vpack.c.bf16 %v1794_v46, %v1794_v46 }
 0x35b   : > { %5330 = vrcp.f32 %v1766_v4  ;;  %v1809_v3 = vpack.c.bf16 %v1793_v29, %v1793_v29  ;;  %v2013_v5 = vunpack.c.l.b16 %v1813_v22  ;;  %2177 = vmatpush.bf16.msrb.mxu0 %v4986_v54  ;;  %v5361_v54 = vld [vmem:[#allocation2 + $0x8] sm:$0xff] }
 0x35c   : > { %v1958_v20 = vunpack.c.l.b16 %v1810_v31  ;;  %v4996_v31 = vld [vmem:[%s6452_s19 + $0x18] sm:$0xff] }
 0x35d   : > { %v1957_v34 = vunpack.c.l.b16 %v1809_v3 }
 0x35f   : > { %v1959_v50 = vpack.c.b16 %v1958_v20, %v1957_v34  ;;  %2178 = vmatpush.bf16.msrb.mxu0 %v4985_v0 }
 0x361   : > { %v5331_v28 = vpop.eup %5330 }
 0x362   : > { %v1798_v30 = vmul.f32 %v5331_v28, %v5908_v6  ;;  %v5225_v24 = vpop.permute.xlu0 %5224 }
 0x363   : > { %v5227_v51 = vunpack.i.h.bf16 %v5225_v24  ;;  %v5226_v11 = vunpack.i.l.bf16 %v5225_v24  ;;  %v4999_v24 = vld [vmem:[%s6452_s19 + $0x30] sm:$0xff] }
 0x364   : > { %v1814_v32 = vpack.c.bf16 %v1798_v30, %v1798_v30  ;;  %v5000_v30 = vld [vmem:[%s6452_s19 + $0x38] sm:$0xff] }
 0x365   : > { %v1367_v33 = vpack.c.bf16 %v5227_v51, %v5227_v51  ;;  %v1366_v35 = vpack.c.bf16 %v5226_v11, %v5226_v11  ;;  %v4998_v51 = vld [vmem:[%s6452_s19 + $0x28] sm:$0xff]  ;;  %v4997_v11 = vld [vmem:[%s6452_s19 + $0x20] sm:$0xff] }
 0x366   : > { %v2014_v38 = vunpack.c.l.b16 %v1814_v32  ;;  %v4995_v32 = vld [vmem:[%s6452_s19 + $0x10] sm:$0xff] }
 0x367   : > { %v1963_v62 = vunpack.c.l.b16 %v1367_v33  ;;  %v1962_v63 = vunpack.c.l.b16 %v1366_v35  ;;  %v4994_v35 = vld [vmem:[%s6452_s19 + $0x8] sm:$0xff] }
 0x368   : > { %v2015_v41 = vpack.c.b16 %v2014_v38, %v2013_v5 }
 0x369   : > { %v1964_v18 = vpack.c.b16 %v1963_v62, %v1962_v63 }
 0x36a   : > { %4342 = vmatmul.msk.bf16.vlgmr.msrb.gmra.mxu3 %vm1622_vm2, %v2015_v41 }
 0x36b   : > { %1976 = vmatpush.bf16.msrb.mxu1 %v1964_v18 }
 0x36e   : > { %4340 = vmatmul.msk.bf16.vlgmr.msrb.gmra.mxu1 %vm1622_vm2, %v1959_v50 }
 0x36f   : > { %2369 = vmatpush.bf16.msra.mxu1 %v5000_v30 }
 0x373   : > { %2370 = vmatpush.bf16.msra.mxu1 %v4999_v24 }
 0x377   : > { %2371 = vmatpush.bf16.msra.mxu1 %v4998_v51 }
 0x37b   : > { %2372 = vmatpush.bf16.msra.mxu1 %v4997_v11 }
 0x37f   : > { %2373 = vmatpush.bf16.msra.mxu1 %v4996_v31 }
 0x382   : > { %v1894_v6 = vpop.f32.mrf.mxu2 }
 0x383   : > { %2374 = vmatpush.bf16.msra.mxu1 %v4995_v32 }
 0x387   : > { %2375 = vmatpush.bf16.msra.mxu1 %v4994_v35 }
 0x38a   : > { %v1896_v58 = vpop.f32.mrf.mxu2 }
 0x38b   : > { %v5228_v43 = vpack.i.bf16 %v1896_v58, %v1894_v6 }
 0x38d   : > { %5229 = vrot.lane.b32.xlu2 %v5228_v43, %s5388_s24 }
 0x3a4   : > { %v1922_v44 = vpop.f32.mrf.mxu3 }
 0x3ac   : > { %v1924_v47 = vpop.f32.mrf.mxu3 }
 0x3ad   : > { %v5243_v48 = vpack.i.bf16 %v1924_v47, %v1922_v44  ;;  %v1950_v49 = vpop.f32.mrf.mxu0  ;;  %v2299_v47 = vld [vmem:[%s6453_s1] sm:$0x3] }
 0x3af   : > { %5244 = vrot.lane.b32.xlu0 %v5243_v48, %s5388_s24  ;;  %v2317_v48 = vpack.c.bf16 %v2299_v47, %v2299_v47 }
 0x3b0   : > { %v2006_v39 = vpop.f32.mrf.mxu2 }
 0x3b5   : > { %v1952_v52 = vpop.f32.mrf.mxu0 }
 0x3b6   : > { %v5233_v8 = vpack.i.bf16 %v1952_v52, %v1950_v49  ;;  %v5258_v49 = vld [vmem:[%s6455_s26] ss:$0 sm:$0xff] }
 0x3b8   : > { %5234 = vrot.lane.b32.xlu1 %v5233_v8, %s5387_s17  ;;  %v2008_v27 = vpop.f32.mrf.mxu2  ;;  %v5358_v8 = vld [vmem:[#allocation2 + $0x10] sm:$0xff] }
 0x3b9   : > { %v5238_v56 = vpack.i.bf16 %v2008_v27, %v2006_v39 }
 0x3c0   : > { %5239 = vrot.lane.b32.xlu1 %v5238_v56, %s5386_s13 }
 0x3e7   : > { %v5230_v12 = vpop.permute.xlu2 %5229 }
 0x3e8   : > { %v5232_v13 = vunpack.i.h.bf16 %v5230_v12  ;;  %v5231_v14 = vunpack.i.l.bf16 %v5230_v12  ;;  %v5390_v12 = vmov 128.0  }
 0x3e9   : > { %5332 = vrcp.f32 %v5390_v12 }
 0x3ea   : > { %v2064_v4 = vsel %vm1391_vm0, %v1840_v45, %v5232_v13  ;;  %v2063_v19 = vsel %vm1391_vm0, %v1838_v23, %v5231_v14  ;;  %v4993_v45 = vld [vmem:[%s6452_s19] sm:$0xff]  ;;  %v5002_v13 = vld [vmem:[%s5554_s23 + $0x8] sm:$0xff] }
 0x3eb   : > { %v1978_v60 = vpop.f32.mrf.mxu1  ;;  %2376 = vmatpush.bf16.msra.mxu1 %v4993_v45  ;;  %v5259_v14 = vld [vmem:[%s6456_s11] ss:$0 sm:$0xff] }
 0x3ed   : > { %v2034_v36 = vpop.f32.mrf.mxu3 }
 0x3ee   : > { %2377 = vmatmul.bf16.vlgmr.msra.gmra.mxu1 %v2317_v48 }
 0x3f3   : > { %v1980_v61 = vpop.f32.mrf.mxu1 }
 0x3f4   : > { %v5248_v1 = vpack.i.bf16 %v1980_v61, %v1978_v60  ;;  %v5006_v60 = vld [vmem:[%s5554_s23 + $0x28] sm:$0xff]  ;;  %v5004_v61 = vld [vmem:[%s5554_s23 + $0x18] sm:$0xff] }
 0x3f5   : > { %v2036_v2 = vpop.f32.mrf.mxu3 }
 0x3f6   : > { %v5253_v21 = vpack.i.bf16 %v2036_v2, %v2034_v36  ;;  %5249 = vrot.lane.b32.xlu1 %v5248_v1, %s5387_s17  ;;  %v5005_v36 = vld [vmem:[%s5554_s23 + $0x20] sm:$0xff]  ;;  %s6458_s17 = scalar_lea.vmem %s6402_s14, %s5518_s2 }
 0x3f8   : > { %5254 = vrot.lane.b32.xlu2 %v5253_v21, %s5386_s13  ;;  %v5360_v21 = vld [vmem:[#allocation2 + $0x18] sm:$0xff] }
 0x421   : > { %v5245_v33 = vpop.permute.xlu0 %5244 }
 0x422   : > { %v5247_v3 = vunpack.i.h.bf16 %v5245_v33  ;;  %v5246_v5 = vunpack.i.l.bf16 %v5245_v33 }
 0x424   : > { %v2096_v41 = vsel %vm1391_vm0, %v1868_v59, %v5247_v3  ;;  %v2095_v18 = vsel %vm1391_vm0, %v5937_v37, %v5246_v5  ;;  %v5359_v37 = vld [vmem:[#allocation2] sm:$0xff]  ;;  %v5007_v59 = vld [vmem:[%s5554_s23 + $0x30] sm:$0xff] }
 0x425   : > { %2452 = vmatpush.bf16.msra.mxu2 %v5007_v59 }
 0x429   : > { %2453 = vmatpush.bf16.msra.mxu2 %v5006_v60  ;;  %v5262_v60 = vld [vmem:[%s6459_s29] ss:$0 sm:$0xff] }
 0x42a   : > { %v5235_v10 = vpop.permute.xlu1 %5234 }
 0x42b   : > { %v5237_v15 = vunpack.i.h.bf16 %v5235_v10  ;;  %v5236_v16 = vunpack.i.l.bf16 %v5235_v10  ;;  %v5003_v10 = vld [vmem:[%s5554_s23 + $0x10] sm:$0xff] }
 0x42d   : > { %v2066_v57 = vsel %vm2065_vm4, %v2063_v19, %v5236_v16  ;;  %v2067_v46 = vsel %vm2065_vm4, %v2064_v4, %v5237_v15  ;;  %2454 = vmatpush.bf16.msra.mxu2 %v5005_v36  ;;  %v5333_v15 = vpop.eup %5332 }
 0x42e   : > { %v2203_v19 = vmul.f32 128.0, %v5333_v15  ;;  %vm2207_vm6 = vweird.f32 %v5333_v15 }
 0x431   : > { %2455 = vmatpush.bf16.msra.mxu2 %v5004_v61 }
 0x432   : > { %v5240_v17 = vpop.permute.xlu1 %5239 }
 0x433   : > { %v5242_v25 = vunpack.i.h.bf16 %v5240_v17  ;;  %v5241_v26 = vunpack.i.l.bf16 %v5240_v17  ;;  %v5001_v17 = vld [vmem:[%s5554_s23] sm:$0xff] }
 0x435   : > { %v2070_v28 = vsel %vm2068_vm5, %v2067_v46, %v5242_v25  ;;  %v2069_v29 = vsel %vm2068_vm5, %v2066_v57, %v5241_v26  ;;  %2456 = vmatpush.bf16.msra.mxu2 %v5003_v10  ;;  %v2204_v26 = vsub.f32 1.0, %v2203_v19 }
 0x436   : > { %v2118_v22 = vpack.c.bf16 %v2070_v28, %v2069_v29 }
 0x437   : > { %v2205_v46 = vmul.f32 %v5333_v15, %v2204_v26 }
 0x438   : > { %2179 = vmatmul.bf16.vlgmr.msrb.gmra.mxu0 %v2118_v22 }
 0x439   : > { %2457 = vmatpush.bf16.msra.mxu2 %v5002_v13  ;;  %v2206_v28 = vadd.f32 %v5333_v15, %v2205_v46 }
 0x43b   : > { %v5990_v29 = vsel %vm2207_vm6, %v5333_v15, %v2206_v28 }
 0x43d   : > { %2458 = vmatpush.bf16.msra.mxu2 %v5001_v17 }
 0x452   : > { %v5255_v38 = vpop.permute.xlu2 %5254 }
 0x453   : > { %v5257_v34 = vunpack.i.h.bf16 %v5255_v38  ;;  %v5256_v50 = vunpack.i.l.bf16 %v5255_v38 }
 0x468   : > { %v5250_v62 = vpop.permute.xlu1 %5249 }
 0x469   : > { %v5252_v63 = vunpack.i.h.bf16 %v5250_v62  ;;  %v5251_v20 = vunpack.i.l.bf16 %v5250_v62 }
 0x46b   : > { %v2097_v6 = vsel %vm2065_vm4, %v2095_v18, %v5251_v20  ;;  %v2098_v58 = vsel %vm2065_vm4, %v2096_v41, %v5252_v63  ;;  %v2378_v16 = vpop.f32.mrf.mxu1 }
 0x46c   : > { %v2099_v43 = vsel %vm2068_vm5, %v2097_v6, %v5256_v50  ;;  %v2100_v23 = vsel %vm2068_vm5, %v2098_v58, %v5257_v34  ;;  %v2379_v4 = vadd.f32 %v5259_v14, %v2378_v16 }
 0x46d   : > { %v2119_v44 = vpack.c.bf16 %v2100_v23, %v2099_v43 }
 0x46e   : > { %v2399_v25 = vpack.c.bf16 %v2379_v4, %v2379_v4 }
 0x46f   : > { %2184 = vmatmul.bf16.gmra.mxu0 %v2119_v44 }
 0x470   : > { %2459 = vmatmul.bf16.vlgmr.msra.gmra.mxu2 %v2399_v25 }
 0x473   : > { %v2380_v57 = vpop.f32.mrf.mxu1 }
 0x4b5   : > { %v2180_v39 = vpop.f32.mrf.mxu0 }
 0x4b6   : > { %v2181_v52 = vadd.f32 %v5258_v49, %v2180_v39  ;;  %v5260_v39 = vld [vmem:[%s6457_s12] ss:$0 sm:$0xff] }
 0x4b8   : > { %v2190_v27 = vadd.f32 %v5358_v8, %v2181_v52 }
 0x4ba   : > { %2194 = vadd.xlane.f32.xlu0 %v2190_v27 }
 0x4bd   : > { %v2182_v56 = vpop.f32.mrf.mxu0 }
 0x4be   : > { %v2183_v53 = vadd.f32 %v5258_v49, %v2182_v56 }
 0x4c0   : > { %v2191_v9 = vadd.f32 %v5359_v37, %v2183_v53  ;;  %v5261_v37 = vld [vmem:[%s6458_s17] ss:$0 sm:$0xff] }
 0x4c2   : > { %2196 = vadd.xlane.f32.xlu1 %v2191_v9 }
 0x4ec   : > { %v2185_v1 = vpop.f32.mrf.mxu0 }
 0x4ed   : > { %v2186_v2 = vadd.f32 %v5258_v49, %v2185_v1 }
 0x4ef   : > { %v2192_v7 = vadd.f32 %v5360_v21, %v2186_v2 }
 0x4f1   : > { %2198 = vadd.xlane.f32.xlu2 %v2192_v7 }
 0x4f3   : > { %v2460_v18 = vpop.f32.mrf.mxu2 }
 0x4f4   : > { %v2187_v40 = vpop.f32.mrf.mxu0  ;;  %v2461_v53 = vadd.f32 %v5260_v39, %v2460_v18 }
 0x4f5   : > { %v2188_v42 = vadd.f32 %v5258_v49, %v2187_v40 }
 0x4f6   : > { %v2466_v61 = vperm.slane %v2461_v53, 0 }
 0x4f7   : > { %v2193_v0 = vadd.f32 %v5361_v54, %v2188_v42 }
 0x4f9   : > { %2200 = vadd.xlane.f32.xlu0 %v2193_v0 }
 0x4fb   : > { %v2462_v6 = vpop.f32.mrf.mxu2 }
 0x52d   : > { %v2195_v22 = vpop.xlane.xlu0 %2194 }
 0x52e   : > { %v2209_v30 = vmul.f32 %v5990_v29, %v2195_v22 }
 0x530   : > { %v2213_v24 = vsub.f32 %v2190_v27, %v2209_v30 }
 0x532   : > { %v2217_v51 = vmul.f32 %v2213_v24, %v2213_v24 }
 0x534   : > { %2221 = vadd.xlane.f32.xlu1 %v2217_v51 }
 0x535   : > { %v2197_v11 = vpop.xlane.xlu1 %2196 }
 0x536   : > { %v2210_v31 = vmul.f32 %v5990_v29, %v2197_v11  ;;  %v2465_v11 = vrot.slane %v2461_v53, 1 }
 0x538   : > { %v2214_v32 = vsub.f32 %v2191_v9, %v2210_v31 }
 0x53a   : > { %v2218_v33 = vmul.f32 %v2214_v32, %v2214_v32 }
 0x53c   : > { %2223 = vadd.xlane.f32.xlu2 %v2218_v33 }
 0x564   : > { %v2199_v35 = vpop.xlane.xlu2 %2198 }
 0x565   : > { %v2211_v3 = vmul.f32 %v5990_v29, %v2199_v35 }
 0x567   : > { %v5995_v5 = vsub.f32 %v2192_v7, %v2211_v3  ;;  %v2467_v3 = vperm.slane %v2465_v11, 0  ;;  %v5050_v11 = vld [vmem:[%s5564_s27 + $0x14c] sm:$0xf] }
 0x569   : > { %v2219_v38 = vmul.f32 %v5995_v5, %v5995_v5 }
 0x56b   : > { %2225 = vadd.xlane.f32.xlu0 %v2219_v38 }
 0x56c   : > { %v2201_v62 = vpop.xlane.xlu0 %2200 }
 0x56d   : > { %v2212_v63 = vmul.f32 %v5990_v29, %v2201_v62 }
 0x56f   : > { %v6000_v20 = vsub.f32 %v2193_v0, %v2212_v63 }
 0x571   : > { %v2220_v41 = vmul.f32 %v6000_v20, %v6000_v20 }
 0x573   : > { %2227 = vadd.xlane.f32.xlu1 %v2220_v41 }
 0x5a7   : > { %v2222_v34 = vpop.xlane.xlu1 %2221 }
 0x5a8   : > { %v2229_v50 = vmul.f32 %v2222_v34, %v5990_v29 }
 0x5aa   : > { %v2233_v58 = vadd.f32 1e-05, %v2229_v50 }
 0x5ac   : > { %5334 = vrsqrt.f32 %v2233_v58  ;;  %vm2243_vm8 = vweird.f32 %v2233_v58 }
 0x5af   : > { %v2224_v43 = vpop.xlane.xlu2 %2223 }
 0x5b0   : > { %v2230_v23 = vmul.f32 %v2224_v43, %v5990_v29 }
 0x5b2   : > { %v5335_v44 = vpop.eup %5334  ;;  %v2234_v45 = vadd.f32 1e-05, %v2230_v23 }
 0x5b3   : > { %v2238_v47 = vmul.f32 %v5335_v44, %v2233_v58  ;;  %vm2244_vm7 = vweird.f32 %v5335_v44 }
 0x5b4   : > { %5336 = vrsqrt.f32 %v2234_v45  ;;  %vm2245_vm9 = vmor %vm2243_vm8, %vm2244_vm7  ;;  %vm2253_vm11 = vweird.f32 %v2234_v45 }
 0x5b5   : > { %v2239_v48 = vmul.f32 %v5335_v44, %v2238_v47 }
 0x5b7   : > { %v2240_v49 = vmul.f32 0.5, %v2239_v48 }
 0x5b9   : > { %v2241_v52 = vsub.f32 1.5, %v2240_v49 }
 0x5ba   : > { %v5337_v8 = vpop.eup %5336 }
 0x5bb   : > { %v2242_v27 = vmul.f32 %v5335_v44, %v2241_v52  ;;  %v2248_v56 = vmul.f32 %v5337_v8, %v2234_v45  ;;  %vm2254_vm10 = vweird.f32 %v5337_v8 }
 0x5bc   : > { %vm2255_vm12 = vmor %vm2253_vm11, %vm2254_vm10 }
 0x5bd   : > { %v2249_v9 = vmul.f32 %v5337_v8, %v2248_v56  ;;  %v2246_v55 = vsel %vm2245_vm9, %v5335_v44, %v2242_v27 }
 0x5be   : > { %v2277_v59 = vmul.f32 %v2246_v55, %v2213_v24  ;;  %v5065_v55 = vld [vmem:[%s5564_s27 + $0x1c4] sm:$0xf] }
 0x5bf   : > { %v2250_v36 = vmul.f32 0.5, %v2249_v9  ;;  %v5069_v9 = vld [vmem:[%s5564_s27 + $0x1dc] sm:$0xf0] }
 0x5c0   : > { %v2285_v1 = vmul.f32 %v5261_v37, %v2277_v59 }
 0x5c1   : > { %v2251_v2 = vsub.f32 1.5, %v2250_v36  ;;  %v4673_v36 = vld [vmem:[%s5564_s27 + $0x1c8] sm:$0xf] }
 0x5c2   : > { %v2293_v21 = vadd.f32 %v5262_v60, %v2285_v1 }
 0x5c3   : > { %v2252_v7 = vmul.f32 %v5337_v8, %v2251_v2 }
 0x5c4   : > { %v2470_v40 = vadd.f32 %v2466_v61, %v2293_v21  ;;  %v5066_v21 = vld [vmem:[%s5564_s27 + $0x1cc] sm:$0xf] }
 0x5c5   : > { %v2256_v42 = vsel %vm2255_vm12, %v5337_v8, %v2252_v7  ;;  %v4675_v7 = vld [vmem:[%s5564_s27 + $0x1e8] sm:$0xf0] }
 0x5c6   : > { %2474 = vadd.xlane.f32.xlu2 %v2470_v40  ;;  %v2278_v54 = vmul.f32 %v2256_v42, %v2214_v32  ;;  %v4633_v42 = vld [vmem:[%s5564_s27 + $0x180] sm:$0xf] }
 0x5c8   : > { %v2286_v0 = vmul.f32 %v5261_v37, %v2278_v54  ;;  %v5061_v54 = vld [vmem:[%s5564_s27 + $0x19c] sm:$0xf0] }
 0x5ca   : > { %v2294_v10 = vadd.f32 %v5262_v60, %v2286_v0  ;;  %v5057_v0 = vld [vmem:[%s5564_s27 + $0x184] sm:$0xf] }
 0x5cc   : > { %v2471_v12 = vadd.f32 %v2466_v61, %v2294_v10  ;;  %v5070_v61 = vld [vmem:[%s5564_s27 + $0x1e4] sm:$0xf0]  ;;  %v4634_v10 = vor.u32 %v5061_v54, %v4633_v42  ;;  %v4473_v54 = vld [vmem:[%s5564_s27 + $0x40] sm:$0xf] }
 0x5cd   : > { %v4674_v2 = vor.u32 %v5070_v61, %v4673_v36  ;;  %v4507_v36 = vld [vmem:[%s5564_s27 + $0xa0] sm:$0xf0]  ;;  %v4513_v61 = vld [vmem:[%s5564_s27 + $0x88] sm:$0xf] }
 0x5ce   : > { %2476 = vadd.xlane.f32.xlu0 %v2471_v12 }
 0x5cf   : > { %3012 = vmatpush.bf16.msrb.mxu1 %v4674_v2 }
 0x5de   : > { %v2226_v13 = vpop.xlane.xlu0 %2225 }
 0x5df   : > { %v2231_v14 = vmul.f32 %v2226_v13, %v5990_v29  ;;  %v4641_v13 = vld [vmem:[%s5564_s27 + $0x188] sm:$0xf] }
 0x5e1   : > { %v2235_v15 = vadd.f32 1e-05, %v2231_v14  ;;  %v5062_v14 = vld [vmem:[%s5564_s27 + $0x1a4] sm:$0xf0] }
 0x5e3   : > { %5338 = vrsqrt.f32 %v2235_v15  ;;  %vm2263_vm14 = vweird.f32 %v2235_v15 }
 0x5e6   : > { %v2228_v16 = vpop.xlane.xlu1 %2227 }
 0x5e7   : > { %v2232_v17 = vmul.f32 %v2228_v16, %v5990_v29  ;;  %v4642_v16 = vor.u32 %v5062_v14, %v4641_v13  ;;  %v4475_v13 = vld [vmem:[%s5564_s27 + $0x60] sm:$0xf0]  ;;  %v4481_v14 = vld [vmem:[%s5564_s27 + $0x48] sm:$0xf] }
 0x5e9   : > { %v5339_v4 = vpop.eup %5338  ;;  %v2236_v19 = vadd.f32 1e-05, %v2232_v17  ;;  %v5058_v17 = vld [vmem:[%s5564_s27 + $0x18c] sm:$0xf]  ;;  %3013 = vmatpush.bf16.msrb.mxu1 %v4642_v16 }
 0x5ea   : > { %v2258_v25 = vmul.f32 %v5339_v4, %v2235_v15  ;;  %vm2264_vm13 = vweird.f32 %v5339_v4 }
 0x5eb   : > { %5340 = vrsqrt.f32 %v2236_v19  ;;  %vm2265_vm15 = vmor %vm2263_vm14, %vm2264_vm13  ;;  %vm2273_vm1 = vweird.f32 %v2236_v19 }
 0x5ec   : > { %v2259_v26 = vmul.f32 %v5339_v4, %v2258_v25  ;;  %v4601_v25 = vld [vmem:[%s5564_s27 + $0x140] sm:$0xf] }
 0x5ee   : > { %v2260_v57 = vmul.f32 0.5, %v2259_v26  ;;  %v5053_v26 = vld [vmem:[%s5564_s27 + $0x15c] sm:$0xf0] }
 0x5f0   : > { %v2261_v46 = vsub.f32 1.5, %v2260_v57  ;;  %v5049_v57 = vld [vmem:[%s5564_s27 + $0x144] sm:$0xf] }
 0x5f1   : > { %v5341_v28 = vpop.eup %5340 }
 0x5f2   : > { %v2262_v22 = vmul.f32 %v5339_v4, %v2261_v46  ;;  %v2268_v30 = vmul.f32 %v5341_v28, %v2236_v19  ;;  %vm2274_vm0 = vweird.f32 %v5341_v28  ;;  %v4602_v46 = vor.u32 %v5053_v26, %v4601_v25  ;;  %v4483_v25 = vld [vmem:[%s5564_s27 + $0x68] sm:$0xf0] }
 0x5f3   : > { %vm2275_vm2 = vmor %vm2273_vm1, %vm2274_vm0 }
 0x5f4   : > { %v2269_v24 = vmul.f32 %v5341_v28, %v2268_v30  ;;  %v2266_v51 = vsel %vm2265_vm15, %v5339_v4, %v2262_v22  ;;  %v4643_v4 = vld [vmem:[%s5564_s27 + $0x1a8] sm:$0xf0]  ;;  %v4609_v22 = vld [vmem:[%s5564_s27 + $0x148] sm:$0xf] }
 0x5f5   : > { %v2279_v31 = vmul.f32 %v2266_v51, %v5995_v5  ;;  %v4646_v19 = vor.u32 %v5058_v17, %v4643_v4  ;;  %v5054_v30 = vld [vmem:[%s5564_s27 + $0x164] sm:$0xf0] }
 0x5f6   : > { %v2270_v32 = vmul.f32 0.5, %v2269_v24  ;;  %v4610_v51 = vor.u32 %v5054_v30, %v4609_v22  ;;  %v5009_v22 = vld [vmem:[%s5564_s27 + $0x4] sm:$0xf] }
 0x5f7   : > { %v2287_v33 = vmul.f32 %v5261_v37, %v2279_v31  ;;  %v4611_v31 = vld [vmem:[%s5564_s27 + $0x168] sm:$0xf0] }
 0x5f8   : > { %v2271_v35 = vsub.f32 1.5, %v2270_v32  ;;  %v4614_v32 = vor.u32 %v5050_v11, %v4611_v31  ;;  %3014 = vmatpush.bf16.msrb.mxu1 %v4610_v51  ;;  %v4443_v51 = vld [vmem:[%s5564_s27 + $0x20] sm:$0xf0]  ;;  %v4449_v11 = vld [vmem:[%s5564_s27 + $0x8] sm:$0xf] }
 0x5f9   : > { %v2295_v38 = vadd.f32 %v5262_v60, %v2287_v33  ;;  %v4569_v33 = vld [vmem:[%s5564_s27 + $0x100] sm:$0xf]  ;;  %v4446_v31 = vor.u32 %v5009_v22, %v4443_v51  ;;  %v4617_v22 = vld [vmem:[%s5564_s27 + $0x150] sm:$0xf] }
 0x5fa   : > { %v2272_v62 = vmul.f32 %v5341_v28, %v2271_v35  ;;  %v5045_v35 = vld [vmem:[%s5564_s27 + $0x11c] sm:$0xf0] }
 0x5fb   : > { %v2472_v63 = vadd.f32 %v2467_v3, %v2295_v38  ;;  %v4570_v38 = vor.u32 %v5045_v35, %v4569_v33  ;;  %v5010_v33 = vld [vmem:[%s5564_s27 + $0xc] sm:$0xf] }
 0x5fc   : > { %v2276_v41 = vsel %vm2275_vm2, %v5341_v28, %v2272_v62  ;;  %v4603_v28 = vld [vmem:[%s5564_s27 + $0x160] sm:$0xf0]  ;;  %v4451_v35 = vld [vmem:[%s5564_s27 + $0x28] sm:$0xf0] }
 0x5fd   : > { %2478 = vadd.xlane.f32.xlu1 %v2472_v63  ;;  %v2280_v18 = vmul.f32 %v2276_v41, %v6000_v20  ;;  %v4606_v24 = vor.u32 %v5049_v57, %v4603_v28  ;;  %v4571_v62 = vld [vmem:[%s5564_s27 + $0x120] sm:$0xf0]  ;;  %v5046_v41 = vld [vmem:[%s5564_s27 + $0x124] sm:$0xf0]  ;;  %v5013_v28 = vld [vmem:[%s5564_s27 + $0x1c] sm:$0xf0] }
 0x5ff   : > { %v2288_v34 = vmul.f32 %v5261_v37, %v2280_v18  ;;  %v4665_v37 = vld [vmem:[%s5564_s27 + $0x1c0] sm:$0xf] }
 0x600   : > { %v4666_v59 = vor.u32 %v5069_v9, %v4665_v37  ;;  %v4505_v9 = vld [vmem:[%s5564_s27 + $0x80] sm:$0xf] }
 0x601   : > { %v2296_v50 = vadd.f32 %v5262_v60, %v2288_v34  ;;  %v4667_v60 = vld [vmem:[%s5564_s27 + $0x1e0] sm:$0xf0] }
 0x602   : > { %v4670_v1 = vor.u32 %v5065_v55, %v4667_v60  ;;  %2974 = vmatpush.bf16.msra.mxu3 %v4666_v59  ;;  %v5029_v55 = vld [vmem:[%s5564_s27 + $0x9c] sm:$0xf0]  ;;  %v5025_v59 = vld [vmem:[%s5564_s27 + $0x84] sm:$0xf] }
 0x603   : > { %v2473_v6 = vadd.f32 %v2467_v3, %v2296_v50  ;;  %v5041_v3 = vld [vmem:[%s5564_s27 + $0x104] sm:$0xf]  ;;  %v5042_v50 = vld [vmem:[%s5564_s27 + $0x10c] sm:$0xf]  ;;  %v4506_v60 = vor.u32 %v5029_v55, %v4505_v9  ;;  %v4510_v2 = vor.u32 %v5025_v59, %v4507_v36 }
 0x604   : > { %2993 = vmatpush.bf16.msra.mxu0 %v4670_v1  ;;  %v4574_v18 = vor.u32 %v5041_v3, %v4571_v62  ;;  %v5030_v1 = vld [vmem:[%s5564_s27 + $0xa4] sm:$0xf0] }
 0x605   : > { %2480 = vadd.xlane.f32.xlu2 %v2473_v6 }
 0x606   : > { %2975 = vmatpush.bf16.msra.mxu3 %v4634_v10  ;;  %v5017_v10 = vld [vmem:[%s5564_s27 + $0x44] sm:$0xf] }
 0x607   : > { %v4478_v17 = vor.u32 %v5017_v10, %v4475_v13  ;;  %v4691_v10 = vld [vmem:[%s5564_s27 + $0x1f8] sm:$0xf0]  ;;  %v4649_v13 = vld [vmem:[%s5564_s27 + $0x190] sm:$0xf] }
 0x60a   : > { %2976 = vmatpush.bf16.msra.mxu3 %v4602_v46  ;;  %v4441_v46 = vld [vmem:[%s5564_s27] sm:$0xf] }
 0x60e   : > { %2977 = vmatpush.bf16.msra.mxu3 %v4570_v38  ;;  %v4454_v38 = vor.u32 %v5010_v33, %v4451_v35 }
 0x639   : > { %v2475_v58 = vpop.xlane.xlu2 %2474 }
 0x63a   : > { %v2482_v5 = vmul.f32 %v2475_v58, %v5990_v29 }
 0x63c   : > { %v6026_v43 = vsub.f32 %v2470_v40, %v2482_v5  ;;  %v4678_v40 = vor.u32 %v5066_v21, %v4675_v7  ;;  %v4537_v5 = vld [vmem:[%s5564_s27 + $0xc0] sm:$0xf]  ;;  %v4514_v21 = vor.u32 %v5030_v1, %v4513_v61  ;;  %v5026_v7 = vld [vmem:[%s5564_s27 + $0x8c] sm:$0xf]  ;;  %v5071_v61 = vld [vmem:[%s5564_s27 + $0x1ec] sm:$0xf0] }
 0x63d   : > { %v5067_v1 = vld [vmem:[%s5564_s27 + $0x1d4] sm:$0xf] }
 0x63e   : > { %v2490_v23 = vmul.f32 %v6026_v43, %v6026_v43  ;;  %3031 = vmatpush.bf16.msrb.mxu2 %v4678_v40  ;;  %v4515_v40 = vld [vmem:[%s5564_s27 + $0xa8] sm:$0xf0] }
 0x63f   : > { %v4518_v42 = vor.u32 %v5026_v7, %v4515_v40  ;;  %v4689_v7 = vld [vmem:[%s5564_s27 + $0x1d8] sm:$0xf] }
 0x640   : > { %2494 = vadd.xlane.f32.xlu0 %v2490_v23  ;;  %v5037_v23 = vld [vmem:[%s5564_s27 + $0xdc] sm:$0xf0]  ;;  %v5072_v40 = vld [vmem:[%s5564_s27 + $0x1f4] sm:$0xf0] }
 0x641   : > { %v2477_v44 = vpop.xlane.xlu0 %2476 }
 0x642   : > { %v2483_v45 = vmul.f32 %v2477_v44, %v5990_v29  ;;  %3032 = vmatpush.bf16.msrb.mxu2 %v4646_v19  ;;  %v5033_v44 = vld [vmem:[%s5564_s27 + $0xc4] sm:$0xf]  ;;  %v5018_v19 = vld [vmem:[%s5564_s27 + $0x4c] sm:$0xf] }
 0x643   : > { %v4486_v57 = vor.u32 %v5018_v19, %v4483_v25  ;;  %v5064_v19 = vld [vmem:[%s5564_s27 + $0x1b4] sm:$0xf0] }
 0x644   : > { %v6031_v20 = vsub.f32 %v2471_v12, %v2483_v45  ;;  %v4635_v12 = vld [vmem:[%s5564_s27 + $0x1a0] sm:$0xf0]  ;;  %v4538_v45 = vor.u32 %v5037_v23, %v4537_v5 }
 0x645   : > { %v4638_v15 = vor.u32 %v5057_v0, %v4635_v12  ;;  %v5021_v0 = vld [vmem:[%s5564_s27 + $0x5c] sm:$0xf0] }
 0x646   : > { %v2491_v47 = vmul.f32 %v6031_v20, %v6031_v20  ;;  %3033 = vmatpush.bf16.msrb.mxu2 %v4614_v32  ;;  %2978 = vmatpush.bf16.msra.mxu3 %v4538_v45  ;;  %v4474_v12 = vor.u32 %v5021_v0, %v4473_v54  ;;  %v5014_v32 = vld [vmem:[%s5564_s27 + $0x24] sm:$0xf0]  ;;  %v4690_v54 = vor.u32 %v5072_v40, %v4689_v7  ;;  %v5068_v0 = vld [vmem:[%s5564_s27 + $0x1dc] sm:$0xf] }
 0x647   : > { %2994 = vmatpush.bf16.msra.mxu0 %v4638_v15  ;;  %v5022_v15 = vld [vmem:[%s5564_s27 + $0x64] sm:$0xf0]  ;;  %v4450_v3 = vor.u32 %v5014_v32, %v4449_v11  ;;  %v4619_v11 = vld [vmem:[%s5564_s27 + $0x170] sm:$0xf0]  ;;  %v5056_v32 = vld [vmem:[%s5564_s27 + $0x174] sm:$0xf0] }
 0x648   : > { %2496 = vadd.xlane.f32.xlu1 %v2491_v47  ;;  %v4539_v47 = vld [vmem:[%s5564_s27 + $0xe0] sm:$0xf0]  ;;  %v4482_v4 = vor.u32 %v5022_v15, %v4481_v14  ;;  %v5063_v14 = vld [vmem:[%s5564_s27 + $0x1ac] sm:$0xf0]  ;;  %v5059_v15 = vld [vmem:[%s5564_s27 + $0x194] sm:$0xf] }
 0x649   : > { %v5036_v7 = vld [vmem:[%s5564_s27 + $0xdc] sm:$0xf] }
 0x64a   : > { %2979 = vmatpush.bf16.msra.mxu3 %v4506_v60  ;;  %v4563_v40 = vld [vmem:[%s5564_s27 + $0xf8] sm:$0xf0] }
 0x64b   : > { %2995 = vmatpush.bf16.msra.mxu0 %v4606_v24  ;;  %v4442_v24 = vor.u32 %v5013_v28, %v4441_v46  ;;  %v4659_v46 = vld [vmem:[%s5564_s27 + $0x1b8] sm:$0xf0] }
 0x64e   : > { %2980 = vmatpush.bf16.msra.mxu3 %v4474_v12  ;;  %v4694_v12 = vor.u32 %v5068_v0, %v4691_v10  ;;  %v4566_v0 = vor.u32 %v5036_v7, %v4563_v40  ;;  %v5031_v10 = vld [vmem:[%s5564_s27 + $0xac] sm:$0xf0] }
 0x64f   : > { %2996 = vmatpush.bf16.msra.mxu0 %v4574_v18 }
 0x652   : > { %2981 = vmatpush.bf16.msra.mxu3 %v4442_v24  ;;  %v5051_v24 = vld [vmem:[%s5564_s27 + $0x154] sm:$0xf] }
 0x653   : > { %v4622_v35 = vor.u32 %v5051_v24, %v4619_v11  ;;  %v5019_v24 = vld [vmem:[%s5564_s27 + $0x54] sm:$0xf] }
 0x670   : > { %v2479_v48 = vpop.xlane.xlu1 %2478 }
 0x671   : > { %v2484_v49 = vmul.f32 %v2479_v48, %v5990_v29  ;;  %v4545_v48 = vld [vmem:[%s5564_s27 + $0xc8] sm:$0xf] }
 0x673   : > { %v6036_v39 = vsub.f32 %v2472_v63, %v2484_v49  ;;  %v4577_v63 = vld [vmem:[%s5564_s27 + $0x108] sm:$0xf] }
 0x674   : > { %v4578_v34 = vor.u32 %v5046_v41, %v4577_v63  ;;  %v5038_v49 = vld [vmem:[%s5564_s27 + $0xe4] sm:$0xf0] }
 0x675   : > { %v2492_v52 = vmul.f32 %v6036_v39, %v6036_v39 }
 0x676   : > { %3015 = vmatpush.bf16.msrb.mxu1 %v4578_v34 }
 0x677   : > { %2498 = vadd.xlane.f32.xlu2 %v2492_v52  ;;  %v4542_v52 = vor.u32 %v5033_v44, %v4539_v47 }
 0x678   : > { %v2481_v8 = vpop.xlane.xlu2 %2480 }
 0x679   : > { %v2485_v27 = vmul.f32 %v2481_v8, %v5990_v29  ;;  %v4546_v8 = vor.u32 %v5038_v49, %v4545_v48  ;;  %2997 = vmatpush.bf16.msra.mxu0 %v4542_v52  ;;  %v6116_v52 = vld [vmem:[%s927_s28] ss:$0 sm:$0xff] }
 0x67b   : > { %v6041_v56 = vsub.f32 %v2473_v6, %v2485_v27  ;;  %v4579_v6 = vld [vmem:[%s5564_s27 + $0x128] sm:$0xf0]  ;;  %3016 = vmatpush.bf16.msrb.mxu1 %v4546_v8 }
 0x67c   : > { %v4582_v58 = vor.u32 %v5042_v50, %v4579_v6  ;;  %v5034_v27 = vld [vmem:[%s5564_s27 + $0xcc] sm:$0xf] }
 0x67d   : > { %v2493_v53 = vmul.f32 %v6041_v56, %v6041_v56  ;;  %2998 = vmatpush.bf16.msra.mxu0 %v4510_v2 }
 0x67e   : > { %3034 = vmatpush.bf16.msrb.mxu2 %v4582_v58 }
 0x67f   : > { %2500 = vadd.xlane.f32.xlu0 %v2493_v53  ;;  %v4547_v53 = vld [vmem:[%s5564_s27 + $0xe8] sm:$0xf0]  ;;  %3017 = vmatpush.bf16.msrb.mxu1 %v4514_v21  ;;  %v4683_v21 = vld [vmem:[%s5564_s27 + $0x1f0] sm:$0xf0] }
 0x680   : > { %v4550_v37 = vor.u32 %v5034_v27, %v4547_v53 }
 0x681   : > { %2999 = vmatpush.bf16.msra.mxu0 %v4478_v17  ;;  %v4651_v17 = vld [vmem:[%s5564_s27 + $0x1b0] sm:$0xf0] }
 0x682   : > { %3035 = vmatpush.bf16.msrb.mxu2 %v4550_v37  ;;  %v6124_v37 = vld [vmem:[%s930_s21] ss:$0 sm:$0xff]  ;;  %v4654_v25 = vor.u32 %v5059_v15, %v4651_v17  ;;  %v5032_v17 = vld [vmem:[%s5564_s27 + $0xb4] sm:$0xf0]  ;;  %s6462_s21 = sld [smem:[#allocation20_spill]] }
 0x683   : > { %3018 = vmatpush.bf16.msrb.mxu1 %v4482_v4  ;;  %v4657_v4 = vld [vmem:[%s5564_s27 + $0x198] sm:$0xf] }
 0x685   : > { %3000 = vmatpush.bf16.msra.mxu0 %v4446_v31  ;;  %v4625_v31 = vld [vmem:[%s5564_s27 + $0x158] sm:$0xf] }
 0x686   : > { %3036 = vmatpush.bf16.msrb.mxu2 %v4518_v42  ;;  %v4686_v42 = vor.u32 %v5067_v1, %v4683_v21 }
 0x687   : > { %3019 = vmatpush.bf16.msrb.mxu1 %v4450_v3  ;;  %v4626_v3 = vor.u32 %v5056_v32, %v4625_v31  ;;  %v4497_v31 = vld [vmem:[%s5564_s27 + $0x58] sm:$0xf] }
 0x688   : > { %v5024_v32 = vld [vmem:[%s5564_s27 + $0x74] sm:$0xf0]  ;;  %s6463_s26 = scalar_lea.vmem %s6462_s21, %s5518_s2  ;;  %s6466_s2 = sld [smem:[#allocation3_spill]] }
 0x689   : > { %3069 = vmatpush.bf16.msrb.mxu0 %v4686_v42  ;;  %v4521_v42 = vld [vmem:[%s5564_s27 + $0x90] sm:$0xf] }
 0x68a   : > { %3037 = vmatpush.bf16.msrb.mxu2 %v4486_v57  ;;  %v5060_v57 = vld [vmem:[%s5564_s27 + $0x19c] sm:$0xf] }
 0x68b   : > { %3088 = vmatpush.bf16.msra.mxu1 %v4690_v54  ;;  %v4662_v28 = vor.u32 %v5060_v57, %v4659_v46  ;;  %v4531_v57 = vld [vmem:[%s5564_s27 + $0xb8] sm:$0xf0]  ;;  %v4489_v46 = vld [vmem:[%s5564_s27 + $0x50] sm:$0xf] }
 0x68d   : > { %3070 = vmatpush.bf16.msrb.mxu0 %v4654_v25 }
 0x68e   : > { %3038 = vmatpush.bf16.msrb.mxu2 %v4454_v38  ;;  %v5052_v38 = vld [vmem:[%s5564_s27 + $0x15c] sm:$0xf]  ;;  %p4951_p6 = scmp.ne.s32.totalorder %s6466_s2, 1 }
 0x68f   : > { %s6467_s30 = sld [smem:[#allocation24_spill]] (!%p4951_p6) }
 0x691   : > { %3071 = vmatpush.bf16.msrb.mxu0 %v4622_v35 }
 0x692   : > { %3107 = vmatpush.bf16.msra.mxu2 %v4694_v12  ;;  %v5027_v12 = vld [vmem:[%s5564_s27 + $0x94] sm:$0xf] }
 0x696   : > { %3108 = vmatpush.bf16.msra.mxu2 %v4662_v28 }
 0x6b3   : > { %v2495_v16 = vpop.xlane.xlu0 %2494 }
 0x6b4   : > { %v2502_v26 = vmul.f32 %v2495_v16, %v5990_v29  ;;  %v4650_v16 = vor.u32 %v5063_v14, %v4649_v13  ;;  %v4523_v13 = vld [vmem:[%s5564_s27 + $0xb0] sm:$0xf0]  ;;  %v4522_v14 = vor.u32 %v5031_v10, %v4521_v42  ;;  %v5096_v10 = vld [vmem:[%s5575_s3 + $0xb8] sm:$0xff] }
 0x6b5   : > { %v4526_v15 = vor.u32 %v5027_v12, %v4523_v13  ;;  %v5104_v12 = vld [vmem:[%s5575_s3 + $0xf8] sm:$0xff]  ;;  %v5095_v13 = vld [vmem:[%s5575_s3 + $0xb0] sm:$0xff] }
 0x6b6   : > { %v2506_v30 = vadd.f32 1e-05, %v2502_v26  ;;  %v4658_v26 = vor.u32 %v5064_v19, %v4657_v4  ;;  %v5028_v4 = vld [vmem:[%s5564_s27 + $0x9c] sm:$0xf] }
 0x6b8   : > { %5342 = vrsqrt.f32 %v2506_v30  ;;  %vm2516_vm4 = vweird.f32 %v2506_v30  ;;  %3089 = vmatpush.bf16.msra.mxu1 %v4658_v26 }
 0x6bb   : > { %v2497_v62 = vpop.xlane.xlu1 %2496 }
 0x6bc   : > { %v2503_v63 = vmul.f32 %v2497_v62, %v5990_v29  ;;  %v4627_v62 = vld [vmem:[%s5564_s27 + $0x178] sm:$0xf0]  ;;  %3090 = vmatpush.bf16.msra.mxu1 %v4626_v3 }
 0x6bd   : > { %v5020_v3 = vld [vmem:[%s5564_s27 + $0x5c] sm:$0xf] }
 0x6be   : > { %v5343_v41 = vpop.eup %5342  ;;  %v2507_v18 = vadd.f32 1e-05, %v2503_v63 }
 0x6bf   : > { %v2511_v34 = vmul.f32 %v5343_v41, %v2506_v30  ;;  %vm2517_vm3 = vweird.f32 %v5343_v41  ;;  %v5055_v30 = vld [vmem:[%s5564_s27 + $0x16c] sm:$0xf0] }
 0x6c0   : > { %5344 = vrsqrt.f32 %v2507_v18  ;;  %vm2518_vm5 = vmor %vm2516_vm4, %vm2517_vm3  ;;  %vm2526_vm7 = vweird.f32 %v2507_v18  ;;  %v4618_v51 = vor.u32 %v5055_v30, %v4617_v22  ;;  %v4534_v22 = vor.u32 %v5028_v4, %v4531_v57  ;;  %v5023_v30 = vld [vmem:[%s5564_s27 + $0x6c] sm:$0xf0]  ;;  %v5078_v4 = vld [vmem:[%s5575_s3 + $0x28] sm:$0xff] }
 0x6c1   : > { %v2512_v50 = vmul.f32 %v5343_v41, %v2511_v34  ;;  %v5047_v34 = vld [vmem:[%s5564_s27 + $0x12c] sm:$0xf0]  ;;  %v4490_v11 = vor.u32 %v5023_v30, %v4489_v46  ;;  %v5084_v57 = vld [vmem:[%s5575_s3 + $0x58] sm:$0xff] }
 0x6c2   : > { %v5092_v46 = vld [vmem:[%s5575_s3 + $0x98] sm:$0xff]  ;;  %v5083_v30 = vld [vmem:[%s5575_s3 + $0x50] sm:$0xff] }
 0x6c3   : > { %v2513_v6 = vmul.f32 0.5, %v2512_v50  ;;  %v5043_v50 = vld [vmem:[%s5564_s27 + $0x114] sm:$0xf] }
 0x6c5   : > { %v2514_v58 = vsub.f32 1.5, %v2513_v6 }
 0x6c6   : > { %v5345_v5 = vpop.eup %5344 }
 0x6c7   : > { %v2515_v23 = vmul.f32 %v5343_v41, %v2514_v58  ;;  %v2521_v44 = vmul.f32 %v5345_v5, %v2507_v18  ;;  %vm2527_vm6 = vweird.f32 %v5345_v5  ;;  %v4585_v18 = vld [vmem:[%s5564_s27 + $0x110] sm:$0xf] }
 0x6c8   : > { %vm2528_vm8 = vmor %vm2526_vm7, %vm2527_vm6  ;;  %v4586_v58 = vor.u32 %v5047_v34, %v4585_v18  ;;  %v5015_v18 = vld [vmem:[%s5564_s27 + $0x2c] sm:$0xf0]  ;;  %v5011_v34 = vld [vmem:[%s5564_s27 + $0x14] sm:$0xf] }
 0x6c9   : > { %v2522_v45 = vmul.f32 %v5345_v5, %v2521_v44  ;;  %v2519_v47 = vsel %vm2518_vm5, %v5343_v41, %v2515_v23  ;;  %v4630_v41 = vor.u32 %v5052_v38, %v4627_v62  ;;  %v4593_v23 = vld [vmem:[%s5564_s27 + $0x118] sm:$0xf]  ;;  %v4499_v38 = vld [vmem:[%s5564_s27 + $0x78] sm:$0xf0]  ;;  %v4457_v62 = vld [vmem:[%s5564_s27 + $0x10] sm:$0xf] }
 0x6ca   : > { %v2550_v8 = vmul.f32 %v2519_v47, %v6026_v43  ;;  %v5044_v47 = vld [vmem:[%s5564_s27 + $0x11c] sm:$0xf] }
 0x6cb   : > { %v2523_v48 = vmul.f32 0.5, %v2522_v45  ;;  %3109 = vmatpush.bf16.msra.mxu2 %v4630_v41  ;;  %v5048_v45 = vld [vmem:[%s5564_s27 + $0x134] sm:$0xf0]  ;;  %v4502_v41 = vor.u32 %v5020_v3, %v4499_v38  ;;  %v5089_v3 = vld [vmem:[%s5575_s3 + $0x80] sm:$0xff]  ;;  %v5074_v38 = vld [vmem:[%s5575_s3 + $0x8] sm:$0xff] }
 0x6cc   : > { %v2558_v9 = vmul.f32 %v6116_v52, %v2550_v8 }
 0x6cd   : > { %v2524_v49 = vsub.f32 1.5, %v2523_v48  ;;  %v4595_v48 = vld [vmem:[%s5564_s27 + $0x138] sm:$0xf0] }
 0x6ce   : > { %v6130_v59 = vadd.f32 %v6124_v37, %v2558_v9  ;;  %v4598_v8 = vor.u32 %v5044_v47, %v4595_v48  ;;  %v5035_v9 = vld [vmem:[%s5564_s27 + $0xd4] sm:$0xf]  ;;  %v4467_v47 = vld [vmem:[%s5564_s27 + $0x38] sm:$0xf0] }
 0x6cf   : > { %v2525_v27 = vmul.f32 %v5345_v5, %v2524_v49  ;;  %v4594_v49 = vor.u32 %v5048_v45, %v4593_v23  ;;  %v5016_v23 = vld [vmem:[%s5564_s27 + $0x34] sm:$0xf0]  ;;  %v5012_v45 = vld [vmem:[%s5564_s27 + $0x1c] sm:$0xf] }
 0x6d0   : > { %3110 = vmatpush.bf16.msra.mxu2 %v4598_v8 }
 0x6d1   : > { %v2529_v53 = vsel %vm2528_vm8, %v5345_v5, %v2525_v27  ;;  %v4587_v5 = vld [vmem:[%s5564_s27 + $0x130] sm:$0xf0]  ;;  %v4553_v27 = vld [vmem:[%s5564_s27 + $0xd0] sm:$0xf]  ;;  %3091 = vmatpush.bf16.msra.mxu1 %v4594_v49 }
 0x6d2   : > { %v2551_v43 = vmul.f32 %v2529_v53, %v6031_v20  ;;  %v4681_v20 = vld [vmem:[%s5564_s27 + $0x1d0] sm:$0xf]  ;;  %v4590_v44 = vor.u32 %v5043_v50, %v4587_v5  ;;  %v4459_v50 = vld [vmem:[%s5564_s27 + $0x30] sm:$0xf0]  ;;  %v4465_v5 = vld [vmem:[%s5564_s27 + $0x18] sm:$0xf] }
 0x6d3   : > { %v4682_v2 = vor.u32 %v5071_v61, %v4681_v20  ;;  %v5039_v53 = vld [vmem:[%s5564_s27 + $0xec] sm:$0xf0]  ;;  %v4561_v20 = vld [vmem:[%s5564_s27 + $0xd8] sm:$0xf]  ;;  %v4462_v49 = vor.u32 %v5011_v34, %v4459_v50 }
 0x6d4   : > { %v2559_v55 = vmul.f32 %v6116_v52, %v2551_v43  ;;  %3072 = vmatpush.bf16.msrb.mxu0 %v4590_v44  ;;  %v4554_v43 = vor.u32 %v5039_v53, %v4553_v27  ;;  %v5040_v61 = vld [vmem:[%s5564_s27 + $0xf4] sm:$0xf0]  ;;  %3111 = vmatpush.bf16.msra.mxu2 %v4566_v0  ;;  %v4458_v44 = vor.u32 %v5015_v18, %v4457_v62  ;;  %v5098_v62 = vld [vmem:[%s5575_s3 + $0xc8] sm:$0xff] }
 0x6d5   : > { %3050 = vmatpush.bf16.msrb.mxu3 %v4682_v2  ;;  %v4562_v21 = vor.u32 %v5040_v61, %v4561_v20  ;;  %v4466_v27 = vor.u32 %v5016_v23, %v4465_v5  ;;  %v4470_v53 = vor.u32 %v5012_v45, %v4467_v47 }
 0x6d6   : > { %v6133_v60 = vadd.f32 %v6124_v37, %v2559_v55  ;;  %v4555_v55 = vld [vmem:[%s5564_s27 + $0xf0] sm:$0xf0] }
 0x6d7   : > { %v4558_v2 = vor.u32 %v5035_v9, %v4555_v55  ;;  %3092 = vmatpush.bf16.msra.mxu1 %v4562_v21 }
 0x6d8   : > { %v6137_v36 = vpack.c.bf16 %v6133_v60, %v6130_v59  ;;  %3112 = vmatpush.bf16.msra.mxu2 %v4534_v22  ;;  %v5101_v22 = vld [vmem:[%s5575_s3 + $0xe0] sm:$0xff] }
 0x6d9   : > { %3051 = vmatpush.bf16.msrb.mxu3 %v4650_v16  ;;  %3073 = vmatpush.bf16.msrb.mxu0 %v4558_v2  ;;  %v4529_v16 = vld [vmem:[%s5564_s27 + $0x98] sm:$0xf] }
 0x6da   : > { %2982 = vmatmul.bf16.vlgmr.msra.gmra.mxu3 %v6137_v36  ;;  %3001 = vmatmul.bf16.vlgmr.msra.gmra.mxu0 %v6137_v36  ;;  %v4530_v26 = vor.u32 %v5032_v17, %v4529_v16  ;;  %v5086_v16 = vld [vmem:[%s5575_s3 + $0x68] sm:$0xff] }
 0x6db   : > { %3020 = vmatmul.bf16.vlgmr.msrb.gmra.mxu1 %v6137_v36  ;;  %3039 = vmatmul.bf16.vlgmr.msrb.gmra.mxu2 %v6137_v36  ;;  %v5094_v17 = vld [vmem:[%s5575_s3 + $0xa8] sm:$0xff] }
 0x6dc   : > { %3093 = vmatpush.bf16.msra.mxu1 %v4530_v26  ;;  %3113 = vmatpush.bf16.msra.mxu2 %v4502_v41  ;;  %v5093_v26 = vld [vmem:[%s5575_s3 + $0xa0] sm:$0xff] }
 0x6dd   : > { %3052 = vmatpush.bf16.msrb.mxu3 %v4618_v51  ;;  %v4491_v51 = vld [vmem:[%s5564_s27 + $0x70] sm:$0xf0]  ;;  %3074 = vmatpush.bf16.msrb.mxu0 %v4526_v15  ;;  %s6461_s27 = sld [smem:[#allocation8_spill]]  ;;  %v5097_v41 = vld [vmem:[%s5575_s3 + $0xc0] sm:$0xff] }
 0x6de   : > { %v4494_v35 = vor.u32 %v5019_v24, %v4491_v51  ;;  %v5103_v15 = vld [vmem:[%s5575_s3 + $0xf0] sm:$0xff]  ;;  %v5076_v24 = vld [vmem:[%s5575_s3 + $0x18] sm:$0xff] }
 0x6df   : > { %v5100_v51 = vld [vmem:[%s5575_s3 + $0xd8] sm:$0xff] }
 0x6e0   : > { %3114 = vmatpush.bf16.msra.mxu2 %v4470_v53 }
 0x6e1   : > { %3053 = vmatpush.bf16.msrb.mxu3 %v4586_v58  ;;  %3075 = vmatpush.bf16.msrb.mxu0 %v4494_v35  ;;  %v5081_v35 = vld [vmem:[%s5575_s3 + $0x40] sm:$0xff] }
 0x6e3   : > { %v6263_v18 = vld [vmem:[%s6461_s27] sm:$0xff] }
 0x6e4   : > { %3747 = vmatpush.bf16.msrb.mxu2 %v5104_v12  ;;  %v6269_v5 = vperm.slane %v6263_v18, 2  ;;  %v6278_v53 = vperm.slane %v6263_v18, 3 }
 0x6e5   : > { %3054 = vmatpush.bf16.msrb.mxu3 %v4554_v43  ;;  %3076 = vmatpush.bf16.msrb.mxu0 %v4462_v49  ;;  %v6274_v49 = vperm.slane %v6263_v18, 0 }
 0x6e8   : > { %3748 = vmatpush.bf16.msrb.mxu2 %v5103_v15  ;;  %v5128_v15 = vld [vmem:[%s5575_s3 + $0x1b8] sm:$0xff] }
 0x6e9   : > { %3055 = vmatpush.bf16.msrb.mxu3 %v4522_v14  ;;  %v5079_v14 = vld [vmem:[%s5575_s3 + $0x30] sm:$0xff] }
 0x6ea   : > { %v2499_v33 = vpop.xlane.xlu2 %2498 }
 0x6eb   : > { %v2504_v63 = vmul.f32 %v2499_v33, %v5990_v29 }
 0x6ed   : > { %v6171_v6 = vadd.f32 1e-05, %v2504_v63  ;;  %v4498_v63 = vor.u32 %v5024_v32, %v4497_v31  ;;  %3056 = vmatpush.bf16.msrb.mxu3 %v4490_v11  ;;  %v5082_v11 = vld [vmem:[%s5575_s3 + $0x48] sm:$0xff]  ;;  %v5075_v32 = vld [vmem:[%s5575_s3 + $0x10] sm:$0xff] }
 0x6ee   : > { %v5090_v31 = vld [vmem:[%s5575_s3 + $0x88] sm:$0xff] }
 0x6ef   : > { %5346 = vrsqrt.f32 %v6171_v6  ;;  %3094 = vmatpush.bf16.msra.mxu1 %v4498_v63  ;;  %vm2536_vm10 = vweird.f32 %v6171_v6  ;;  %v5073_v63 = vld [vmem:[%s5575_s3] sm:$0xff] }
 0x6f1   : > { %3057 = vmatpush.bf16.msrb.mxu3 %v4458_v44 }
 0x6f2   : > { %v2501_v1 = vpop.xlane.xlu0 %2500 }
 0x6f3   : > { %v2505_v54 = vmul.f32 %v2501_v1, %v5990_v29  ;;  %3095 = vmatpush.bf16.msra.mxu1 %v4466_v27 }
 0x6f5   : > { %v5347_v19 = vpop.eup %5346  ;;  %v2509_v25 = vadd.f32 1e-05, %v2505_v54 }
 0x6f6   : > { %v2531_v28 = vmul.f32 %v5347_v19, %v6171_v6  ;;  %vm2537_vm9 = vweird.f32 %v5347_v19 }
 0x6f7   : > { %5348 = vrsqrt.f32 %v2509_v25  ;;  %vm2538_vm11 = vmor %vm2536_vm10, %vm2537_vm9  ;;  %vm2546_vm13 = vweird.f32 %v2509_v25  ;;  %3728 = vmatpush.bf16.msrb.mxu1 %v5096_v10 }
 0x6f8   : > { %v2532_v33 = vmul.f32 %v5347_v19, %v2531_v28  ;;  %v5077_v28 = vld [vmem:[%s5575_s3 + $0x20] sm:$0xff] }
 0x6fa   : > { %v2533_v58 = vmul.f32 0.5, %v2532_v33  ;;  %v5099_v33 = vld [vmem:[%s5575_s3 + $0xd0] sm:$0xff] }
 0x6fb   : > { %3729 = vmatpush.bf16.msrb.mxu1 %v5095_v13 }
 0x6fc   : > { %v2534_v48 = vsub.f32 1.5, %v2533_v58  ;;  %v6266_v58 = vperm.slane %v6263_v18, 1 }
 0x6fd   : > { %v5349_v8 = vpop.eup %5348 }
 0x6fe   : > { %v2535_v9 = vmul.f32 %v5347_v19, %v2534_v48  ;;  %v2541_v43 = vmul.f32 %v5349_v8, %v2509_v25  ;;  %vm2547_vm12 = vweird.f32 %v5349_v8  ;;  %v5085_v25 = vld [vmem:[%s5575_s3 + $0x60] sm:$0xff] }
 0x6ff   : > { %vm2548_vm14 = vmor %vm2546_vm13, %vm2547_vm12  ;;  %3730 = vmatpush.bf16.msrb.mxu1 %v5094_v17  ;;  %v5127_v17 = vld [vmem:[%s5575_s3 + $0x1b0] sm:$0xff] }
 0x700   : > { %v2542_v55 = vmul.f32 %v5349_v8, %v2541_v43  ;;  %v2539_v20 = vsel %vm2538_vm11, %v5347_v19, %v2535_v9  ;;  %v5102_v19 = vld [vmem:[%s5575_s3 + $0xe8] sm:$0xff] }
 0x701   : > { %v2552_v2 = vmul.f32 %v2539_v20, %v6036_v39  ;;  %3749 = vmatpush.bf16.msrb.mxu2 %v5102_v19  ;;  %v5136_v19 = vld [vmem:[%s5575_s3 + $0x1f8] sm:$0xff] }
 0x702   : > { %v2543_v61 = vmul.f32 0.5, %v2542_v55 }
 0x703   : > { %v2560_v6 = vmul.f32 %v6116_v52, %v2552_v2  ;;  %3731 = vmatpush.bf16.msrb.mxu1 %v5093_v26  ;;  %v5126_v26 = vld [vmem:[%s5575_s3 + $0x1a8] sm:$0xff] }
 0x704   : > { %v2544_v1 = vsub.f32 1.5, %v2543_v61 }
 0x705   : > { %v6219_v54 = vadd.f32 %v6124_v37, %v2560_v6  ;;  %3750 = vmatpush.bf16.msrb.mxu2 %v5101_v22  ;;  %v5125_v22 = vld [vmem:[%s5575_s3 + $0x1a0] sm:$0xff] }
 0x706   : > { %v2545_v21 = vmul.f32 %v5349_v8, %v2544_v1 }
 0x707   : > { %3732 = vmatpush.bf16.msrb.mxu1 %v5092_v46  ;;  %v5135_v46 = vld [vmem:[%s5575_s3 + $0x1f0] sm:$0xff] }
 0x708   : > { %v2549_v7 = vsel %vm2548_vm14, %v5349_v8, %v2545_v21 }
 0x709   : > { %v2553_v40 = vmul.f32 %v2549_v7, %v6041_v56  ;;  %v5088_v56 = vld [vmem:[%s5575_s3 + $0x78] sm:$0xff]  ;;  %3751 = vmatpush.bf16.msrb.mxu2 %v5100_v51 }
 0x70a   : > { %3709 = vmatpush.bf16.msra.mxu0 %v5088_v56  ;;  %v5124_v51 = vld [vmem:[%s5575_s3 + $0x198] sm:$0xff] }
 0x70b   : > { %v2561_v42 = vmul.f32 %v6116_v52, %v2553_v40  ;;  %v5080_v52 = vld [vmem:[%s5575_s3 + $0x38] sm:$0xff] }
 0x70c   : > { %3690 = vmatpush.bf16.msra.mxu3 %v5080_v52 }
 0x70d   : > { %v6222_v39 = vadd.f32 %v6124_v37, %v2561_v42  ;;  %v5087_v37 = vld [vmem:[%s5575_s3 + $0x70] sm:$0xff]  ;;  %3752 = vmatpush.bf16.msrb.mxu2 %v5099_v33 }
 0x70e   : > { %3710 = vmatpush.bf16.msra.mxu0 %v5087_v37  ;;  %v5123_v33 = vld [vmem:[%s5575_s3 + $0x190] sm:$0xff] }
 0x70f   : > { %v2636_v0 = vpack.c.bf16 %v6222_v39, %v6219_v54 }
 0x710   : > { %3691 = vmatpush.bf16.msra.mxu3 %v5079_v14  ;;  %v5120_v14 = vld [vmem:[%s5575_s3 + $0x178] sm:$0xff] }
 0x711   : > { %2987 = vmatmul.bf16.gmra.mxu3 %v2636_v0  ;;  %3006 = vmatmul.bf16.gmra.mxu0 %v2636_v0 }
 0x712   : > { %3025 = vmatmul.bf16.gmra.mxu1 %v2636_v0  ;;  %3044 = vmatmul.bf16.gmra.mxu2 %v2636_v0 }
 0x713   : > { %3711 = vmatpush.bf16.msra.mxu0 %v5086_v16  ;;  %3753 = vmatpush.bf16.msrb.mxu2 %v5098_v62  ;;  %v5119_v16 = vld [vmem:[%s5575_s3 + $0x170] sm:$0xff]  ;;  %v5122_v62 = vld [vmem:[%s5575_s3 + $0x188] sm:$0xff] }
 0x714   : > { %3692 = vmatpush.bf16.msra.mxu3 %v5078_v4  ;;  %v5112_v4 = vld [vmem:[%s5575_s3 + $0x138] sm:$0xff] }
 0x717   : > { %3712 = vmatpush.bf16.msra.mxu0 %v5085_v25  ;;  %3754 = vmatpush.bf16.msrb.mxu2 %v5097_v41  ;;  %v5118_v25 = vld [vmem:[%s5575_s3 + $0x168] sm:$0xff]  ;;  %v5131_v41 = vld [vmem:[%s5575_s3 + $0x1d0] sm:$0xff] }
 0x718   : > { %3693 = vmatpush.bf16.msra.mxu3 %v5077_v28  ;;  %v5117_v28 = vld [vmem:[%s5575_s3 + $0x160] sm:$0xff] }
 0x71b   : > { %3713 = vmatpush.bf16.msra.mxu0 %v5084_v57  ;;  %v5111_v57 = vld [vmem:[%s5575_s3 + $0x130] sm:$0xff] }
 0x71c   : > { %3694 = vmatpush.bf16.msra.mxu3 %v5076_v24  ;;  %v5116_v24 = vld [vmem:[%s5575_s3 + $0x158] sm:$0xff] }
 0x71f   : > { %3714 = vmatpush.bf16.msra.mxu0 %v5083_v30  ;;  %v5110_v30 = vld [vmem:[%s5575_s3 + $0x128] sm:$0xff] }
 0x720   : > { %3695 = vmatpush.bf16.msra.mxu3 %v5075_v32  ;;  %v5115_v32 = vld [vmem:[%s5575_s3 + $0x150] sm:$0xff] }
 0x721   : > { %3058 = vmatmul.bf16.vlgmr.msrb.gmra.mxu3 %v6137_v36  ;;  %3077 = vmatmul.bf16.vlgmr.msrb.gmra.mxu0 %v6137_v36 }
 0x722   : > { %3096 = vmatmul.bf16.vlgmr.msra.gmra.mxu1 %v6137_v36  ;;  %3115 = vmatmul.bf16.vlgmr.msra.gmra.mxu2 %v6137_v36  ;;  %v5091_v36 = vld [vmem:[%s5575_s3 + $0x90] sm:$0xff] }
 0x723   : > { %3733 = vmatpush.bf16.msrb.mxu1 %v5091_v36  ;;  %3715 = vmatpush.bf16.msra.mxu0 %v5082_v11  ;;  %v5134_v36 = vld [vmem:[%s5575_s3 + $0x1e8] sm:$0xff]  ;;  %v5109_v11 = vld [vmem:[%s5575_s3 + $0x120] sm:$0xff] }
 0x724   : > { %3696 = vmatpush.bf16.msra.mxu3 %v5074_v38  ;;  %3823 = vmatpush.bf16.msra.mxu2 %v5136_v19  ;;  %v5114_v38 = vld [vmem:[%s5575_s3 + $0x148] sm:$0xff]  ;;  %v2643_v19 = vperm.slane %v6263_v18, 5 }
 0x727   : > { %3734 = vmatpush.bf16.msrb.mxu1 %v5090_v31  ;;  %3716 = vmatpush.bf16.msra.mxu0 %v5081_v35  ;;  %v5133_v31 = vld [vmem:[%s5575_s3 + $0x1e0] sm:$0xff]  ;;  %v5108_v35 = vld [vmem:[%s5575_s3 + $0x118] sm:$0xff] }
 0x728   : > { %3697 = vmatpush.bf16.msra.mxu3 %v5073_v63  ;;  %3824 = vmatpush.bf16.msra.mxu2 %v5135_v46  ;;  %v5107_v63 = vld [vmem:[%s5575_s3 + $0x110] sm:$0xff] }
 0x72b   : > { %3735 = vmatpush.bf16.msrb.mxu1 %v5089_v3  ;;  %3785 = vmatpush.bf16.msrb.mxu0 %v5120_v14  ;;  %v5132_v3 = vld [vmem:[%s5575_s3 + $0x1d8] sm:$0xff] }
 0x72c   : > { %3766 = vmatpush.bf16.msrb.mxu3 %v5112_v4  ;;  %3825 = vmatpush.bf16.msra.mxu2 %v5134_v36 }
 0x72f   : > { %3804 = vmatpush.bf16.msra.mxu1 %v5128_v15  ;;  %3786 = vmatpush.bf16.msrb.mxu0 %v5119_v16 }
 0x730   : > { %3767 = vmatpush.bf16.msrb.mxu3 %v5111_v57  ;;  %3826 = vmatpush.bf16.msra.mxu2 %v5133_v31 }
 0x731   : > { %3063 = vmatmul.bf16.gmra.mxu3 %v2636_v0  ;;  %3082 = vmatmul.bf16.gmra.mxu0 %v2636_v0 }
 0x732   : > { %3101 = vmatmul.bf16.gmra.mxu1 %v2636_v0  ;;  %3120 = vmatmul.bf16.gmra.mxu2 %v2636_v0 }
 0x733   : > { %3805 = vmatpush.bf16.msra.mxu1 %v5127_v17  ;;  %3787 = vmatpush.bf16.msrb.mxu0 %v5118_v25  ;;  %v2644_v25 = vperm.slane %v6263_v18, 6 }
 0x734   : > { %3768 = vmatpush.bf16.msrb.mxu3 %v5110_v30  ;;  %3827 = vmatpush.bf16.msra.mxu2 %v5132_v3 }
 0x737   : > { %3806 = vmatpush.bf16.msra.mxu1 %v5126_v26  ;;  %3788 = vmatpush.bf16.msrb.mxu0 %v5117_v28 }
 0x738   : > { %3769 = vmatpush.bf16.msrb.mxu3 %v5109_v11  ;;  %3828 = vmatpush.bf16.msra.mxu2 %v5131_v41 }
 0x73b   : > { %3807 = vmatpush.bf16.msra.mxu1 %v5125_v22  ;;  %3789 = vmatpush.bf16.msrb.mxu0 %v5116_v24  ;;  %v2642_v22 = vperm.slane %v6263_v18, 4  ;;  %v2645_v24 = vperm.slane %v6263_v18, 7 }
 0x73c   : > { %3770 = vmatpush.bf16.msrb.mxu3 %v5108_v35 }
 0x73f   : > { %3808 = vmatpush.bf16.msra.mxu1 %v5124_v51  ;;  %3790 = vmatpush.bf16.msrb.mxu0 %v5115_v32 }
 0x740   : > { %3771 = vmatpush.bf16.msrb.mxu3 %v5107_v63 }
 0x743   : > { %3809 = vmatpush.bf16.msra.mxu1 %v5123_v33  ;;  %3791 = vmatpush.bf16.msrb.mxu0 %v5114_v38 }
 0x747   : > { %3810 = vmatpush.bf16.msra.mxu1 %v5122_v62 }
 0x757   : > { %v3002_v34 = vpop.f32.mrf.mxu0 }
 0x758   : > { %v3021_v50 = vpop.f32.mrf.mxu1  ;;  %v3003_v44 = vadd.f32 %v3002_v34, %v6266_v58  ;;  %v5113_v34 = vld [vmem:[%s5575_s3 + $0x140] sm:$0xff] }
 0x759   : > { %v3022_v47 = vadd.f32 %v3021_v50, %v6269_v5  ;;  %v5121_v50 = vld [vmem:[%s5575_s3 + $0x180] sm:$0xff]  ;;  %3792 = vmatpush.bf16.msrb.mxu0 %v5113_v34 }
 0x75a   : > { %v3127_v43 = vmax.f32 %v3003_v44, 0.0  ;;  %3811 = vmatpush.bf16.msra.mxu1 %v5121_v50  ;;  %v5130_v44 = vld [vmem:[%s5575_s3 + $0x1c8] sm:$0xff] }
 0x75b   : > { %v3128_v20 = vmax.f32 %v3022_v47, 0.0  ;;  %3829 = vmatpush.bf16.msra.mxu2 %v5130_v44 }
 0x75d   : > { %v2983_v23 = vpop.f32.mrf.mxu3 }
 0x75e   : > { %v3040_v45 = vpop.f32.mrf.mxu2  ;;  %v2984_v1 = vadd.f32 %v2983_v23, %v6274_v49  ;;  %v5106_v23 = vld [vmem:[%s5575_s3 + $0x108] sm:$0xff] }
 0x75f   : > { %v3004_v48 = vpop.f32.mrf.mxu0  ;;  %v3041_v21 = vadd.f32 %v3040_v45, %v6278_v53  ;;  %3772 = vmatpush.bf16.msrb.mxu3 %v5106_v23 }
 0x760   : > { %v3005_v8 = vadd.f32 %v3004_v48, %v6266_v58  ;;  %v3023_v27 = vpop.f32.mrf.mxu1  ;;  %v3126_v56 = vmax.f32 %v2984_v1, 0.0  ;;  %v5105_v48 = vld [vmem:[%s5575_s3 + $0x100] sm:$0xff] }
 0x761   : > { %v3024_v9 = vadd.f32 %v3023_v27, %v6269_v5  ;;  %v3129_v52 = vmax.f32 %v3041_v21, 0.0 }
 0x762   : > { %v3135_v55 = vmax.f32 %v3005_v8, 0.0  ;;  %v5129_v8 = vld [vmem:[%s5575_s3 + $0x1c0] sm:$0xff] }
 0x763   : > { %v3136_v61 = vmax.f32 %v3024_v9, 0.0  ;;  %3773 = vmatpush.bf16.msrb.mxu3 %v5105_v48  ;;  %3830 = vmatpush.bf16.msra.mxu2 %v5129_v8 }
 0x764   : > { %v3288_v2 = vpack.c.bf16 %v3135_v55, %v3127_v43 }
 0x765   : > { %v3289_v7 = vpack.c.bf16 %v3136_v61, %v3128_v20  ;;  %v2985_v6 = vpop.f32.mrf.mxu3 }
 0x766   : > { %v2986_v40 = vadd.f32 %v2985_v6, %v6274_v49  ;;  %v3042_v42 = vpop.f32.mrf.mxu2  ;;  %3717 = vmatmul.bf16.vlgmr.msra.gmra.mxu0 %v3288_v2 }
 0x767   : > { %v3043_v0 = vadd.f32 %v3042_v42, %v6278_v53  ;;  %3736 = vmatmul.bf16.vlgmr.msrb.gmra.mxu1 %v3289_v7 }
 0x768   : > { %v3134_v10 = vmax.f32 %v2986_v40, 0.0 }
 0x769   : > { %v3137_v12 = vmax.f32 %v3043_v0, 0.0 }
 0x76a   : > { %v3287_v37 = vpack.c.bf16 %v3134_v10, %v3126_v56 }
 0x76b   : > { %v3290_v13 = vpack.c.bf16 %v3137_v12, %v3129_v52 }
 0x76c   : > { %3698 = vmatmul.bf16.vlgmr.msra.gmra.mxu3 %v3287_v37 }
 0x76d   : > { %3755 = vmatmul.bf16.vlgmr.msrb.gmra.mxu2 %v3290_v13 }
 0x78e   : > { %v3007_v45 = vpop.f32.mrf.mxu0 }
 0x78f   : > { %v3026_v47 = vpop.f32.mrf.mxu1  ;;  %v3008_v9 = vadd.f32 %v3007_v45, %v6266_v58 }
 0x790   : > { %v3027_v55 = vadd.f32 %v3026_v47, %v6269_v5 }
 0x791   : > { %v3143_v21 = vmax.f32 %v3008_v9, 0.0 }
 0x792   : > { %v3144_v6 = vmax.f32 %v3027_v55, 0.0 }
 0x794   : > { %v2988_v27 = vpop.f32.mrf.mxu3 }
 0x795   : > { %v3045_v43 = vpop.f32.mrf.mxu2  ;;  %v2989_v42 = vadd.f32 %v2988_v27, %v6274_v49 }
 0x796   : > { %v3009_v20 = vpop.f32.mrf.mxu0  ;;  %v3046_v56 = vadd.f32 %v3045_v43, %v6278_v53 }
 0x797   : > { %v3010_v61 = vadd.f32 %v3009_v20, %v6266_v58  ;;  %v3028_v1 = vpop.f32.mrf.mxu1 }
 0x798   : > { %v3029_v2 = vadd.f32 %v3028_v1, %v6269_v5  ;;  %v3142_v5 = vmax.f32 %v2989_v42, 0.0  ;;  %v3145_v16 = vmax.f32 %v3046_v56, 0.0 }
 0x799   : > { %v3151_v7 = vmax.f32 %v3010_v61, 0.0 }
 0x79a   : > { %v3152_v40 = vmax.f32 %v3029_v2, 0.0 }
 0x79b   : > { %v3296_v0 = vpack.c.bf16 %v3151_v7, %v3143_v21 }
 0x79c   : > { %v2990_v10 = vpop.f32.mrf.mxu3  ;;  %v3297_v52 = vpack.c.bf16 %v3152_v40, %v3144_v6 }
 0x79d   : > { %v2991_v12 = vadd.f32 %v2990_v10, %v6274_v49  ;;  %v3047_v37 = vpop.f32.mrf.mxu2  ;;  %3722 = vmatmul.bf16.gmra.mxu0 %v3296_v0 }
 0x79e   : > { %v3048_v58 = vadd.f32 %v3047_v37, %v6278_v53  ;;  %3741 = vmatmul.bf16.gmra.mxu1 %v3297_v52  ;;  %v3078_v13 = vpop.f32.mrf.mxu0 }
 0x79f   : > { %v3150_v14 = vmax.f32 %v2991_v12, 0.0  ;;  %v3097_v15 = vpop.f32.mrf.mxu1  ;;  %v3079_v57 = vadd.f32 %v3078_v13, %v2643_v19 }
 0x7a0   : > { %v3153_v17 = vmax.f32 %v3048_v58, 0.0  ;;  %v3098_v28 = vadd.f32 %v3097_v15, %v2644_v25 }
 0x7a1   : > { %v3295_v4 = vpack.c.bf16 %v3150_v14, %v3142_v5  ;;  %v3131_v11 = vmax.f32 %v3079_v57, 0.0 }
 0x7a2   : > { %v3298_v26 = vpack.c.bf16 %v3153_v17, %v3145_v16  ;;  %v3132_v32 = vmax.f32 %v3098_v28, 0.0 }
 0x7a3   : > { %3703 = vmatmul.bf16.gmra.mxu3 %v3295_v4 }
 0x7a4   : > { %3760 = vmatmul.bf16.gmra.mxu2 %v3298_v26  ;;  %v3059_v49 = vpop.f32.mrf.mxu3 }
 0x7a5   : > { %v3116_v46 = vpop.f32.mrf.mxu2  ;;  %v3060_v35 = vadd.f32 %v3059_v49, %v2642_v22 }
 0x7a6   : > { %v3080_v53 = vpop.f32.mrf.mxu0  ;;  %v3117_v38 = vadd.f32 %v3116_v46, %v2645_v24 }
 0x7a7   : > { %v3081_v30 = vadd.f32 %v3080_v53, %v2643_v19  ;;  %v3099_v36 = vpop.f32.mrf.mxu1  ;;  %v3130_v44 = vmax.f32 %v3060_v35, 0.0 }
 0x7a8   : > { %v3100_v51 = vadd.f32 %v3099_v36, %v2644_v25  ;;  %v3133_v18 = vmax.f32 %v3117_v38, 0.0  ;;  %v5265_v36 = vld [vmem:[%s6463_s26] ss:$0 sm:$0xff] }
 0x7a9   : > { %v3139_v31 = vmax.f32 %v3081_v30, 0.0 }
 0x7aa   : > { %v3140_v33 = vmax.f32 %v3100_v51, 0.0 }
 0x7ab   : > { %v3292_v3 = vpack.c.bf16 %v3139_v31, %v3131_v11 }
 0x7ac   : > { %v3293_v62 = vpack.c.bf16 %v3140_v33, %v3132_v32  ;;  %v3061_v63 = vpop.f32.mrf.mxu3 }
 0x7ad   : > { %v3062_v41 = vadd.f32 %v3061_v63, %v2642_v22  ;;  %v3118_v34 = vpop.f32.mrf.mxu2  ;;  %3793 = vmatmul.bf16.vlgmr.msrb.gmra.mxu0 %v3292_v3 }
 0x7ae   : > { %v3119_v50 = vadd.f32 %v3118_v34, %v2645_v24  ;;  %3812 = vmatmul.bf16.vlgmr.msra.gmra.mxu1 %v3293_v62  ;;  %v3083_v23 = vpop.f32.mrf.mxu0 }
 0x7af   : > { %v3138_v45 = vmax.f32 %v3062_v41, 0.0  ;;  %v3102_v47 = vpop.f32.mrf.mxu1  ;;  %v3084_v43 = vadd.f32 %v3083_v23, %v2643_v19 }
 0x7b0   : > { %v3141_v48 = vmax.f32 %v3119_v50, 0.0  ;;  %v3103_v20 = vadd.f32 %v3102_v47, %v2644_v25 }
 0x7b1   : > { %v3291_v8 = vpack.c.bf16 %v3138_v45, %v3130_v44  ;;  %v3147_v7 = vmax.f32 %v3084_v43, 0.0 }
 0x7b2   : > { %v3294_v27 = vpack.c.bf16 %v3141_v48, %v3133_v18  ;;  %v3148_v40 = vmax.f32 %v3103_v20, 0.0 }
 0x7b3   : > { %3774 = vmatmul.bf16.vlgmr.msrb.gmra.mxu3 %v3291_v8 }
 0x7b4   : > { %3831 = vmatmul.bf16.vlgmr.msra.gmra.mxu2 %v3294_v27  ;;  %v3064_v9 = vpop.f32.mrf.mxu3 }
 0x7b5   : > { %v3121_v55 = vpop.f32.mrf.mxu2  ;;  %v3065_v0 = vadd.f32 %v3064_v9, %v2642_v22 }
 0x7b6   : > { %v3085_v61 = vpop.f32.mrf.mxu0  ;;  %v3122_v10 = vadd.f32 %v3121_v55, %v2645_v24 }
 0x7b7   : > { %v3086_v1 = vadd.f32 %v3085_v61, %v2643_v19  ;;  %v3104_v2 = vpop.f32.mrf.mxu1  ;;  %v3146_v5 = vmax.f32 %v3065_v0, 0.0 }
 0x7b8   : > { %v3105_v21 = vadd.f32 %v3104_v2, %v2644_v25  ;;  %v3149_v15 = vmax.f32 %v3122_v10, 0.0 }
 0x7b9   : > { %v3155_v6 = vmax.f32 %v3086_v1, 0.0 }
 0x7ba   : > { %v3156_v42 = vmax.f32 %v3105_v21, 0.0 }
 0x7bb   : > { %v3300_v56 = vpack.c.bf16 %v3155_v6, %v3147_v7 }
 0x7bc   : > { %v3301_v52 = vpack.c.bf16 %v3156_v42, %v3148_v40  ;;  %v3066_v12 = vpop.f32.mrf.mxu3 }
 0x7bd   : > { %v3067_v37 = vadd.f32 %v3066_v12, %v2642_v22  ;;  %v3123_v58 = vpop.f32.mrf.mxu2  ;;  %3798 = vmatmul.bf16.gmra.mxu0 %v3300_v56 }
 0x7be   : > { %v3124_v13 = vadd.f32 %v3123_v58, %v2645_v24  ;;  %3817 = vmatmul.bf16.gmra.mxu1 %v3301_v52 }
 0x7bf   : > { %v3154_v14 = vmax.f32 %v3067_v37, 0.0 }
 0x7c0   : > { %v3157_v16 = vmax.f32 %v3124_v13, 0.0 }
 0x7c1   : > { %v3299_v17 = vpack.c.bf16 %v3154_v14, %v3146_v5 }
 0x7c2   : > { %v3302_v4 = vpack.c.bf16 %v3157_v16, %v3149_v15 }
 0x7c3   : > { %3779 = vmatmul.bf16.gmra.mxu3 %v3299_v17 }
 0x7c4   : > { %3836 = vmatmul.bf16.gmra.mxu2 %v3302_v4 }
 0x7e3   : > { %v3718_v19 = vpop.f32.mrf.mxu0 }
 0x7e4   : > { %v3737_v25 = vpop.f32.mrf.mxu1 }
 0x7eb   : > { %v3720_v57 = vpop.f32.mrf.mxu0 }
 0x7ec   : > { %v3739_v46 = vpop.f32.mrf.mxu1 }
 0x7ef   : > { %v3699_v26 = vpop.f32.mrf.mxu3 }
 0x7f0   : > { %v3756_v49 = vpop.f32.mrf.mxu2  ;;  %v3700_v31 = vadd.f32 %v5265_v36, %v3699_v26 }
 0x7f2   : > { %v3719_v33 = vadd.f32 %v3718_v19, %v3700_v31 }
 0x7f4   : > { %v3738_v38 = vadd.f32 %v3737_v25, %v3719_v33 }
 0x7f6   : > { %v3757_v34 = vadd.f32 %v3756_v49, %v3738_v38 }
 0x7f7   : > { %v3701_v28 = vpop.f32.mrf.mxu3 }
 0x7f8   : > { %v3758_v22 = vpop.f32.mrf.mxu2  ;;  %v3702_v62 = vadd.f32 %v5265_v36, %v3701_v28 }
 0x7fa   : > { %v3721_v50 = vadd.f32 %v3720_v57, %v3702_v62 }
 0x7fc   : > { %v3740_v47 = vadd.f32 %v3739_v46, %v3721_v50 }
 0x7fe   : > { %v3759_v9 = vadd.f32 %v3758_v22, %v3740_v47 }
 0x81a   : > { %v3723_v53 = vpop.f32.mrf.mxu0 }
 0x81b   : > { %v3742_v30 = vpop.f32.mrf.mxu1 }
 0x822   : > { %v3725_v11 = vpop.f32.mrf.mxu0 }
 0x823   : > { %v3744_v32 = vpop.f32.mrf.mxu1 }
 0x826   : > { %v3704_v24 = vpop.f32.mrf.mxu3 }
 0x827   : > { %v3761_v51 = vpop.f32.mrf.mxu2  ;;  %v3705_v18 = vadd.f32 %v5265_v36, %v3704_v24 }
 0x829   : > { %v3724_v43 = vadd.f32 %v3723_v53, %v3705_v18 }
 0x82a   : > { %v3794_v63 = vpop.f32.mrf.mxu0 }
 0x82b   : > { %v3813_v41 = vpop.f32.mrf.mxu1  ;;  %v3743_v7 = vadd.f32 %v3742_v30, %v3724_v43 }
 0x82d   : > { %v3762_v0 = vadd.f32 %v3761_v51, %v3743_v7 }
 0x82e   : > { %v3706_v35 = vpop.f32.mrf.mxu3 }
 0x82f   : > { %v3763_v3 = vpop.f32.mrf.mxu2  ;;  %v3707_v6 = vadd.f32 %v5265_v36, %v3706_v35 }
 0x831   : > { %v3726_v56 = vadd.f32 %v3725_v11, %v3707_v6  ;;  %v5267_v6 = vld [vmem:[%s936_s18] ss:$0 sm:$0xff] }
 0x832   : > { %v3796_v27 = vpop.f32.mrf.mxu0 }
 0x833   : > { %v3815_v20 = vpop.f32.mrf.mxu1  ;;  %v3745_v5 = vadd.f32 %v3744_v32, %v3726_v56 }
 0x835   : > { %v3764_v16 = vadd.f32 %v3763_v3, %v3745_v5 }
 0x836   : > { %v3775_v23 = vpop.f32.mrf.mxu3 }
 0x837   : > { %v3776_v44 = vadd.f32 %v3775_v23, %v3757_v34  ;;  %v3832_v45 = vpop.f32.mrf.mxu2 }
 0x839   : > { %v3795_v48 = vadd.f32 %v3794_v63, %v3776_v44 }
 0x83a   : > { %v3799_v52 = vpop.f32.mrf.mxu0 }
 0x83b   : > { %v3814_v8 = vadd.f32 %v3813_v41, %v3795_v48  ;;  %v3818_v13 = vpop.f32.mrf.mxu1 }
 0x83d   : > { %v3833_v55 = vadd.f32 %v3832_v45, %v3814_v8 }
 0x83e   : > { %v3777_v61 = vpop.f32.mrf.mxu3 }
 0x83f   : > { %v3778_v1 = vadd.f32 %v3777_v61, %v3759_v9  ;;  %v3842_v2 = vadd.f32 %v3833_v55, %v6130_v59  ;;  %v3834_v21 = vpop.f32.mrf.mxu2 }
 0x841   : > { %v3797_v40 = vadd.f32 %v3796_v27, %v3778_v1  ;;  %3846 = vadd.xlane.f32.xlu1 %v3842_v2 }
 0x842   : > { %v3801_v26 = vpop.f32.mrf.mxu0 }
 0x843   : > { %v3816_v42 = vadd.f32 %v3815_v20, %v3797_v40  ;;  %v3820_v57 = vpop.f32.mrf.mxu1 }
 0x845   : > { %v3835_v10 = vadd.f32 %v3834_v21, %v3816_v42 }
 0x846   : > { %v3780_v12 = vpop.f32.mrf.mxu3 }
 0x847   : > { %v3781_v37 = vadd.f32 %v3780_v12, %v3762_v0  ;;  %v3843_v58 = vadd.f32 %v3835_v10, %v6133_v60  ;;  %v3837_v15 = vpop.f32.mrf.mxu2 }
 0x849   : > { %v3800_v14 = vadd.f32 %v3799_v52, %v3781_v37  ;;  %3848 = vadd.xlane.f32.xlu2 %v3843_v58 }
 0x84b   : > { %v3819_v59 = vadd.f32 %v3818_v13, %v3800_v14 }
 0x84d   : > { %v3838_v17 = vadd.f32 %v3837_v15, %v3819_v59 }
 0x84e   : > { %v3782_v4 = vpop.f32.mrf.mxu3 }
 0x84f   : > { %v3783_v19 = vadd.f32 %v3782_v4, %v3764_v16  ;;  %v3844_v25 = vadd.f32 %v3838_v17, %v6219_v54  ;;  %v3839_v28 = vpop.f32.mrf.mxu2 }
 0x851   : > { %v3802_v49 = vadd.f32 %v3801_v26, %v3783_v19  ;;  %3850 = vadd.xlane.f32.xlu0 %v3844_v25 }
 0x853   : > { %v3821_v46 = vadd.f32 %v3820_v57, %v3802_v49 }
 0x855   : > { %v3840_v53 = vadd.f32 %v3839_v28, %v3821_v46 }
 0x857   : > { %v3845_v60 = vadd.f32 %v3840_v53, %v6222_v39 }
 0x859   : > { %3852 = vadd.xlane.f32.xlu1 %v3845_v60 }
 0x8b4   : > { %v3847_v22 = vpop.xlane.xlu1 %3846 }
 0x8b5   : > { %v3854_v30 = vmul.f32 %v3847_v22, %v5990_v29 }
 0x8b7   : > { %v3858_v36 = vsub.f32 %v3842_v2, %v3854_v30  ;;  %v5266_v2 = vld [vmem:[%s933_s20] ss:$0 sm:$0xff] }
 0x8b9   : > { %v3862_v24 = vmul.f32 %v3858_v36, %v3858_v36 }
 0x8bb   : > { %3866 = vadd.xlane.f32.xlu2 %v3862_v24 }
 0x8bc   : > { %v3849_v51 = vpop.xlane.xlu2 %3848 }
 0x8bd   : > { %v3855_v11 = vmul.f32 %v3849_v51, %v5990_v29 }
 0x8bf   : > { %v3859_v54 = vsub.f32 %v3843_v58, %v3855_v11 }
 0x8c1   : > { %v3863_v31 = vmul.f32 %v3859_v54, %v3859_v54 }
 0x8c3   : > { %3868 = vadd.xlane.f32.xlu0 %v3863_v31 }
 0x8c4   : > { %v3851_v32 = vpop.xlane.xlu0 %3850 }
 0x8c5   : > { %v3856_v33 = vmul.f32 %v3851_v32, %v5990_v29 }
 0x8c7   : > { %v6341_v35 = vsub.f32 %v3844_v25, %v3856_v33 }
 0x8c9   : > { %v3864_v39 = vmul.f32 %v6341_v35, %v6341_v35 }
 0x8cb   : > { %3870 = vadd.xlane.f32.xlu1 %v3864_v39 }
 0x8cc   : > { %v3853_v3 = vpop.xlane.xlu1 %3852 }
 0x8cd   : > { %v3857_v38 = vmul.f32 %v3853_v3, %v5990_v29 }
 0x8cf   : > { %v6346_v62 = vsub.f32 %v3845_v60, %v3857_v38 }
 0x8d1   : > { %v3865_v63 = vmul.f32 %v6346_v62, %v6346_v62 }
 0x8d3   : > { %3872 = vadd.xlane.f32.xlu2 %v3865_v63 }
 0x92e   : > { %v3867_v41 = vpop.xlane.xlu2 %3866 }
 0x92f   : > { %v3874_v34 = vmul.f32 %v3867_v41, %v5990_v29 }
 0x931   : > { %v3878_v50 = vadd.f32 1e-05, %v3874_v34 }
 0x933   : > { %5350 = vrsqrt.f32 %v3878_v50  ;;  %vm3888_vm0 = vweird.f32 %v3878_v50 }
 0x936   : > { %v3869_v23 = vpop.xlane.xlu0 %3868 }
 0x937   : > { %v3875_v44 = vmul.f32 %v3869_v23, %v5990_v29 }
 0x939   : > { %v5351_v45 = vpop.eup %5350  ;;  %v3879_v47 = vadd.f32 1e-05, %v3875_v44 }
 0x93a   : > { %v3883_v18 = vmul.f32 %v5351_v45, %v3878_v50  ;;  %vm3889_vm15 = vweird.f32 %v5351_v45 }
 0x93b   : > { %5352 = vrsqrt.f32 %v3879_v47  ;;  %vm3890_vm1 = vmor %vm3888_vm0, %vm3889_vm15  ;;  %vm3898_vm3 = vweird.f32 %v3879_v47 }
 0x93c   : > { %v3884_v48 = vmul.f32 %v5351_v45, %v3883_v18 }
 0x93e   : > { %v3885_v8 = vmul.f32 0.5, %v3884_v48  ;;  %v3871_v27 = vpop.xlane.xlu1 %3870 }
 0x93f   : > { %v3876_v9 = vmul.f32 %v3871_v27, %v5990_v29 }
 0x940   : > { %v3886_v43 = vsub.f32 1.5, %v3885_v8 }
 0x941   : > { %v5353_v55 = vpop.eup %5352  ;;  %v3880_v20 = vadd.f32 1e-05, %v3876_v9 }
 0x942   : > { %v3887_v61 = vmul.f32 %v5351_v45, %v3886_v43  ;;  %v3893_v1 = vmul.f32 %v5353_v55, %v3879_v47  ;;  %vm3899_vm2 = vweird.f32 %v5353_v55 }
 0x943   : > { %5354 = vrsqrt.f32 %v3880_v20  ;;  %vm3900_vm4 = vmor %vm3898_vm3, %vm3899_vm2  ;;  %vm3908_vm6 = vweird.f32 %v3880_v20 }
 0x944   : > { %v3891_v21 = vsel %vm3890_vm1, %v5351_v45, %v3887_v61  ;;  %v3894_v7 = vmul.f32 %v5353_v55, %v3893_v1 }
 0x945   : > { %v3922_v40 = vmul.f32 %v3891_v21, %v3858_v36 }
 0x946   : > { %v3895_v42 = vmul.f32 0.5, %v3894_v7  ;;  %v3873_v0 = vpop.xlane.xlu2 %3872 }
 0x947   : > { %v3930_v56 = vmul.f32 %v5266_v2, %v3922_v40  ;;  %v3877_v10 = vmul.f32 %v3873_v0, %v5990_v29 }
 0x948   : > { %v3896_v52 = vsub.f32 1.5, %v3895_v42 }
 0x949   : > { %v5355_v12 = vpop.eup %5354  ;;  %v3938_v37 = vadd.f32 %v5267_v6, %v3930_v56  ;;  %v3881_v58 = vadd.f32 1e-05, %v3877_v10 }
 0x94a   : > { %v3897_v13 = vmul.f32 %v5353_v55, %v3896_v52  ;;  %v3903_v5 = vmul.f32 %v5355_v12, %v3880_v20  ;;  %vm3909_vm5 = vweird.f32 %v5355_v12 }
 0x94b   : > { %3942 = vst [vmem:[#allocation2 + $0x10] sm:$0xff] %v3938_v37  ;;  %5356 = vrsqrt.f32 %v3881_v58  ;;  %vm3910_vm7 = vmor %vm3908_vm6, %vm3909_vm5  ;;  %vm3918_vm9 = vweird.f32 %v3881_v58 }
 0x94c   : > { %v3901_v14 = vsel %vm3900_vm4, %v5353_v55, %v3897_v13  ;;  %v3904_v15 = vmul.f32 %v5355_v12, %v3903_v5 }
 0x94d   : > { %v3923_v59 = vmul.f32 %v3901_v14, %v3859_v54 }
 0x94e   : > { %v3905_v16 = vmul.f32 0.5, %v3904_v15 }
 0x94f   : > { %v3931_v17 = vmul.f32 %v5266_v2, %v3923_v59 }
 0x950   : > { %v3906_v4 = vsub.f32 1.5, %v3905_v16 }
 0x951   : > { %v5357_v19 = vpop.eup %5356  ;;  %v3939_v29 = vadd.f32 %v5267_v6, %v3931_v17 }
 0x952   : > { %v3907_v25 = vmul.f32 %v5355_v12, %v3906_v4  ;;  %v3913_v26 = vmul.f32 %v5357_v19, %v3881_v58  ;;  %vm3919_vm8 = vweird.f32 %v5357_v19 }
 0x953   : > { %3943 = vst [vmem:[#allocation2] sm:$0xff] %v3939_v29  ;;  %vm3920_vm10 = vmor %vm3918_vm9, %vm3919_vm8 }
 0x954   : > { %v3911_v49 = vsel %vm3910_vm7, %v5355_v12, %v3907_v25  ;;  %v3914_v57 = vmul.f32 %v5357_v19, %v3913_v26 }
 0x955   : > { %v3924_v46 = vmul.f32 %v3911_v49, %v6341_v35 }
 0x956   : > { %v3915_v28 = vmul.f32 0.5, %v3914_v57 }
 0x957   : > { %v3932_v53 = vmul.f32 %v5266_v2, %v3924_v46 }
 0x958   : > { %v3916_v60 = vsub.f32 1.5, %v3915_v28 }
 0x959   : > { %v3940_v22 = vadd.f32 %v5267_v6, %v3932_v53 }
 0x95a   : > { %v3917_v30 = vmul.f32 %v5357_v19, %v3916_v60 }
 0x95b   : > { %3944 = vst [vmem:[#allocation2 + $0x18] sm:$0xff] %v3940_v22 }
 0x95c   : > { %v3921_v36 = vsel %vm3920_vm10, %v5357_v19, %v3917_v30 }
 0x95d   : > { %v3925_v24 = vmul.f32 %v3921_v36, %v6346_v62 }
 0x95f   : > { %v3933_v51 = vmul.f32 %v5266_v2, %v3925_v24  ;;  %3949 = sbr.rel (%p4951_p6) target bundleno = 2412 (0x96c), region = 108 }
 0x961   : > { %v3941_v11 = vadd.f32 %v5267_v6, %v3933_v51 }
 0x963   : > { %3945 = vst [vmem:[#allocation2 + $0x8] sm:$0xff] %v3941_v11 }
 0x964   : > { %v3950_v54 = vld [vmem:[#allocation2 + $0x10] sm:$0xff]  ;;  %v3951_v31 = vld [vmem:[#allocation2] sm:$0xff]  ;;  %v3952_v32 = vld [vmem:[#allocation2 + $0x18] sm:$0xff] }
 0x965   : > { %3954 = vst [vmem:[%s6467_s30] sm:$0xff] %v3950_v54 }
 0x966   : > { %3955 = vst [vmem:[%s6467_s30 + $0x8] sm:$0xff] %v3951_v31 }
 0x967   : > { %3956 = vst [vmem:[%s6467_s30 + $0x10] sm:$0xff] %v3952_v32 }
 0x96a   : > { %v3953_v33 = vld [vmem:[#allocation2 + $0x8] sm:$0xff] }
 0x96b   : > { %3957 = vst [vmem:[%s6467_s30 + $0x18] sm:$0xff] %v3953_v33 }
 0x96c PF: > { %s6468_s1 = sld [smem:[#allocation5_spill]] }
 0x96d   : > { %s6470_s22 = sld [smem:[#allocation6_spill]] }
 0x972   : > { %s30_s23 = sadd.s32 1, %s6468_s1   ;;  %s6469_s1 = sld [smem:[#allocation4_spill]] }
 0x973   : > { %p27_p7 = scmp.ge.s32.totalorder %s30_s23, 4  }
 0x975   :  { %29 = sbr.rel (!%p27_p7) target bundleno = 17 (0x11), region = 193 }

</bundles_post_ra>
